<compile_context>
chip_gen: v7x
topology: tpu7x:2x2x1
jax: 0.10.0
libtpu: 0.0.40
codegen_flags: <defaults>
</compile_context>

<pallas_src>
import numpy as np
import jax
import jax.numpy as jnp
from jax.experimental import pallas as pl
from jax.experimental.pallas import tpu as pltpu

# ------------------------- model dimensions (small) -------------------------
VOCAB = 50            # vocab_size
VOCAB_PAD = 64        # vocab rows zero-padded for the in-kernel one-hot dot
E = 32                # word_embed_dim
H = 32                # word_hidden_dim  -> conv channels C = 2H = 64
C = 2 * H
T = 8                 # tag_num
N_CONV = 4
BN_EPS = 1e-5

# batch geometry for the example: 8 sequences x 64 tokens = 512 flattened rows
B = 8
S = 64                # power of two: pos-within-seq uses a bitwise AND
BS = B * S
M_TILE = 256          # rows (matmul M) per grid step; must be a multiple of S
N_TILES = BS // M_TILE

# packed small-vector aux buffer layout (f32, (16,128))
AUX_ROWS = 16
AUX_W2CB = 0                       # word2cnn bias            row 0
AUX_CONVB = 1                      # conv bias (BN-scaled)    rows 1..4
AUX_BNSHIFT = 1 + N_CONV           # BN shift                 rows 5..8
AUX_H2TB = 1 + 2 * N_CONV          # hidden2tag bias          row 9


# ------------------------------- Pallas kernel ------------------------------
def ner_kernel(idx_ref, mask_ref, emb_w2c_ref, conv_w_ref, h2t_w_ref, aux_ref,
               out_ref):
    M = idx_ref.shape[0]                                           # M_TILE rows

    # -- embedding gather + word2cnn fused into ONE bf16 MXU matmul:
    #    h = tanh(onehot(idx) @ (emb_pad @ w2c_w) + w2c_b)
    idx = idx_ref[...]                                             # (M,1) i32
    vocab_ids = jax.lax.broadcasted_iota(jnp.int32, (M, VOCAB_PAD), 1)
    onehot = (vocab_ids == idx).astype(jnp.bfloat16)               # (M,64)
    h = jnp.tanh(
        jnp.dot(onehot, emb_w2c_ref[...], preferred_element_type=jnp.float32)
        + aux_ref[AUX_W2CB:AUX_W2CB + 1, 0:C])                     # (M,C) f32

    # -- sequence-edge masks, hoisted out of the conv loop.
    #    M_TILE % S == 0 so the tile-local row index gives pos-within-seq;
    #    S is a power of two so `& (S-1)` == `% S` (asserted in the wrapper).
    row = jax.lax.broadcasted_iota(jnp.int32, (M, C), 0)
    pos = jnp.bitwise_and(row, S - 1)
    first_row = pos == 0
    last_row = pos == S - 1

    # -- 4 x [Conv1d(k=3,pad=1) -> ReLU -> Dropout(id) -> BatchNorm1d(eval)]
    #    BN scale is folded into conv weights/bias (scale > 0 commutes with
    #    ReLU).  Each layer = 3 accumulated bf16 dots on the shifted taps
    #    (no staging scratch); roll wrap-around is neutralized by the masks.
    for l in range(N_CONV):
        prev = jnp.where(first_row, 0.0, pltpu.roll(h, 1, 0)).astype(jnp.bfloat16)
        nxt = jnp.where(last_row, 0.0, pltpu.roll(h, M - 1, 0)).astype(jnp.bfloat16)
        cur = h.astype(jnp.bfloat16)
        y = (jnp.dot(prev, conv_w_ref[3 * l + 0], preferred_element_type=jnp.float32)
             + jnp.dot(cur, conv_w_ref[3 * l + 1], preferred_element_type=jnp.float32)
             + jnp.dot(nxt, conv_w_ref[3 * l + 2], preferred_element_type=jnp.float32)
             + aux_ref[AUX_CONVB + l:AUX_CONVB + l + 1, 0:C])      # (M,C) f32
        y = jnp.maximum(y, 0.0)                                    # ReLU
        h = y + aux_ref[AUX_BNSHIFT + l:AUX_BNSHIFT + l + 1, 0:C]  # BN shift

    # -- hidden2tag
    logits = (jnp.dot(h.astype(jnp.bfloat16), h2t_w_ref[...],
                      preferred_element_type=jnp.float32)
              + aux_ref[AUX_H2TB:AUX_H2TB + 1, 0:T])               # (M,T)

    # -- first-index argmax over tags (torch.max tie-break), masked
    m = jnp.max(logits, axis=-1, keepdims=True)                    # (M,1)
    tag_ids = jax.lax.broadcasted_iota(jnp.int32, (M, T), 1)
    tag = jnp.min(jnp.where(logits == m, tag_ids, jnp.int32(T)),
                  axis=-1, keepdims=True)                          # (M,1) i32
    out_ref[...] = tag * mask_ref[...]


# --------------------------------- wrapper -----------------------------------
@jax.jit
def ner_forward(word_inputs, word_seq_lengths, char_inputs, batch_label, mask,
                params):
    """Mirrors NamedEntityRecog.forward for the CNN / no-CRF / no-char config."""
    del word_seq_lengths, char_inputs, batch_label  # unused in this config
    assert S & (S - 1) == 0, "kernel uses a bitwise AND for pos-within-seq"
    assert BS % M_TILE == 0 and M_TILE % S == 0

    idx_col = word_inputs.astype(jnp.int32).reshape(BS, 1)
    mask_col = mask.astype(jnp.int32).reshape(BS, 1)

    def full(*dims):  # whole-array block, grid-invariant
        return pl.BlockSpec(dims, lambda i: (0,) * len(dims))

    out = pl.pallas_call(
        ner_kernel,
        grid=(N_TILES,),
        in_specs=[
            pl.BlockSpec((M_TILE, 1), lambda i: (i, 0)),   # word ids (row tile)
            pl.BlockSpec((M_TILE, 1), lambda i: (i, 0)),   # mask     (row tile)
            full(VOCAB_PAD, C),                            # emb @ w2c   (bf16)
            full(3 * N_CONV, C, C),                        # conv weights(bf16)
            full(C, T),                                    # hidden2tag  (bf16)
            full(AUX_ROWS, 128),                           # packed biases (f32)
        ],
        out_specs=pl.BlockSpec((M_TILE, 1), lambda i: (i, 0)),
        out_shape=jax.ShapeDtypeStruct((BS, 1), jnp.int32),
        compiler_params=pltpu.CompilerParams(
            dimension_semantics=("parallel",)),
    )(idx_col, mask_col, params["emb_w2c"], params["conv_w_k"],
      params["h2t_w_bf16"], params["aux"])
    return out.reshape(B, S)                               # (B, S) int32


# -------------------------- deterministic parameters ------------------------
def init_params(key):
    ks = jax.random.split(key, 8)
    emb_scale = np.sqrt(3.0 / E)
    emb = jax.random.uniform(ks[0], (VOCAB, E), jnp.float32,
                             -emb_scale, emb_scale)
    emb = emb.at[0].set(0.0)                               # padding_idx=0

    lin_b = 1.0 / np.sqrt(E)
    w2c_w = jax.random.uniform(ks[1], (E, C), jnp.float32, -lin_b, lin_b)
    w2c_b = jax.random.uniform(ks[2], (1, C), jnp.float32, -lin_b, lin_b)

    conv_bound = 1.0 / np.sqrt(C * 3)
    conv_w = jax.random.uniform(ks[3], (N_CONV, 3, C, C), jnp.float32,
                                -conv_bound, conv_bound)
    conv_b = jax.random.uniform(ks[4], (N_CONV, 1, C), jnp.float32,
                                -conv_bound, conv_bound)

    # BatchNorm1d eval, default stats: gamma=1, beta=0, mean=0, var=1
    bn_scale = jnp.full((N_CONV, 1, C), 1.0 / np.sqrt(1.0 + BN_EPS), jnp.float32)
    bn_shift = jnp.zeros((N_CONV, 1, C), jnp.float32)

    h2t_bound = 1.0 / np.sqrt(C)
    h2t_w = jax.random.uniform(ks[5], (C, T), jnp.float32, -h2t_bound, h2t_bound)
    h2t_b = jax.random.uniform(ks[6], (1, T), jnp.float32, -h2t_bound, h2t_bound)

    # ---- kernel-ready folded / packed views, built once at init ----
    # 1) fold Embedding into word2cnn: onehot @ (emb_pad @ w2c_w)
    emb_pad = jnp.zeros((VOCAB_PAD, E), jnp.float32).at[:VOCAB].set(emb)
    emb_w2c = jnp.dot(emb_pad, w2c_w)                      # (VOCAB_PAD, C)
    # 2) fold BN scale (>0) through ReLU into conv weights/bias
    conv_w_s = conv_w * bn_scale[:, None, :, :]            # scale output channel
    conv_b_s = conv_b * bn_scale
    conv_w_k = conv_w_s.reshape(N_CONV * 3, C, C)
    # 3) pack the small vectors into one (16,128) f32 aux buffer (1 DMA)
    aux = jnp.zeros((AUX_ROWS, 128), jnp.float32)
    aux = aux.at[AUX_W2CB, 0:C].set(w2c_b[0])
    aux = aux.at[AUX_CONVB:AUX_CONVB + N_CONV, 0:C].set(conv_b_s[:, 0, :])
    aux = aux.at[AUX_BNSHIFT:AUX_BNSHIFT + N_CONV, 0:C].set(bn_shift[:, 0, :])
    aux = aux.at[AUX_H2TB, 0:T].set(h2t_b[0])

    return dict(
        # kernel operands (bf16 matmul weights, f32 aux)
        emb_w2c=emb_w2c.astype(jnp.bfloat16),
        conv_w_k=conv_w_k.astype(jnp.bfloat16),
        h2t_w_bf16=h2t_w.astype(jnp.bfloat16),
        aux=aux,
        # pieces kept for the pure-JAX reference
        w2c_b=w2c_b, conv_b_s=conv_b_s, bn_shift=bn_shift, h2t_b=h2t_b,
    )


# ------------------------------ pure-JAX reference --------------------------
def ner_reference(word_inputs, mask, p):
    """Module-structured reference (per-sequence conv with explicit zero pads),
    using the same folded parameters and bf16 matmul precision as the kernel.
    The folds (emb@w2c, BN-scale-through-ReLU) are mathematically exact."""
    bf = jnp.bfloat16
    x = p["emb_w2c"][word_inputs].astype(jnp.float32)      # (B,S,C) gather
    h = jnp.tanh(x + p["w2c_b"][0])
    w = p["conv_w_k"]                                      # (3*N_CONV, C, C) bf16
    for l in range(N_CONV):
        zp = jnp.zeros((B, 1, C), h.dtype)
        prev = jnp.concatenate([zp, h[:, :-1, :]], axis=1)
        nxt = jnp.concatenate([h[:, 1:, :], zp], axis=1)
        y = (jnp.einsum("bsc,cd->bsd", prev.astype(bf), w[3 * l + 0],
                        preferred_element_type=jnp.float32)
             + jnp.einsum("bsc,cd->bsd", h.astype(bf), w[3 * l + 1],
                          preferred_element_type=jnp.float32)
             + jnp.einsum("bsc,cd->bsd", nxt.astype(bf), w[3 * l + 2],
                          preferred_element_type=jnp.float32)
             + p["conv_b_s"][l, 0])
        y = jnp.maximum(y, 0.0)
        h = y + p["bn_shift"][l, 0]
    logits = (jnp.einsum("bsc,ct->bst", h.astype(bf), p["h2t_w_bf16"],
                         preferred_element_type=jnp.float32)
              + p["h2t_b"][0])
    tag = jnp.argmax(logits, axis=-1).astype(jnp.int32)
    return tag * mask.astype(jnp.int32)


# ------------------------------------ main -----------------------------------
if __name__ == "__main__":
    key = jax.random.PRNGKey(0)
    pkey, dkey, lkey = jax.random.split(key, 3)
    params = init_params(pkey)

    word_inputs = jax.random.randint(dkey, (B, S), 1, VOCAB, dtype=jnp.int32)
    lengths = jax.random.randint(lkey, (B,), S // 2, S + 1, dtype=jnp.int32)
    pos = jnp.arange(S)[None, :]
    mask = (pos < lengths[:, None]).astype(jnp.int32)      # (B, S)
    word_inputs = word_inputs * mask                       # pad ids -> 0
    char_inputs = jnp.zeros((B * S, 4), jnp.int32)         # unused (use_char=False)
    batch_label = jnp.zeros((B, S), jnp.int32)             # unused in forward

    tag_seq = ner_forward(word_inputs, lengths, char_inputs, batch_label, mask,
                          params)
    tag_seq = jax.block_until_ready(tag_seq)

    ref = jax.block_until_ready(ner_reference(word_inputs, mask, params))
    np.testing.assert_array_equal(np.asarray(tag_seq), np.asarray(ref))
    assert tag_seq.shape == (B, S) and tag_seq.dtype == jnp.int32

    print("KERNEL_OK")
</pallas_src>

<mosaic_0001>
module attributes {stable_mosaic.version = 11 : i64} {
  func.func @ner_kernel(%arg0: i32, %arg1: memref<256x1xi32, #tpu.memory_space<vmem>>, %arg2: memref<256x1xi32, #tpu.memory_space<vmem>>, %arg3: memref<64x64xbf16, #tpu.memory_space<vmem>>, %arg4: memref<12x64x64xbf16, #tpu.memory_space<vmem>>, %arg5: memref<64x8xbf16, #tpu.memory_space<vmem>>, %arg6: memref<16x128xf32, #tpu.memory_space<vmem>>, %arg7: memref<256x1xi32, #tpu.memory_space<vmem>>) attributes {dimension_semantics = [#tpu.dimension_semantics<parallel>], iteration_bounds = array<i64: 2>, scalar_prefetch = 0 : i64, scratch_operands = 0 : i64, tpu.core_type = #tpu.core_type<tc>, window_params = [{transform_indices = @transform_0, window_bounds = array<i64: 256, 1>}, {transform_indices = @transform_1, window_bounds = array<i64: 256, 1>}, {pipeline_mode = #tpu.pipeline_mode<synchronous>, transform_indices = @transform_2, window_bounds = array<i64: 64, 64>}, {pipeline_mode = #tpu.pipeline_mode<synchronous>, transform_indices = @transform_3, window_bounds = array<i64: 12, 64, 64>}, {pipeline_mode = #tpu.pipeline_mode<synchronous>, transform_indices = @transform_4, window_bounds = array<i64: 64, 8>}, {pipeline_mode = #tpu.pipeline_mode<synchronous>, transform_indices = @transform_5, window_bounds = array<i64: 16, 128>}, {transform_indices = @transform_6, window_bounds = array<i64: 256, 1>}]} {
    %c0 = arith.constant 0 : index
    %c0_0 = arith.constant 0 : index
    %0 = vector.load %arg1[%c0, %c0_0] : memref<256x1xi32, #tpu.memory_space<vmem>>, vector<256x1xi32>
    %1 = tpu.iota {dimensions = array<i32: 1>} : vector<256x64xi32>
    %2 = vector.broadcast %0 : vector<256x1xi32> to vector<256x64xi32>
    %3 = arith.cmpi eq, %1, %2 : vector<256x64xi32>
    %4 = arith.extui %3 : vector<256x64xi1> to vector<256x64xi32>
    %5 = arith.sitofp %4 : vector<256x64xi32> to vector<256x64xf32>
    %6 = arith.truncf %5 : vector<256x64xf32> to vector<256x64xbf16>
    %c0_1 = arith.constant 0 : index
    %c0_2 = arith.constant 0 : index
    %7 = vector.load %arg3[%c0_1, %c0_2] : memref<64x64xbf16, #tpu.memory_space<vmem>>, vector<64x64xbf16>
    %cst = arith.constant dense<0.000000e+00> : vector<256x64xf32>
    %8 = tpu.matmul %6, %7, %cst {dimension_numbers = #tpu.dot_dimension_numbers<[1], [0], [0], [1], [0, 0, 1, 1], [], []>} : vector<256x64xbf16>, vector<64x64xbf16>, vector<256x64xf32> -> vector<256x64xf32>
    %c0_3 = arith.constant 0 : index
    %c0_4 = arith.constant 0 : index
    %9 = vector.load %arg6[%c0_3, %c0_4] : memref<16x128xf32, #tpu.memory_space<vmem>>, vector<1x64xf32>
    %10 = vector.broadcast %9 : vector<1x64xf32> to vector<256x64xf32>
    %11 = arith.addf %8, %10 : vector<256x64xf32>
    %12 = math.tanh %11 : vector<256x64xf32>
    %13 = tpu.iota {dimensions = array<i32: 0>} : vector<256x64xi32>
    %c63_i32 = arith.constant 63 : i32
    %14 = vector.broadcast %c63_i32 : i32 to vector<256x64xi32>
    %15 = arith.andi %13, %14 : vector<256x64xi32>
    %c0_i32 = arith.constant 0 : i32
    %16 = vector.broadcast %c0_i32 : i32 to vector<256x64xi32>
    %17 = arith.cmpi eq, %15, %16 : vector<256x64xi32>
    %c63_i32_5 = arith.constant 63 : i32
    %18 = vector.broadcast %c63_i32_5 : i32 to vector<256x64xi32>
    %19 = arith.cmpi eq, %15, %18 : vector<256x64xi32>
    %c1_i32 = arith.constant 1 : i32
    %20 = tpu.dynamic_rotate %12 by %c1_i32 dim 0 : vector<256x64xf32>, i32 -> vector<256x64xf32>
    %cst_6 = arith.constant 0.000000e+00 : f32
    %21 = vector.broadcast %cst_6 : f32 to vector<256x64xf32>
    %22 = arith.select %17, %21, %20 : vector<256x64xi1>, vector<256x64xf32>
    %23 = arith.truncf %22 : vector<256x64xf32> to vector<256x64xbf16>
    %c255_i32 = arith.constant 255 : i32
    %24 = tpu.dynamic_rotate %12 by %c255_i32 dim 0 : vector<256x64xf32>, i32 -> vector<256x64xf32>
    %cst_7 = arith.constant 0.000000e+00 : f32
    %25 = vector.broadcast %cst_7 : f32 to vector<256x64xf32>
    %26 = arith.select %19, %25, %24 : vector<256x64xi1>, vector<256x64xf32>
    %27 = arith.truncf %26 : vector<256x64xf32> to vector<256x64xbf16>
    %28 = arith.truncf %12 : vector<256x64xf32> to vector<256x64xbf16>
    %c0_8 = arith.constant 0 : index
    %c0_9 = arith.constant 0 : index
    %c0_10 = arith.constant 0 : index
    %29 = vector.load %arg4[%c0_8, %c0_9, %c0_10] : memref<12x64x64xbf16, #tpu.memory_space<vmem>>, vector<1x64x64xbf16>
    %30 = vector.shape_cast %29 : vector<1x64x64xbf16> to vector<64x64xbf16>
    %cst_11 = arith.constant dense<0.000000e+00> : vector<256x64xf32>
    %31 = tpu.matmul %23, %30, %cst_11 {dimension_numbers = #tpu.dot_dimension_numbers<[1], [0], [0], [1], [0, 0, 1, 1], [], []>} : vector<256x64xbf16>, vector<64x64xbf16>, vector<256x64xf32> -> vector<256x64xf32>
    %c1 = arith.constant 1 : index
    %c0_12 = arith.constant 0 : index
    %c0_13 = arith.constant 0 : index
    %32 = vector.load %arg4[%c1, %c0_12, %c0_13] : memref<12x64x64xbf16, #tpu.memory_space<vmem>>, vector<1x64x64xbf16>
    %33 = vector.shape_cast %32 : vector<1x64x64xbf16> to vector<64x64xbf16>
    %cst_14 = arith.constant dense<0.000000e+00> : vector<256x64xf32>
    %34 = tpu.matmul %28, %33, %cst_14 {dimension_numbers = #tpu.dot_dimension_numbers<[1], [0], [0], [1], [0, 0, 1, 1], [], []>} : vector<256x64xbf16>, vector<64x64xbf16>, vector<256x64xf32> -> vector<256x64xf32>
    %35 = arith.addf %31, %34 : vector<256x64xf32>
    %c2 = arith.constant 2 : index
    %c0_15 = arith.constant 0 : index
    %c0_16 = arith.constant 0 : index
    %36 = vector.load %arg4[%c2, %c0_15, %c0_16] : memref<12x64x64xbf16, #tpu.memory_space<vmem>>, vector<1x64x64xbf16>
    %37 = vector.shape_cast %36 : vector<1x64x64xbf16> to vector<64x64xbf16>
    %cst_17 = arith.constant dense<0.000000e+00> : vector<256x64xf32>
    %38 = tpu.matmul %27, %37, %cst_17 {dimension_numbers = #tpu.dot_dimension_numbers<[1], [0], [0], [1], [0, 0, 1, 1], [], []>} : vector<256x64xbf16>, vector<64x64xbf16>, vector<256x64xf32> -> vector<256x64xf32>
    %39 = arith.addf %35, %38 : vector<256x64xf32>
    %c1_18 = arith.constant 1 : index
    %c0_19 = arith.constant 0 : index
    %40 = vector.load %arg6[%c1_18, %c0_19] : memref<16x128xf32, #tpu.memory_space<vmem>>, vector<1x64xf32>
    %41 = vector.broadcast %40 : vector<1x64xf32> to vector<256x64xf32>
    %42 = arith.addf %39, %41 : vector<256x64xf32>
    %cst_20 = arith.constant 0.000000e+00 : f32
    %43 = vector.broadcast %cst_20 : f32 to vector<256x64xf32>
    %44 = arith.maximumf %42, %43 : vector<256x64xf32>
    %c5 = arith.constant 5 : index
    %c0_21 = arith.constant 0 : index
    %45 = vector.load %arg6[%c5, %c0_21] : memref<16x128xf32, #tpu.memory_space<vmem>>, vector<1x64xf32>
    %46 = vector.broadcast %45 : vector<1x64xf32> to vector<256x64xf32>
    %47 = arith.addf %44, %46 : vector<256x64xf32>
    %c1_i32_22 = arith.constant 1 : i32
    %48 = tpu.dynamic_rotate %47 by %c1_i32_22 dim 0 : vector<256x64xf32>, i32 -> vector<256x64xf32>
    %cst_23 = arith.constant 0.000000e+00 : f32
    %49 = vector.broadcast %cst_23 : f32 to vector<256x64xf32>
    %50 = arith.select %17, %49, %48 : vector<256x64xi1>, vector<256x64xf32>
    %51 = arith.truncf %50 : vector<256x64xf32> to vector<256x64xbf16>
    %c255_i32_24 = arith.constant 255 : i32
    %52 = tpu.dynamic_rotate %47 by %c255_i32_24 dim 0 : vector<256x64xf32>, i32 -> vector<256x64xf32>
    %cst_25 = arith.constant 0.000000e+00 : f32
    %53 = vector.broadcast %cst_25 : f32 to vector<256x64xf32>
    %54 = arith.select %19, %53, %52 : vector<256x64xi1>, vector<256x64xf32>
    %55 = arith.truncf %54 : vector<256x64xf32> to vector<256x64xbf16>
    %56 = arith.truncf %47 : vector<256x64xf32> to vector<256x64xbf16>
    %c3 = arith.constant 3 : index
    %c0_26 = arith.constant 0 : index
    %c0_27 = arith.constant 0 : index
    %57 = vector.load %arg4[%c3, %c0_26, %c0_27] : memref<12x64x64xbf16, #tpu.memory_space<vmem>>, vector<1x64x64xbf16>
    %58 = vector.shape_cast %57 : vector<1x64x64xbf16> to vector<64x64xbf16>
    %cst_28 = arith.constant dense<0.000000e+00> : vector<256x64xf32>
    %59 = tpu.matmul %51, %58, %cst_28 {dimension_numbers = #tpu.dot_dimension_numbers<[1], [0], [0], [1], [0, 0, 1, 1], [], []>} : vector<256x64xbf16>, vector<64x64xbf16>, vector<256x64xf32> -> vector<256x64xf32>
    %c4 = arith.constant 4 : index
    %c0_29 = arith.constant 0 : index
    %c0_30 = arith.constant 0 : index
    %60 = vector.load %arg4[%c4, %c0_29, %c0_30] : memref<12x64x64xbf16, #tpu.memory_space<vmem>>, vector<1x64x64xbf16>
    %61 = vector.shape_cast %60 : vector<1x64x64xbf16> to vector<64x64xbf16>
    %cst_31 = arith.constant dense<0.000000e+00> : vector<256x64xf32>
    %62 = tpu.matmul %56, %61, %cst_31 {dimension_numbers = #tpu.dot_dimension_numbers<[1], [0], [0], [1], [0, 0, 1, 1], [], []>} : vector<256x64xbf16>, vector<64x64xbf16>, vector<256x64xf32> -> vector<256x64xf32>
    %63 = arith.addf %59, %62 : vector<256x64xf32>
    %c5_32 = arith.constant 5 : index
    %c0_33 = arith.constant 0 : index
    %c0_34 = arith.constant 0 : index
    %64 = vector.load %arg4[%c5_32, %c0_33, %c0_34] : memref<12x64x64xbf16, #tpu.memory_space<vmem>>, vector<1x64x64xbf16>
    %65 = vector.shape_cast %64 : vector<1x64x64xbf16> to vector<64x64xbf16>
    %cst_35 = arith.constant dense<0.000000e+00> : vector<256x64xf32>
    %66 = tpu.matmul %55, %65, %cst_35 {dimension_numbers = #tpu.dot_dimension_numbers<[1], [0], [0], [1], [0, 0, 1, 1], [], []>} : vector<256x64xbf16>, vector<64x64xbf16>, vector<256x64xf32> -> vector<256x64xf32>
    %67 = arith.addf %63, %66 : vector<256x64xf32>
    %c2_36 = arith.constant 2 : index
    %c0_37 = arith.constant 0 : index
    %68 = vector.load %arg6[%c2_36, %c0_37] : memref<16x128xf32, #tpu.memory_space<vmem>>, vector<1x64xf32>
    %69 = vector.broadcast %68 : vector<1x64xf32> to vector<256x64xf32>
    %70 = arith.addf %67, %69 : vector<256x64xf32>
    %cst_38 = arith.constant 0.000000e+00 : f32
    %71 = vector.broadcast %cst_38 : f32 to vector<256x64xf32>
    %72 = arith.maximumf %70, %71 : vector<256x64xf32>
    %c6 = arith.constant 6 : index
    %c0_39 = arith.constant 0 : index
    %73 = vector.load %arg6[%c6, %c0_39] : memref<16x128xf32, #tpu.memory_space<vmem>>, vector<1x64xf32>
    %74 = vector.broadcast %73 : vector<1x64xf32> to vector<256x64xf32>
    %75 = arith.addf %72, %74 : vector<256x64xf32>
    %c1_i32_40 = arith.constant 1 : i32
    %76 = tpu.dynamic_rotate %75 by %c1_i32_40 dim 0 : vector<256x64xf32>, i32 -> vector<256x64xf32>
    %cst_41 = arith.constant 0.000000e+00 : f32
    %77 = vector.broadcast %cst_41 : f32 to vector<256x64xf32>
    %78 = arith.select %17, %77, %76 : vector<256x64xi1>, vector<256x64xf32>
    %79 = arith.truncf %78 : vector<256x64xf32> to vector<256x64xbf16>
    %c255_i32_42 = arith.constant 255 : i32
    %80 = tpu.dynamic_rotate %75 by %c255_i32_42 dim 0 : vector<256x64xf32>, i32 -> vector<256x64xf32>
    %cst_43 = arith.constant 0.000000e+00 : f32
    %81 = vector.broadcast %cst_43 : f32 to vector<256x64xf32>
    %82 = arith.select %19, %81, %80 : vector<256x64xi1>, vector<256x64xf32>
    %83 = arith.truncf %82 : vector<256x64xf32> to vector<256x64xbf16>
    %84 = arith.truncf %75 : vector<256x64xf32> to vector<256x64xbf16>
    %c6_44 = arith.constant 6 : index
    %c0_45 = arith.constant 0 : index
    %c0_46 = arith.constant 0 : index
    %85 = vector.load %arg4[%c6_44, %c0_45, %c0_46] : memref<12x64x64xbf16, #tpu.memory_space<vmem>>, vector<1x64x64xbf16>
    %86 = vector.shape_cast %85 : vector<1x64x64xbf16> to vector<64x64xbf16>
    %cst_47 = arith.constant dense<0.000000e+00> : vector<256x64xf32>
    %87 = tpu.matmul %79, %86, %cst_47 {dimension_numbers = #tpu.dot_dimension_numbers<[1], [0], [0], [1], [0, 0, 1, 1], [], []>} : vector<256x64xbf16>, vector<64x64xbf16>, vector<256x64xf32> -> vector<256x64xf32>
    %c7 = arith.constant 7 : index
    %c0_48 = arith.constant 0 : index
    %c0_49 = arith.constant 0 : index
    %88 = vector.load %arg4[%c7, %c0_48, %c0_49] : memref<12x64x64xbf16, #tpu.memory_space<vmem>>, vector<1x64x64xbf16>
    %89 = vector.shape_cast %88 : vector<1x64x64xbf16> to vector<64x64xbf16>
    %cst_50 = arith.constant dense<0.000000e+00> : vector<256x64xf32>
    %90 = tpu.matmul %84, %89, %cst_50 {dimension_numbers = #tpu.dot_dimension_numbers<[1], [0], [0], [1], [0, 0, 1, 1], [], []>} : vector<256x64xbf16>, vector<64x64xbf16>, vector<256x64xf32> -> vector<256x64xf32>
    %91 = arith.addf %87, %90 : vector<256x64xf32>
    %c8 = arith.constant 8 : index
    %c0_51 = arith.constant 0 : index
    %c0_52 = arith.constant 0 : index
    %92 = vector.load %arg4[%c8, %c0_51, %c0_52] : memref<12x64x64xbf16, #tpu.memory_space<vmem>>, vector<1x64x64xbf16>
    %93 = vector.shape_cast %92 : vector<1x64x64xbf16> to vector<64x64xbf16>
    %cst_53 = arith.constant dense<0.000000e+00> : vector<256x64xf32>
    %94 = tpu.matmul %83, %93, %cst_53 {dimension_numbers = #tpu.dot_dimension_numbers<[1], [0], [0], [1], [0, 0, 1, 1], [], []>} : vector<256x64xbf16>, vector<64x64xbf16>, vector<256x64xf32> -> vector<256x64xf32>
    %95 = arith.addf %91, %94 : vector<256x64xf32>
    %c3_54 = arith.constant 3 : index
    %c0_55 = arith.constant 0 : index
    %96 = vector.load %arg6[%c3_54, %c0_55] : memref<16x128xf32, #tpu.memory_space<vmem>>, vector<1x64xf32>
    %97 = vector.broadcast %96 : vector<1x64xf32> to vector<256x64xf32>
    %98 = arith.addf %95, %97 : vector<256x64xf32>
    %cst_56 = arith.constant 0.000000e+00 : f32
    %99 = vector.broadcast %cst_56 : f32 to vector<256x64xf32>
    %100 = arith.maximumf %98, %99 : vector<256x64xf32>
    %c7_57 = arith.constant 7 : index
    %c0_58 = arith.constant 0 : index
    %101 = vector.load %arg6[%c7_57, %c0_58] : memref<16x128xf32, #tpu.memory_space<vmem>>, vector<1x64xf32>
    %102 = vector.broadcast %101 : vector<1x64xf32> to vector<256x64xf32>
    %103 = arith.addf %100, %102 : vector<256x64xf32>
    %c1_i32_59 = arith.constant 1 : i32
    %104 = tpu.dynamic_rotate %103 by %c1_i32_59 dim 0 : vector<256x64xf32>, i32 -> vector<256x64xf32>
    %cst_60 = arith.constant 0.000000e+00 : f32
    %105 = vector.broadcast %cst_60 : f32 to vector<256x64xf32>
    %106 = arith.select %17, %105, %104 : vector<256x64xi1>, vector<256x64xf32>
    %107 = arith.truncf %106 : vector<256x64xf32> to vector<256x64xbf16>
    %c255_i32_61 = arith.constant 255 : i32
    %108 = tpu.dynamic_rotate %103 by %c255_i32_61 dim 0 : vector<256x64xf32>, i32 -> vector<256x64xf32>
    %cst_62 = arith.constant 0.000000e+00 : f32
    %109 = vector.broadcast %cst_62 : f32 to vector<256x64xf32>
    %110 = arith.select %19, %109, %108 : vector<256x64xi1>, vector<256x64xf32>
    %111 = arith.truncf %110 : vector<256x64xf32> to vector<256x64xbf16>
    %112 = arith.truncf %103 : vector<256x64xf32> to vector<256x64xbf16>
    %c9 = arith.constant 9 : index
    %c0_63 = arith.constant 0 : index
    %c0_64 = arith.constant 0 : index
    %113 = vector.load %arg4[%c9, %c0_63, %c0_64] : memref<12x64x64xbf16, #tpu.memory_space<vmem>>, vector<1x64x64xbf16>
    %114 = vector.shape_cast %113 : vector<1x64x64xbf16> to vector<64x64xbf16>
    %cst_65 = arith.constant dense<0.000000e+00> : vector<256x64xf32>
    %115 = tpu.matmul %107, %114, %cst_65 {dimension_numbers = #tpu.dot_dimension_numbers<[1], [0], [0], [1], [0, 0, 1, 1], [], []>} : vector<256x64xbf16>, vector<64x64xbf16>, vector<256x64xf32> -> vector<256x64xf32>
    %c10 = arith.constant 10 : index
    %c0_66 = arith.constant 0 : index
    %c0_67 = arith.constant 0 : index
    %116 = vector.load %arg4[%c10, %c0_66, %c0_67] : memref<12x64x64xbf16, #tpu.memory_space<vmem>>, vector<1x64x64xbf16>
    %117 = vector.shape_cast %116 : vector<1x64x64xbf16> to vector<64x64xbf16>
    %cst_68 = arith.constant dense<0.000000e+00> : vector<256x64xf32>
    %118 = tpu.matmul %112, %117, %cst_68 {dimension_numbers = #tpu.dot_dimension_numbers<[1], [0], [0], [1], [0, 0, 1, 1], [], []>} : vector<256x64xbf16>, vector<64x64xbf16>, vector<256x64xf32> -> vector<256x64xf32>
    %119 = arith.addf %115, %118 : vector<256x64xf32>
    %c11 = arith.constant 11 : index
    %c0_69 = arith.constant 0 : index
    %c0_70 = arith.constant 0 : index
    %120 = vector.load %arg4[%c11, %c0_69, %c0_70] : memref<12x64x64xbf16, #tpu.memory_space<vmem>>, vector<1x64x64xbf16>
    %121 = vector.shape_cast %120 : vector<1x64x64xbf16> to vector<64x64xbf16>
    %cst_71 = arith.constant dense<0.000000e+00> : vector<256x64xf32>
    %122 = tpu.matmul %111, %121, %cst_71 {dimension_numbers = #tpu.dot_dimension_numbers<[1], [0], [0], [1], [0, 0, 1, 1], [], []>} : vector<256x64xbf16>, vector<64x64xbf16>, vector<256x64xf32> -> vector<256x64xf32>
    %123 = arith.addf %119, %122 : vector<256x64xf32>
    %c4_72 = arith.constant 4 : index
    %c0_73 = arith.constant 0 : index
    %124 = vector.load %arg6[%c4_72, %c0_73] : memref<16x128xf32, #tpu.memory_space<vmem>>, vector<1x64xf32>
    %125 = vector.broadcast %124 : vector<1x64xf32> to vector<256x64xf32>
    %126 = arith.addf %123, %125 : vector<256x64xf32>
    %cst_74 = arith.constant 0.000000e+00 : f32
    %127 = vector.broadcast %cst_74 : f32 to vector<256x64xf32>
    %128 = arith.maximumf %126, %127 : vector<256x64xf32>
    %c8_75 = arith.constant 8 : index
    %c0_76 = arith.constant 0 : index
    %129 = vector.load %arg6[%c8_75, %c0_76] : memref<16x128xf32, #tpu.memory_space<vmem>>, vector<1x64xf32>
    %130 = vector.broadcast %129 : vector<1x64xf32> to vector<256x64xf32>
    %131 = arith.addf %128, %130 : vector<256x64xf32>
    %132 = arith.truncf %131 : vector<256x64xf32> to vector<256x64xbf16>
    %c0_77 = arith.constant 0 : index
    %c0_78 = arith.constant 0 : index
    %133 = vector.load %arg5[%c0_77, %c0_78] : memref<64x8xbf16, #tpu.memory_space<vmem>>, vector<64x8xbf16>
    %cst_79 = arith.constant dense<0.000000e+00> : vector<256x8xf32>
    %134 = tpu.matmul %132, %133, %cst_79 {dimension_numbers = #tpu.dot_dimension_numbers<[1], [0], [0], [1], [0, 0, 1, 1], [], []>} : vector<256x64xbf16>, vector<64x8xbf16>, vector<256x8xf32> -> vector<256x8xf32>
    %c9_80 = arith.constant 9 : index
    %c0_81 = arith.constant 0 : index
    %135 = vector.load %arg6[%c9_80, %c0_81] : memref<16x128xf32, #tpu.memory_space<vmem>>, vector<1x8xf32>
    %136 = vector.broadcast %135 : vector<1x8xf32> to vector<256x8xf32>
    %137 = arith.addf %134, %136 : vector<256x8xf32>
    %cst_82 = arith.constant dense<0xFF800000> : vector<256xf32>
    %138 = vector.multi_reduction <maximumf>, %137, %cst_82 [1] : vector<256x8xf32> to vector<256xf32>
    %139 = vector.shape_cast %138 : vector<256xf32> to vector<256x1xf32>
    %140 = tpu.iota {dimensions = array<i32: 1>} : vector<256x8xi32>
    %141 = vector.broadcast %139 : vector<256x1xf32> to vector<256x8xf32>
    %142 = arith.cmpf oeq, %137, %141 : vector<256x8xf32>
    %c8_i32 = arith.constant 8 : i32
    %143 = vector.broadcast %c8_i32 : i32 to vector<256x8xi32>
    %144 = arith.select %142, %140, %143 : vector<256x8xi1>, vector<256x8xi32>
    %cst_83 = arith.constant dense<2147483647> : vector<256xi32>
    %145 = vector.multi_reduction <minsi>, %144, %cst_83 [1] : vector<256x8xi32> to vector<256xi32>
    %146 = vector.shape_cast %145 : vector<256xi32> to vector<256x1xi32>
    %c0_84 = arith.constant 0 : index
    %c0_85 = arith.constant 0 : index
    %147 = vector.load %arg2[%c0_84, %c0_85] : memref<256x1xi32, #tpu.memory_space<vmem>>, vector<256x1xi32>
    %148 = arith.muli %146, %147 : vector<256x1xi32>
    %c0_86 = arith.constant 0 : index
    %c0_87 = arith.constant 0 : index
    %149 = vector.load %arg7[%c0_86, %c0_87] : memref<256x1xi32, #tpu.memory_space<vmem>>, vector<256x1xi32>
    tpu.vector_store %arg7[%c0_86, %c0_87], %148 {strides = array<i32>} : memref<256x1xi32, #tpu.memory_space<vmem>>, vector<256x1xi32>,
    return
  }
  func.func @transform_0(%arg0: i32) -> (i32, i32) {
    %c0_i32 = arith.constant 0 : i32
    %c0_i32_0 = arith.constant 0 : i32
    return %arg0, %c0_i32 : i32, i32
  }
  func.func @transform_1(%arg0: i32) -> (i32, i32) {
    %c0_i32 = arith.constant 0 : i32
    %c0_i32_0 = arith.constant 0 : i32
    return %arg0, %c0_i32 : i32, i32
  }
  func.func @transform_2(%arg0: i32) -> (i32, i32) {
    %c0_i32 = arith.constant 0 : i32
    %c0_i32_0 = arith.constant 0 : i32
    %c0_i32_1 = arith.constant 0 : i32
    return %c0_i32, %c0_i32_0 : i32, i32
  }
  func.func @transform_3(%arg0: i32) -> (i32, i32, i32) {
    %c0_i32 = arith.constant 0 : i32
    %c0_i32_0 = arith.constant 0 : i32
    %c0_i32_1 = arith.constant 0 : i32
    %c0_i32_2 = arith.constant 0 : i32
    return %c0_i32, %c0_i32_0, %c0_i32_1 : i32, i32, i32
  }
  func.func @transform_4(%arg0: i32) -> (i32, i32) {
    %c0_i32 = arith.constant 0 : i32
    %c0_i32_0 = arith.constant 0 : i32
    %c0_i32_1 = arith.constant 0 : i32
    return %c0_i32, %c0_i32_0 : i32, i32
  }
  func.func @transform_5(%arg0: i32) -> (i32, i32) {
    %c0_i32 = arith.constant 0 : i32
    %c0_i32_0 = arith.constant 0 : i32
    %c0_i32_1 = arith.constant 0 : i32
    return %c0_i32, %c0_i32_0 : i32, i32
  }
  func.func @transform_6(%arg0: i32) -> (i32, i32) {
    %c0_i32 = arith.constant 0 : i32
    %c0_i32_0 = arith.constant 0 : i32
    return %arg0, %c0_i32 : i32, i32
  }
}

</mosaic_0001>

<bundles_post_ra>
// kernel: ner_forward.1
= control target key start
LH: loop header
LB: loop body
LE: loop exit
PB: predicated region body
PF: predicated region fallthrough
CT: control target
= control target key end

     0   :  { %s8109_s21 = smov 0   ;;  %s11871_s0 = inlined_call_operand.vmem [shape: s32[512,1], index: 0, kind: input, shape index: {}]   ;;  %s11872_s1 = inlined_call_operand.vmem [shape: s32[512,1], index: 1, kind: input, shape index: {}]   ;;  %s11873_s2 = inlined_call_operand.vmem [shape: bf16[64,64], index: 2, kind: input, shape index: {}]   ;;  %s11874_s3 = inlined_call_operand.vmem [shape: bf16[12,64,64], index: 3, kind: input, shape index: {}]   ;;  %s11875_s4 = inlined_call_operand.vmem [shape: bf16[64,8], index: 4, kind: input, shape index: {}]   ;;  %s11876_s5 = inlined_call_operand.vmem [shape: f32[16,128], index: 5, kind: input, shape index: {}]   ;;  %s11877_s6 = inlined_call_operand.vmem [shape: s32[512,1], index: 6, kind: output, shape index: {}]  }
   0x1 LB: > { %s6413_s22 = sadd.s32 4294967295, %s8070_s21   ;;  %p6417_p0 = scmp.ge.s32.totalorder %s8070_s21, 1  ;;  %s8070_s21 = sphi %s8109_s21, %s16_s21  }
   0x2   : > { %p224_p1 = scmp.lt.s32.totalorder %s8070_s21, 3 }
   0x4   : > { %p225_p2 = pnand %p6417_p0, %p224_p1 }
   0x6   : > { %228 = sbr.rel (%p225_p2) target bundleno = 2539 (0x9eb), region = 44 }
   0xd   : > { %s6418_s23 = sshll.u32 %s6413_s22, 5  ;;  %v8072_v0 = vmov 0   ;;  %v7944_v1 = vld [vmem:[%s11873_s2] sm:$0xff]   ;;  %v7945_v2 = vld [vmem:[%s11873_s2 + $0x8] sm:$0xff]   ;;  %v7946_v11 = vld [vmem:[%s11873_s2 + $0x10] sm:$0xff]   ;;  %v310_v37 = vlaneseq  ;;  %vm557_vm4 = vcmask 523264  }
   0xe   : > { %7943 = vset.pattern.permute.xlu1 %v8072_v0  ;;  %7942 = vset.pattern.permute.xlu0 %v8072_v0  ;;  %p260_p3 = scmp.lt.s32.totalorder %s6418_s23, 63  ;;  %v7947_v12 = vld [vmem:[%s11873_s2 + $0x18] sm:$0xff]   ;;  %v8073_v43 = vmov 0.0  }
   0xf   : > { %7116 = vmatprep.subr.bf16.mxu0 %v7944_v1  ;;  %v8170_v38 = vand.u32 127, %v310_v37 }
  0x10   : > { %s12318_s23 = smov (!%p260_p3, %s6418_s23), 63  ;;  %7117 = vmatpush3.bf16.msra.mxu0 %v7944_v1 }
  0x11   : > { %s8123_s28 = sshll.u32 %s12318_s23, 3  ;;  %7118 = vmatprep.subr.bf16.mxu0 %v7945_v2  ;;  %11967 = vst [vmem:[#allocation2_spill] sm:$0xff] %v8170_v38 }
  0x12   : > { %s8129_s7 = scalar_lea.vmem %s11871_s0, %s8123_s28  ;;  %s11733_s30 = scalar_lea.vmem %s11872_s1, %s8123_s28 }
  0x13   : > { %v280_v3 = vld [vmem:[%s8129_s7 + $0x10] sm:$0xff]  ;;  %v278_v4 = vld [vmem:[%s8129_s7] sm:$0xff]  ;;  %v281_v5 = vld [vmem:[%s8129_s7 + $0x18] sm:$0xff]  ;;  %s11742_s9 = scalar_lea.vmem %s11877_s6, %s8123_s28 }
  0x14   : > { %319 = vperm.xlu1 %7943, %v280_v3   ;;  %313 = vperm.xlu0 %7942, %v278_v4   ;;  %v279_v6 = vld [vmem:[%s8129_s7 + $0x8] sm:$0xff]  ;;  %v282_v8 = vld [vmem:[%s8129_s7 + $0x20] sm:$0xff]  ;;  %v285_v9 = vld [vmem:[%s8129_s7 + $0x38] sm:$0xff] }
  0x15   : > { %7119 = vmatpush3.bf16.msra.mxu0 %v7945_v2  ;;  %v283_v7 = vld [vmem:[%s8129_s7 + $0x28] sm:$0xff]  ;;  %v284_v10 = vld [vmem:[%s8129_s7 + $0x30] sm:$0xff]  ;;  %v286_v14 = vld [vmem:[%s8129_s7 + $0x40] sm:$0xff] }
  0x16   : > { %v287_v13 = vld [vmem:[%s8129_s7 + $0x48] sm:$0xff]  ;;  %7120 = vmatprep.subr.bf16.mxu0 %v7946_v11  ;;  %v289_v15 = vld [vmem:[%s8129_s7 + $0x58] sm:$0xff]  ;;  %v288_v16 = vld [vmem:[%s8129_s7 + $0x50] sm:$0xff] }
  0x17   : > { %v291_v17 = vld [vmem:[%s8129_s7 + $0x68] sm:$0xff]  ;;  %v290_v18 = vld [vmem:[%s8129_s7 + $0x60] sm:$0xff]  ;;  %v293_v19 = vld [vmem:[%s8129_s7 + $0x78] sm:$0xff] }
  0x18   : > { %322 = vperm.xlu1 %7943, %v281_v5   ;;  %316 = vperm.xlu0 %7942, %v279_v6   ;;  %v292_v20 = vld [vmem:[%s8129_s7 + $0x70] sm:$0xff]  ;;  %v295_v21 = vld [vmem:[%s8129_s7 + $0x88] sm:$0xff]  ;;  %v294_v22 = vld [vmem:[%s8129_s7 + $0x80] sm:$0xff] }
  0x19   : > { %7121 = vmatpush3.bf16.msra.mxu0 %v7946_v11  ;;  %v297_v23 = vld [vmem:[%s8129_s7 + $0x98] sm:$0xff]  ;;  %v296_v24 = vld [vmem:[%s8129_s7 + $0x90] sm:$0xff]  ;;  %v299_v25 = vld [vmem:[%s8129_s7 + $0xa8] sm:$0xff] }
  0x1a   : > { %7122 = vmatprep.subr.bf16.mxu0 %v7947_v12  ;;  %v298_v26 = vld [vmem:[%s8129_s7 + $0xa0] sm:$0xff]  ;;  %v301_v27 = vld [vmem:[%s8129_s7 + $0xb8] sm:$0xff]  ;;  %v300_v28 = vld [vmem:[%s8129_s7 + $0xb0] sm:$0xff] }
  0x1b   : > { %v303_v29 = vld [vmem:[%s8129_s7 + $0xc8] sm:$0xff]  ;;  %v302_v30 = vld [vmem:[%s8129_s7 + $0xc0] sm:$0xff]  ;;  %v305_v31 = vld [vmem:[%s8129_s7 + $0xd8] sm:$0xff] }
  0x1c   : > { %328 = vperm.xlu1 %7943, %v283_v7   ;;  %325 = vperm.xlu0 %7942, %v282_v8   ;;  %v304_v32 = vld [vmem:[%s8129_s7 + $0xd0] sm:$0xff]  ;;  %v307_v33 = vld [vmem:[%s8129_s7 + $0xe8] sm:$0xff]  ;;  %v306_v34 = vld [vmem:[%s8129_s7 + $0xe0] sm:$0xff] }
  0x1d   : > { %7123 = vmatpush3.bf16.msra.mxu0 %v7947_v12  ;;  %v309_v35 = vld [vmem:[%s8129_s7 + $0xf8] sm:$0xff]  ;;  %v308_v36 = vld [vmem:[%s8129_s7 + $0xf0] sm:$0xff] }
  0x20   : > { %334 = vperm.xlu1 %7943, %v285_v9   ;;  %331 = vperm.xlu0 %7942, %v284_v10  }
  0x24   : > { %340 = vperm.xlu1 %7943, %v287_v13   ;;  %337 = vperm.xlu0 %7942, %v286_v14  }
  0x28   : > { %346 = vperm.xlu1 %7943, %v289_v15   ;;  %343 = vperm.xlu0 %7942, %v288_v16  }
  0x2c   : > { %352 = vperm.xlu1 %7943, %v291_v17   ;;  %349 = vperm.xlu0 %7942, %v290_v18  }
  0x30   : > { %358 = vperm.xlu1 %7943, %v293_v19   ;;  %355 = vperm.xlu0 %7942, %v292_v20  }
  0x34   : > { %364 = vperm.xlu1 %7943, %v295_v21   ;;  %361 = vperm.xlu0 %7942, %v294_v22  }
  0x38   : > { %370 = vperm.xlu1 %7943, %v297_v23   ;;  %367 = vperm.xlu0 %7942, %v296_v24  }
  0x3c   : > { %376 = vperm.xlu1 %7943, %v299_v25   ;;  %373 = vperm.xlu0 %7942, %v298_v26  }
  0x40   : > { %382 = vperm.xlu1 %7943, %v301_v27   ;;  %379 = vperm.xlu0 %7942, %v300_v28  }
  0x44   : > { %388 = vperm.xlu1 %7943, %v303_v29   ;;  %385 = vperm.xlu0 %7942, %v302_v30  }
  0x48   : > { %394 = vperm.xlu1 %7943, %v305_v31   ;;  %391 = vperm.xlu0 %7942, %v304_v32  }
  0x4c   : > { %400 = vperm.xlu1 %7943, %v307_v33   ;;  %397 = vperm.xlu0 %7942, %v306_v34  }
  0x50   : > { %406 = vperm.xlu1 %7943, %v309_v35   ;;  %403 = vperm.xlu0 %7942, %v308_v36  }
  0x93   : > { %v320_v39 = vpop.permute.xlu1 %319  ;;  %v314_v40 = vpop.permute.xlu0 %313 }
  0x94   : > { %vm410_vm0 = vcmp.eq.s32.totalorder %v8170_v38, %v320_v39  ;;  %vm408_vm1 = vcmp.eq.s32.totalorder %v8170_v38, %v314_v40 }
  0x95   : > { %v6426_v44 = vsel %vm410_vm0, 1.0, %v8073_v43  ;;  %v6424_v46 = vsel %vm408_vm1, 1.0, %v8073_v43 }
  0x97   : > { %v323_v41 = vpop.permute.xlu1 %322  ;;  %v317_v42 = vpop.permute.xlu0 %316 }
  0x98   : > { %vm411_vm2 = vcmp.eq.s32.totalorder %v8170_v38, %v323_v41  ;;  %vm409_vm3 = vcmp.eq.s32.totalorder %v8170_v38, %v317_v42 }
  0x99   : > { %v6427_v45 = vsel %vm411_vm2, 1.0, %v8073_v43  ;;  %v6425_v47 = vsel %vm409_vm3, 1.0, %v8073_v43 }
  0x9a   : > { %v505_v48 = vpack.c.bf16 %v6427_v45, %v6426_v44  ;;  %v504_v49 = vpack.c.bf16 %v6425_v47, %v6424_v46 }
  0x9b   : > { %v329_v50 = vpop.permute.xlu1 %328  ;;  %v326_v51 = vpop.permute.xlu0 %325 }
  0x9c   : > { %vm413_vm5 = vcmp.eq.s32.totalorder %v8170_v38, %v329_v50  ;;  %vm412_vm6 = vcmp.eq.s32.totalorder %v8170_v38, %v326_v51  ;;  %7124 = vmatprep.mubr.msk.bf16.mxu0 %vm557_vm4, %v504_v49 }
  0x9d   : > { %v6429_v52 = vsel %vm413_vm5, 1.0, %v8073_v43  ;;  %v6428_v53 = vsel %vm412_vm6, 1.0, %v8073_v43  ;;  %7125 = vmatmul.mubr.msk.bf16.vlgmr.msra.gmra.mrb[0].mxu0 %vm557_vm4, %v505_v48 }
  0x9e   : > { %v506_v54 = vpack.c.bf16 %v6429_v52, %v6428_v53 }
  0x9f   : > { %v335_v55 = vpop.permute.xlu1 %334  ;;  %v332_v56 = vpop.permute.xlu0 %331 }
  0xa0   : > { %vm415_vm7 = vcmp.eq.s32.totalorder %v8170_v38, %v335_v55  ;;  %vm414_vm8 = vcmp.eq.s32.totalorder %v8170_v38, %v332_v56  ;;  %7128 = vmatprep.mubr.msk.bf16.mxu0 %vm557_vm4, %v506_v54 }
  0xa1   : > { %v6431_v57 = vsel %vm415_vm7, 1.0, %v8073_v43  ;;  %v6430_v58 = vsel %vm414_vm8, 1.0, %v8073_v43 }
  0xa2   : > { %v507_v59 = vpack.c.bf16 %v6431_v57, %v6430_v58 }
  0xa3   : > { %v341_v60 = vpop.permute.xlu1 %340  ;;  %v338_v61 = vpop.permute.xlu0 %337 }
  0xa4   : > { %vm417_vm9 = vcmp.eq.s32.totalorder %v8170_v38, %v341_v60  ;;  %vm416_vm10 = vcmp.eq.s32.totalorder %v8170_v38, %v338_v61  ;;  %v7949_v60 = vld [vmem:[%s11874_s3 + $0x28] sm:$0xff]   ;;  %v7950_v61 = vld [vmem:[%s11874_s3 + $0x30] sm:$0xff]  }
  0xa5   : > { %v6433_v62 = vsel %vm417_vm9, 1.0, %v8073_v43  ;;  %v6432_v63 = vsel %vm416_vm10, 1.0, %v8073_v43  ;;  %7129 = vmatmul.mubr.msk.bf16.gmra.mrb[4].mxu0 %vm557_vm4, %v507_v59  ;;  %v7948_v59 = vld [vmem:[%s11874_s3 + $0x20] sm:$0xff]  }
  0xa6   : > { %v508_v0 = vpack.c.bf16 %v6433_v62, %v6432_v63  ;;  %7156 = vmatprep.subr.bf16.mxu1 %v7948_v59  ;;  %v8267_v62 = vld [vmem:[%s11874_s3] sm:$0xff]  }
  0xa7   : > { %v347_v1 = vpop.permute.xlu1 %346  ;;  %v344_v2 = vpop.permute.xlu0 %343  ;;  %7157 = vmatpush3.bf16.msra.mxu1 %v7948_v59  ;;  %v8273_v63 = vld [vmem:[%s11876_s5] ss:$0 sm:$0xff] }
  0xa8   : > { %vm419_vm11 = vcmp.eq.s32.totalorder %v8170_v38, %v347_v1  ;;  %vm418_vm12 = vcmp.eq.s32.totalorder %v8170_v38, %v344_v2  ;;  %7132 = vmatprep.mubr.msk.bf16.mxu0 %vm557_vm4, %v508_v0  ;;  %7158 = vmatprep.subr.bf16.mxu1 %v7949_v60 }
  0xa9   : > { %v6435_v3 = vsel %vm419_vm11, 1.0, %v8073_v43  ;;  %v6434_v4 = vsel %vm418_vm12, 1.0, %v8073_v43 }
  0xaa   : > { %v509_v5 = vpack.c.bf16 %v6435_v3, %v6434_v4 }
  0xab   : > { %v353_v6 = vpop.permute.xlu1 %352  ;;  %v350_v7 = vpop.permute.xlu0 %349  ;;  %7159 = vmatpush3.bf16.msra.mxu1 %v7949_v60 }
  0xac   : > { %vm421_vm13 = vcmp.eq.s32.totalorder %v8170_v38, %v353_v6  ;;  %vm420_vm14 = vcmp.eq.s32.totalorder %v8170_v38, %v350_v7  ;;  %7160 = vmatprep.subr.bf16.mxu1 %v7950_v61 }
  0xad   : > { %v6437_v8 = vsel %vm421_vm13, 1.0, %v8073_v43  ;;  %v6436_v9 = vsel %vm420_vm14, 1.0, %v8073_v43  ;;  %7133 = vmatmul.mubr.msk.bf16.gmra.mrb[8].mxu0 %vm557_vm4, %v509_v5 }
  0xae   : > { %v510_v10 = vpack.c.bf16 %v6437_v8, %v6436_v9  ;;  %v8280_v9 = vshrl.u32 %v310_v37, 7 }
  0xaf   : > { %v359_v11 = vpop.permute.xlu1 %358  ;;  %v356_v12 = vpop.permute.xlu0 %355  ;;  %7161 = vmatpush3.bf16.msra.mxu1 %v7950_v61 }
  0xb0   : > { %vm423_vm15 = vcmp.eq.s32.totalorder %v8170_v38, %v359_v11  ;;  %vm422_vm0 = vcmp.eq.s32.totalorder %v8170_v38, %v356_v12  ;;  %7136 = vmatprep.mubr.msk.bf16.mxu0 %vm557_vm4, %v510_v10 }
  0xb1   : > { %v6439_v13 = vsel %vm423_vm15, 1.0, %v8073_v43  ;;  %v6438_v14 = vsel %vm422_vm0, 1.0, %v8073_v43 }
  0xb2   : > { %v511_v15 = vpack.c.bf16 %v6439_v13, %v6438_v14  ;;  %v808_v14 = vadd.s32 64, %v8280_v9 }
  0xb3   : > { %v365_v16 = vpop.permute.xlu1 %364  ;;  %v362_v17 = vpop.permute.xlu0 %361 }
  0xb4   : > { %vm425_vm1 = vcmp.eq.s32.totalorder %v8170_v38, %v365_v16  ;;  %vm424_vm2 = vcmp.eq.s32.totalorder %v8170_v38, %v362_v17 }
  0xb5   : > { %v6441_v18 = vsel %vm425_vm1, 1.0, %v8073_v43  ;;  %v6440_v19 = vsel %vm424_vm2, 1.0, %v8073_v43  ;;  %7137 = vmatmul.mubr.msk.bf16.gmra.mrb[12].mxu0 %vm557_vm4, %v511_v15  ;;  %vm960_vm2 = vcmp.lt.s32.totalorder %v8280_v9, 1 }
  0xb6   : > { %v512_v20 = vpack.c.bf16 %v6441_v18, %v6440_v19  ;;  %v840_v19 = vand.u32 63, %v808_v14 }
  0xb7   : > { %v371_v21 = vpop.permute.xlu1 %370  ;;  %v368_v22 = vpop.permute.xlu0 %367 }
  0xb8   : > { %vm427_vm3 = vcmp.eq.s32.totalorder %v8170_v38, %v371_v21  ;;  %vm426_vm5 = vcmp.eq.s32.totalorder %v8170_v38, %v368_v22  ;;  %7140 = vmatprep.mubr.msk.bf16.mxu0 %vm557_vm4, %v512_v20  ;;  %v8292_v20 = vadd.s32 56, %v8280_v9 }
  0xb9   : > { %v6443_v23 = vsel %vm427_vm3, 1.0, %v8073_v43  ;;  %v6442_v24 = vsel %vm426_vm5, 1.0, %v8073_v43  ;;  %vm1073_vm3 = vcmp.lt.s32.totalorder %v8280_v9, 7  ;;  %vm8361_vm5 = vcmp.eq.s32.totalorder %v840_v19, 0 }
  0xba   : > { %v513_v25 = vpack.c.bf16 %v6443_v23, %v6442_v24  ;;  %v8297_v23 = vadd.s32 128, %v8280_v9 }
  0xbb   : > { %v377_v26 = vpop.permute.xlu1 %376  ;;  %v374_v27 = vpop.permute.xlu0 %373 }
  0xbc   : > { %vm429_vm6 = vcmp.eq.s32.totalorder %v8170_v38, %v377_v26  ;;  %vm428_vm7 = vcmp.eq.s32.totalorder %v8170_v38, %v374_v27 }
  0xbd   : > { %v6445_v28 = vsel %vm429_vm6, 1.0, %v8073_v43  ;;  %v6444_v29 = vsel %vm428_vm7, 1.0, %v8073_v43  ;;  %7141 = vmatmul.mubr.msk.bf16.gmra.mrb[16].mxu0 %vm557_vm4, %v513_v25  ;;  %v8300_v25 = vadd.s32 120, %v8280_v9 }
  0xbe   : > { %v514_v30 = vpack.c.bf16 %v6445_v28, %v6444_v29 }
  0xbf   : > { %v383_v31 = vpop.permute.xlu1 %382  ;;  %v380_v32 = vpop.permute.xlu0 %379  ;;  %v847_v60 = vand.u32 63, %v8300_v25 }
  0xc0   : > { %vm431_vm8 = vcmp.eq.s32.totalorder %v8170_v38, %v383_v31  ;;  %vm430_vm9 = vcmp.eq.s32.totalorder %v8170_v38, %v380_v32  ;;  %7144 = vmatprep.mubr.msk.bf16.mxu0 %vm557_vm4, %v514_v30 }
  0xc1   : > { %v6447_v33 = vsel %vm431_vm8, 1.0, %v8073_v43  ;;  %v6446_v34 = vsel %vm430_vm9, 1.0, %v8073_v43  ;;  %vm8510_vm8 = vcmp.eq.s32.totalorder %v847_v60, 63 }
  0xc2   : > { %v515_v35 = vpack.c.bf16 %v6447_v33, %v6446_v34 }
  0xc3   : > { %v389_v36 = vpop.permute.xlu1 %388  ;;  %v386_v39 = vpop.permute.xlu0 %385 }
  0xc4   : > { %vm433_vm10 = vcmp.eq.s32.totalorder %v8170_v38, %v389_v36  ;;  %vm432_vm11 = vcmp.eq.s32.totalorder %v8170_v38, %v386_v39 }
  0xc5   : > { %v6449_v40 = vsel %vm433_vm10, 1.0, %v8073_v43  ;;  %v6448_v41 = vsel %vm432_vm11, 1.0, %v8073_v43  ;;  %7145 = vmatmul.mubr.msk.bf16.gmra.mrb[20].mxu0 %vm557_vm4, %v515_v35 }
  0xc6   : > { %v516_v42 = vpack.c.bf16 %v6449_v40, %v6448_v41  ;;  %v7953_v41 = vld [vmem:[%s11874_s3 + $0x8] sm:$0xff]  }
  0xc7   : > { %v395_v44 = vpop.permute.xlu1 %394  ;;  %v392_v45 = vpop.permute.xlu0 %391 }
  0xc8   : > { %vm435_vm12 = vcmp.eq.s32.totalorder %v8170_v38, %v395_v44  ;;  %vm434_vm13 = vcmp.eq.s32.totalorder %v8170_v38, %v392_v45  ;;  %7148 = vmatprep.mubr.msk.bf16.mxu0 %vm557_vm4, %v516_v42 }
  0xc9   : > { %v6451_v46 = vsel %vm435_vm12, 1.0, %v8073_v43  ;;  %v6450_v47 = vsel %vm434_vm13, 1.0, %v8073_v43  ;;  %vm5607_vm13 = vcmask 64512  }
  0xca   : > { %v517_v48 = vpack.c.bf16 %v6451_v46, %v6450_v47 }
  0xcb   : > { %v401_v49 = vpop.permute.xlu1 %400  ;;  %v398_v50 = vpop.permute.xlu0 %397 }
  0xcc   : > { %vm437_vm14 = vcmp.eq.s32.totalorder %v8170_v38, %v401_v49  ;;  %vm436_vm15 = vcmp.eq.s32.totalorder %v8170_v38, %v398_v50 }
  0xcd   : > { %v6453_v51 = vsel %vm437_vm14, 1.0, %v8073_v43  ;;  %v6452_v52 = vsel %vm436_vm15, 1.0, %v8073_v43  ;;  %7149 = vmatmul.mubr.msk.bf16.gmra.mrb[24].mxu0 %vm557_vm4, %v517_v48 }
  0xce   : > { %v518_v53 = vpack.c.bf16 %v6453_v51, %v6452_v52 }
  0xcf   : > { %v407_v54 = vpop.permute.xlu1 %406  ;;  %v404_v55 = vpop.permute.xlu0 %403 }
  0xd0   : > { %vm439_vm0 = vcmp.eq.s32.totalorder %v8170_v38, %v407_v54  ;;  %vm438_vm1 = vcmp.eq.s32.totalorder %v8170_v38, %v404_v55  ;;  %7152 = vmatprep.mubr.msk.bf16.mxu0 %vm557_vm4, %v518_v53  ;;  %v839_v55 = vand.u32 63, %v8292_v20 }
  0xd1   : > { %v6455_v56 = vsel %vm439_vm0, 1.0, %v8073_v43  ;;  %v6454_v57 = vsel %vm438_vm1, 1.0, %v8073_v43  ;;  %v7951_v43 = vld [vmem:[%s11874_s3 + $0x38] sm:$0xff]  }
  0xd2   : > { %v519_v58 = vpack.c.bf16 %v6455_v56, %v6454_v57  ;;  %7162 = vmatprep.subr.bf16.mxu1 %v7951_v43  ;;  %v7954_v57 = vld [vmem:[%s11874_s3 + $0x10] sm:$0xff]   ;;  %vm8390_vm6 = vcmp.eq.s32.totalorder %v839_v55, 63 }
  0xd3   : > { %7163 = vmatpush3.bf16.msra.mxu1 %v7951_v43 }
  0xd4   : > { %7196 = vmatprep.subr.bf16.mxu1 %v8267_v62 }
  0xd5   : > { %7153 = vmatmul.mubr.msk.bf16.gmra.mrb[28].mxu0 %vm557_vm4, %v519_v58  ;;  %v848_v58 = vand.u32 63, %v8297_v23 }
  0xd7   : > { %vm8477_vm7 = vcmp.eq.s32.totalorder %v848_v58, 0 }
 0x170   : > { %v7126_v0 = vpop.f32.mrb[0].mxu0 }
 0x171   : > { %v649_v1 = vadd.f32 %v7126_v0, %v8273_v63  ;;  %v640_v2 = vpop.f32.mrb[1].mxu0  ;;  %v11968_v0 = vmov 0 }
 0x172   : > { %v641_v3 = vadd.f32 %v8273_v63, %v640_v2  ;;  %v7127_v4 = vpop.f32.mrb[2].mxu0  ;;  %v11969_v0 = vsel %vm8361_vm5, 4294967295, %v11968_v0 }
 0x173   : > { %8000 = vtanh.f32 %v649_v1  ;;  %v652_v5 = vadd.f32 %v7127_v4, %v8273_v63  ;;  %v643_v6 = vpop.f32.mrb[3].mxu0  ;;  %11970 = vst [vmem:[#allocation3_spill] sm:$0xff] %v11969_v0  ;;  %v8366_v1 = vadd.s32 192, %v8280_v9 }
 0x174   : > { %8002 = vtanh.f32 %v641_v3  ;;  %v644_v7 = vadd.f32 %v8273_v63, %v643_v6 }
 0x175   : > { %8004 = vtanh.f32 %v652_v5 }
 0x176   : > { %8006 = vtanh.f32 %v644_v7 }
 0x178   : > { %v7130_v8 = vpop.f32.mrb[4].mxu0 }
 0x179   : > { %v665_v10 = vadd.f32 %v7130_v8, %v8273_v63  ;;  %v656_v11 = vpop.f32.mrb[5].mxu0 }
 0x17a   : > { %v657_v12 = vadd.f32 %v8273_v63, %v656_v11  ;;  %v7131_v13 = vpop.f32.mrb[6].mxu0 }
 0x17b   : > { %8008 = vtanh.f32 %v665_v10  ;;  %v668_v15 = vadd.f32 %v7131_v13, %v8273_v63  ;;  %v659_v16 = vpop.f32.mrb[7].mxu0 }
 0x17c   : > { %8010 = vtanh.f32 %v657_v12  ;;  %v660_v17 = vadd.f32 %v8273_v63, %v659_v16 }
 0x17d   : > { %v8001_v18 = vpop.eup %8000  ;;  %8012 = vtanh.f32 %v668_v15 }
 0x17e   : > { %v8288_v37 = vpop.eup %8002  ;;  %8014 = vtanh.f32 %v660_v17  ;;  %v930_v22 = vrot.slane %v8001_v18, 7  ;;  %v1043_v24 = vrot.slane %v8001_v18, 1  ;;  %v7955_v17 = vld [vmem:[%s11874_s3 + $0x18] sm:$0xff]  }
 0x17f   : > { %v8294_v21 = vpop.eup %8004  ;;  %v11879_v29 = vrot.slane %v8288_v37, 7  ;;  %v11878_v44 = vrot.slane %v8288_v37, 1 }
 0x180   : > { %v8007_v26 = vpop.eup %8006  ;;  %v7134_v27 = vpop.f32.mrb[8].mxu0  ;;  %v1155_v28 = vpack.c.bf16 %v8294_v21, %v8001_v18  ;;  %v931_v30 = vrot.slane %v8294_v21, 7  ;;  %v1044_v31 = vrot.slane %v8294_v21, 1  ;;  %v11971_v21 = vmov 0 }
 0x181   : > { %v681_v32 = vadd.f32 %v7134_v27, %v8273_v63  ;;  %v672_v33 = vpop.f32.mrb[9].mxu0  ;;  %v1154_v34 = vpack.c.bf16 %v8007_v26, %v8288_v37  ;;  %v929_v35 = vrot.slane %v8007_v26, 7  ;;  %v1042_v36 = vrot.slane %v8007_v26, 1 }
 0x182   : > { %v673_v39 = vadd.f32 %v8273_v63, %v672_v33  ;;  %v7135_v40 = vpop.f32.mrb[10].mxu0  ;;  %v8314_v42 = vsel %vm960_vm2, %v930_v22, %v931_v30  ;;  %v8319_v45 = vsel %vm1073_vm3, %v1043_v24, %v1044_v31  ;;  %v11972_v21 = vsel %vm8390_vm6, 4294967295, %v11971_v21 }
 0x183   : > { %8016 = vtanh.f32 %v681_v32  ;;  %v684_v46 = vadd.f32 %v7135_v40, %v8273_v63  ;;  %v675_v47 = vpop.f32.mrb[11].mxu0  ;;  %7164 = vmatprep.mubr.msk.bf16.mxu1 %vm557_vm4, %v1154_v34  ;;  %v8325_v48 = vsel %vm960_vm2, %v929_v35, %v930_v22  ;;  %v8331_v49 = vsel %vm960_vm2, %v11879_v29, %v929_v35  ;;  %11973 = vst [vmem:[#allocation4_spill] sm:$0xff] %v11972_v21 }
 0x184   : > { %8018 = vtanh.f32 %v673_v39  ;;  %v676_v50 = vadd.f32 %v8273_v63, %v675_v47  ;;  %7165 = vmatmul.mubr.msk.bf16.vlgmr.msra.gmra.mrb[0].mxu1 %vm557_vm4, %v1155_v28  ;;  %v8339_v52 = vsel %vm1073_vm3, %v1042_v36, %v1043_v24  ;;  %v8348_v54 = vsel %vm1073_vm3, %v11878_v44, %v1042_v36  ;;  %v8423_v39 = vld [vmem:[%s11874_s3 + $0x40] sm:$0xff]  }
 0x185   : > { %v8341_v53 = vpop.eup %8008  ;;  %8020 = vtanh.f32 %v684_v46  ;;  %7197 = vmatpush3.bf16.msra.mxu1 %v8267_v62  ;;  %v856_v40 = vand.u32 63, %v8366_v1  ;;  %v8548_v33 = vadd.s32 248, %v8280_v9 }
 0x186   : > { %v8011_v56 = vpop.eup %8010  ;;  %8022 = vtanh.f32 %v676_v50  ;;  %7198 = vmatprep.subr.bf16.mxu1 %v7953_v41  ;;  %v934_v62 = vrot.slane %v8341_v53, 7  ;;  %v1047_v7 = vrot.slane %v8341_v53, 1 }
 0x187   : > { %v8358_v61 = vpop.eup %8012  ;;  %v932_v43 = vrot.slane %v8011_v56, 7  ;;  %v1045_v2 = vrot.slane %v8011_v56, 1  ;;  %vm8589_vm9 = vcmp.eq.s32.totalorder %v856_v40, 0 }
 0x188   : > { %v8015_v3 = vpop.eup %8014  ;;  %v7138_v4 = vpop.f32.mrb[12].mxu0  ;;  %v1157_v5 = vpack.c.bf16 %v8358_v61, %v8341_v53  ;;  %v935_v6 = vrot.slane %v8358_v61, 7  ;;  %v1048_v8 = vrot.slane %v8358_v61, 1 }
 0x189   : > { %v697_v10 = vadd.f32 %v7138_v4, %v8273_v63  ;;  %v688_v11 = vpop.f32.mrb[13].mxu0  ;;  %v1156_v12 = vpack.c.bf16 %v8015_v3, %v8011_v56  ;;  %7199 = vmatpush3.bf16.msra.mxu1 %v7953_v41  ;;  %v933_v13 = vrot.slane %v8015_v3, 7  ;;  %v8376_v14 = vsel %vm960_vm2, %v931_v30, %v932_v43 }
 0x18a   : > { %v689_v15 = vadd.f32 %v8273_v63, %v688_v11  ;;  %v7139_v16 = vpop.f32.mrb[14].mxu0  ;;  %7200 = vmatprep.subr.bf16.mxu1 %v7954_v57  ;;  %v8384_v18 = vsel %vm960_vm2, %v934_v62, %v935_v6  ;;  %v8388_v19 = vsel %vm1073_vm3, %v1044_v31, %v1045_v2  ;;  %v1046_v20 = vrot.slane %v8015_v3, 1 }
 0x18b   : > { %8024 = vtanh.f32 %v697_v10  ;;  %v700_v22 = vadd.f32 %v7139_v16, %v8273_v63  ;;  %v691_v24 = vpop.f32.mrb[15].mxu0  ;;  %7168 = vmatprep.mubr.msk.bf16.mxu1 %vm557_vm4, %v1156_v12  ;;  %v8398_v26 = vsel %vm960_vm2, %v932_v43, %v933_v13  ;;  %v8402_v27 = vsel %vm960_vm2, %v933_v13, %v934_v62 }
 0x18c   : > { %8026 = vtanh.f32 %v689_v15  ;;  %v692_v28 = vadd.f32 %v8273_v63, %v691_v24  ;;  %7169 = vmatmul.mubr.msk.bf16.gmra.mrb[4].mxu1 %vm557_vm4, %v1157_v5  ;;  %v8414_v34 = vsel %vm1073_vm3, %v1046_v20, %v1047_v7  ;;  %v8418_v35 = vsel %vm1073_vm3, %v1045_v2, %v1046_v20 }
 0x18d   : > { %v8017_v32 = vpop.eup %8016  ;;  %8028 = vtanh.f32 %v700_v22  ;;  %7201 = vmatpush3.bf16.msra.mxu1 %v7954_v57  ;;  %v1098_v46 = vsel %vm1073_vm3, %v1047_v7, %v1048_v8  ;;  %v8433_v56 = vadd.s32 184, %v8280_v9 }
 0x18e   : > { %v8019_v36 = vpop.eup %8018  ;;  %8030 = vtanh.f32 %v692_v28  ;;  %7202 = vmatprep.subr.bf16.mxu1 %v7955_v17  ;;  %v938_v53 = vrot.slane %v8017_v32, 7  ;;  %v1051_v2 = vrot.slane %v8017_v32, 1 }
 0x18f   : > { %v8430_v47 = vpop.eup %8020  ;;  %v936_v50 = vrot.slane %v8019_v36, 7  ;;  %v1049_v55 = vrot.slane %v8019_v36, 1 }
 0x190   : > { %v8023_v57 = vpop.eup %8022  ;;  %v7142_v61 = vpop.f32.mrb[16].mxu0  ;;  %v1159_v43 = vpack.c.bf16 %v8430_v47, %v8017_v32  ;;  %v939_v62 = vrot.slane %v8430_v47, 7  ;;  %v1052_v3 = vrot.slane %v8430_v47, 1 }
 0x191   : > { %v713_v4 = vadd.f32 %v7142_v61, %v8273_v63  ;;  %v704_v5 = vpop.f32.mrb[17].mxu0  ;;  %v1158_v7 = vpack.c.bf16 %v8023_v57, %v8019_v36  ;;  %7203 = vmatpush3.bf16.msra.mxu1 %v7955_v17  ;;  %v937_v10 = vrot.slane %v8023_v57, 7  ;;  %v984_v11 = vsel %vm960_vm2, %v935_v6, %v936_v50 }
 0x192   : > { %v705_v12 = vadd.f32 %v8273_v63, %v704_v5  ;;  %v7143_v13 = vpop.f32.mrb[18].mxu0  ;;  %7236 = vmatprep.subr.bf16.mxu1 %v8423_v39  ;;  %v1001_v15 = vsel %vm8361_vm5, 0.0, %v984_v11  ;;  %v8447_v16 = vsel %vm960_vm2, %v938_v53, %v939_v62  ;;  %v1097_v20 = vsel %vm1073_vm3, %v1048_v8, %v1049_v55 }
 0x193   : > { %8032 = vtanh.f32 %v713_v4  ;;  %v716_v17 = vadd.f32 %v7143_v13, %v8273_v63  ;;  %v707_v22 = vpop.f32.mrb[19].mxu0  ;;  %7172 = vmatprep.mubr.msk.bf16.mxu1 %vm557_vm4, %v1158_v7  ;;  %v983_v6 = vsel %vm960_vm2, %v936_v50, %v937_v10  ;;  %v8457_v24 = vsel %vm960_vm2, %v937_v10, %v938_v53 }
 0x194   : > { %8034 = vtanh.f32 %v705_v12  ;;  %v708_v28 = vadd.f32 %v8273_v63, %v707_v22  ;;  %7173 = vmatmul.mubr.msk.bf16.gmra.mrb[8].mxu1 %vm557_vm4, %v1159_v43  ;;  %v8461_v32 = vpack.c.bf16 %v983_v6, %v1001_v15  ;;  %v1113_v47 = vsel %vm8390_vm6, 0.0, %v1097_v20 }
 0x195   : > { %v8025_v36 = vpop.eup %8024  ;;  %8036 = vtanh.f32 %v716_v17  ;;  %v1050_v50 = vrot.slane %v8023_v57, 1  ;;  %v8469_v53 = vsel %vm1073_vm3, %v1051_v2, %v1052_v3  ;;  %v8471_v5 = vpack.c.bf16 %v1113_v47, %v1098_v46 }
 0x196   : > { %v8027_v61 = vpop.eup %8026  ;;  %8038 = vtanh.f32 %v708_v28  ;;  %v942_v4 = vrot.slane %v8025_v36, 7  ;;  %v1055_v43 = vrot.slane %v8025_v36, 1  ;;  %v11974_v11 = vmov 0 }
 0x197   : > { %v8473_v7 = vpop.eup %8028  ;;  %v940_v10 = vrot.slane %v8027_v61, 7  ;;  %v11975_v11 = vsel %vm8477_vm7, 4294967295, %v11974_v11  ;;  %v8483_v57 = vsel %vm1073_vm3, %v1050_v50, %v1051_v2  ;;  %v8487_v12 = vsel %vm1073_vm3, %v1049_v55, %v1050_v50 }
 0x198   : > { %11976 = vst [vmem:[#allocation5_spill] sm:$0xff] %v11975_v11  ;;  %v1053_v46 = vrot.slane %v8027_v61, 1  ;;  %v8031_v13 = vpop.eup %8030  ;;  %v7146_v15 = vpop.f32.mrb[20].mxu0  ;;  %v1161_v20 = vpack.c.bf16 %v8473_v7, %v8025_v36  ;;  %v943_v17 = vrot.slane %v8473_v7, 7  ;;  %v1056_v58 = vrot.slane %v8473_v7, 1 }
 0x199   : > { %v729_v22 = vadd.f32 %v7146_v15, %v8273_v63  ;;  %v720_v2 = vpop.f32.mrb[21].mxu0  ;;  %v1160_v6 = vpack.c.bf16 %v8031_v13, %v8027_v61  ;;  %v941_v28 = vrot.slane %v8031_v13, 7  ;;  %v8497_v55 = vsel %vm960_vm2, %v939_v62, %v940_v10 }
 0x19a   : > { %v721_v47 = vadd.f32 %v8273_v63, %v720_v2  ;;  %v7147_v50 = vpop.f32.mrb[22].mxu0  ;;  %v8502_v36 = vsel %vm960_vm2, %v942_v4, %v943_v17  ;;  %v8506_v23 = vsel %vm1073_vm3, %v1052_v3, %v1053_v46  ;;  %v1054_v7 = vrot.slane %v8031_v13, 1 }
 0x19b   : > { %v11977_v61 = vmov 0  ;;  %8040 = vtanh.f32 %v729_v22  ;;  %v732_v62 = vadd.f32 %v7147_v50, %v8273_v63  ;;  %v723_v15 = vpop.f32.mrb[23].mxu0  ;;  %7176 = vmatprep.mubr.msk.bf16.mxu1 %vm557_vm4, %v1160_v6  ;;  %v8518_v2 = vsel %vm960_vm2, %v940_v10, %v941_v28 }
 0x19c   : > { %v11978_v61 = vsel %vm8510_vm8, 4294967295, %v11977_v61  ;;  %v8522_v3 = vsel %vm960_vm2, %v941_v28, %v942_v4  ;;  %8042 = vtanh.f32 %v721_v47  ;;  %v724_v25 = vadd.f32 %v8273_v63, %v723_v15  ;;  %7177 = vmatmul.mubr.msk.bf16.gmra.mrb[12].mxu1 %vm557_vm4, %v1161_v20 }
 0x19d   : > { %11979 = vst [vmem:[#allocation6_spill] sm:$0xff] %v11978_v61  ;;  %v8033_v22 = vpop.eup %8032  ;;  %8044 = vtanh.f32 %v732_v62  ;;  %v8534_v4 = vsel %vm1073_vm3, %v1054_v7, %v1055_v43  ;;  %v8538_v6 = vsel %vm1073_vm3, %v1053_v46, %v1054_v7  ;;  %v1090_v47 = vsel %vm1073_vm3, %v1055_v43, %v1056_v58 }
 0x19e   : > { %v8035_v20 = vpop.eup %8034  ;;  %8046 = vtanh.f32 %v724_v25  ;;  %v855_v50 = vand.u32 63, %v8433_v56  ;;  %v946_v10 = vrot.slane %v8033_v22, 7  ;;  %v1059_v28 = vrot.slane %v8033_v22, 1 }
 0x19f   : > { %v8545_v62 = vpop.eup %8036  ;;  %v944_v15 = vrot.slane %v8035_v20, 7  ;;  %v1057_v41 = vrot.slane %v8035_v20, 1 }
 0x1a0   : > { %v8039_v46 = vpop.eup %8038  ;;  %v7150_v7 = vpop.f32.mrb[24].mxu0  ;;  %v1163_v25 = vpack.c.bf16 %v8545_v62, %v8033_v22  ;;  %v947_v59 = vrot.slane %v8545_v62, 7  ;;  %v1060_v13 = vrot.slane %v8545_v62, 1  ;;  %vm8601_vm10 = vcmp.eq.s32.totalorder %v855_v50, 63 }
 0x1a1   : > { %v745_v43 = vadd.f32 %v7150_v7, %v8273_v63  ;;  %v736_v56 = vpop.f32.mrb[25].mxu0  ;;  %v1162_v60 = vpack.c.bf16 %v8039_v46, %v8035_v20  ;;  %v945_v8 = vrot.slane %v8039_v46, 7  ;;  %v976_v31 = vsel %vm960_vm2, %v943_v17, %v944_v15 }
 0x1a2   : > { %v737_v30 = vadd.f32 %v8273_v63, %v736_v56  ;;  %v7151_v51 = vpop.f32.mrb[26].mxu0  ;;  %v1009_v44 = vsel %vm8477_vm7, 0.0, %v976_v31  ;;  %v8561_v29 = vsel %vm960_vm2, %v946_v10, %v947_v59  ;;  %v1089_v22 = vsel %vm1073_vm3, %v1056_v58, %v1057_v41 }
 0x1a3   : > { %8048 = vtanh.f32 %v745_v43  ;;  %v748_v20 = vadd.f32 %v7151_v51, %v8273_v63  ;;  %v739_v62 = vpop.f32.mrb[27].mxu0  ;;  %7180 = vmatprep.mubr.msk.bf16.mxu1 %vm557_vm4, %v1162_v60  ;;  %v975_v17 = vsel %vm960_vm2, %v944_v15, %v945_v8  ;;  %v8571_v7 = vsel %vm960_vm2, %v945_v8, %v946_v10 }
 0x1a4   : > { %8050 = vtanh.f32 %v737_v30  ;;  %v740_v31 = vadd.f32 %v8273_v63, %v739_v62  ;;  %7181 = vmatmul.mubr.msk.bf16.gmra.mrb[16].mxu1 %vm557_vm4, %v1163_v25  ;;  %v8575_v56 = vpack.c.bf16 %v975_v17, %v1009_v44  ;;  %v1121_v60 = vsel %vm8510_vm8, 0.0, %v1089_v22 }
 0x1a5   : > { %v8041_v58 = vpop.eup %8040  ;;  %8052 = vtanh.f32 %v748_v20  ;;  %v1058_v15 = vrot.slane %v8039_v46, 1  ;;  %v8583_v8 = vsel %vm1073_vm3, %v1059_v28, %v1060_v13  ;;  %v8585_v43 = vpack.c.bf16 %v1121_v60, %v1090_v47 }
 0x1a6   : > { %11980 = vst [vmem:[#allocation7_spill] sm:$0xff] %v8583_v8  ;;  %v8043_v30 = vpop.eup %8042  ;;  %8054 = vtanh.f32 %v740_v31  ;;  %v950_v10 = vrot.slane %v8041_v58, 7  ;;  %v1063_v44 = vrot.slane %v8041_v58, 1  ;;  %v11981_v20 = vmov 0 }
 0x1a7   : > { %v8045_v25 = vpop.eup %8044  ;;  %v948_v62 = vrot.slane %v8043_v30, 7  ;;  %v11982_v20 = vsel %vm8589_vm9, 4294967295, %v11981_v20  ;;  %v8595_v46 = vsel %vm1073_vm3, %v1058_v15, %v1059_v28  ;;  %v8599_v22 = vsel %vm1073_vm3, %v1057_v41, %v1058_v15 }
 0x1a8   : > { %11983 = vst [vmem:[#allocation8_spill] sm:$0xff] %v11982_v20  ;;  %11984 = vst [vmem:[#allocation9_spill] sm:$0xff] %v8595_v46  ;;  %v1061_v17 = vrot.slane %v8043_v30, 1  ;;  %v11986_v47 = vmov 0  ;;  %v8047_v31 = vpop.eup %8046  ;;  %v7154_v60 = vpop.f32.mrb[28].mxu0  ;;  %v1165_v1 = vpack.c.bf16 %v8045_v25, %v8041_v58  ;;  %v951_v40 = vrot.slane %v8045_v25, 7 }
 0x1a9   : > { %11985 = vst [vmem:[#allocation10_spill] sm:$0xff] %v8599_v22  ;;  %v11987_v47 = vsel %vm8601_vm10, 4294967295, %v11986_v47  ;;  %v1064_v38 = vrot.slane %v8045_v25, 1  ;;  %v761_v28 = vadd.f32 %v7154_v60, %v8273_v63  ;;  %v752_v61 = vpop.f32.mrb[29].mxu0  ;;  %v1164_v11 = vpack.c.bf16 %v8047_v31, %v8043_v30 }
 0x1aa   : > { %11988 = vst [vmem:[#allocation11_spill] sm:$0xff] %v11987_v47  ;;  %v949_v21 = vrot.slane %v8047_v31, 7  ;;  %v8610_v41 = vsel %vm960_vm2, %v947_v59, %v948_v62  ;;  %v753_v50 = vadd.f32 %v8273_v63, %v752_v61  ;;  %v7155_v15 = vpop.f32.mrb[30].mxu0  ;;  %v8615_v58 = vsel %vm960_vm2, %v950_v10, %v951_v40 }
 0x1ab   : > { %v8619_v51 = vsel %vm1073_vm3, %v1060_v13, %v1061_v17  ;;  %v1062_v25 = vrot.slane %v8047_v31, 1  ;;  %8056 = vtanh.f32 %v761_v28  ;;  %v764_v30 = vadd.f32 %v7155_v15, %v8273_v63  ;;  %v755_v60 = vpop.f32.mrb[31].mxu0  ;;  %7184 = vmatprep.mubr.msk.bf16.mxu1 %vm557_vm4, %v1164_v11 }
 0x1ac   : > { %11989 = vst [vmem:[#allocation12_spill] sm:$0xff] %v8619_v51  ;;  %v8625_v59 = vsel %vm960_vm2, %v948_v62, %v949_v21  ;;  %v8629_v61 = vsel %vm960_vm2, %v949_v21, %v950_v10  ;;  %8058 = vtanh.f32 %v753_v50  ;;  %v756_v0 = vadd.f32 %v8273_v63, %v755_v60  ;;  %7185 = vmatmul.mubr.msk.bf16.gmra.mrb[20].mxu1 %vm557_vm4, %v1165_v1 }
 0x1ad   : > { %v8049_v11 = vpop.eup %8048  ;;  %8060 = vtanh.f32 %v764_v30  ;;  %v8641_v21 = vsel %vm1073_vm3, %v1062_v25, %v1063_v44  ;;  %v8645_v63 = vsel %vm1073_vm3, %v1061_v17, %v1062_v25  ;;  %v832_v1 = vand.u32 63, %v8280_v9  ;;  %v7999_v9 = vld [vmem:[%s11875_s4 + $0x18] sm:$0xff]  }
 0x1ae   : > { %11990 = vst [vmem:[#allocation13_spill] sm:$0xff] %v8641_v21  ;;  %11991 = vst [vmem:[#allocation14_spill] sm:$0xff] %v8645_v63  ;;  %v8051_v10 = vpop.eup %8050  ;;  %8062 = vtanh.f32 %v756_v0  ;;  %v1082_v50 = vsel %vm1073_vm3, %v1063_v44, %v1064_v38  ;;  %v954_v60 = vrot.slane %v8049_v11, 7  ;;  %v863_v31 = vand.u32 63, %v8548_v33 }
 0x1af   : > { %v8053_v15 = vpop.eup %8052  ;;  %v952_v30 = vrot.slane %v8051_v10, 7  ;;  %v1065_v62 = vrot.slane %v8051_v10, 1  ;;  %v1067_v25 = vrot.slane %v8049_v11, 1  ;;  %vm8693_vm11 = vcmp.eq.s32.totalorder %v832_v1, 0 }
 0x1b0   : > { %v8055_v13 = vpop.eup %8054  ;;  %v1167_v8 = vpack.c.bf16 %v8053_v15, %v8049_v11  ;;  %v955_v17 = vrot.slane %v8053_v15, 7  ;;  %v1068_v51 = vrot.slane %v8053_v15, 1  ;;  %vm8697_vm12 = vcmp.eq.s32.totalorder %v863_v31, 63 }
 0x1b1   : > { %v1166_v0 = vpack.c.bf16 %v8055_v13, %v8051_v10  ;;  %v953_v22 = vrot.slane %v8055_v13, 7  ;;  %v968_v46 = vsel %vm960_vm2, %v951_v40, %v952_v30  ;;  %v1081_v28 = vsel %vm1073_vm3, %v1064_v38, %v1065_v62 }
 0x1b2   : > { %v1017_v44 = vsel %vm8589_vm9, 0.0, %v968_v46  ;;  %v8661_v63 = vsel %vm960_vm2, %v954_v60, %v955_v17  ;;  %v1129_v33 = vsel %vm8601_vm10, 0.0, %v1081_v28  ;;  %v1066_v11 = vrot.slane %v8055_v13, 1 }
 0x1b3   : > { %7188 = vmatprep.mubr.msk.bf16.mxu1 %vm557_vm4, %v1166_v0  ;;  %v967_v10 = vsel %vm960_vm2, %v952_v30, %v953_v22  ;;  %v8670_v40 = vsel %vm960_vm2, %v953_v22, %v954_v60  ;;  %v8672_v38 = vpack.c.bf16 %v1129_v33, %v1082_v50  ;;  %v8676_v46 = vsel %vm1073_vm3, %v1067_v25, %v1068_v51 }
 0x1b4   : > { %7189 = vmatmul.mubr.msk.bf16.gmra.mrb[24].mxu1 %vm557_vm4, %v1167_v8  ;;  %v8679_v15 = vpack.c.bf16 %v967_v10, %v1017_v44  ;;  %v8685_v28 = vsel %vm1073_vm3, %v1066_v11, %v1067_v25  ;;  %v8689_v22 = vsel %vm1073_vm3, %v1065_v62, %v1066_v11 }
 0x1b5   : > { %11992 = vst [vmem:[#allocation15_spill] sm:$0xff] %v8672_v38  ;;  %11993 = vst [vmem:[#allocation16_spill] sm:$0xff] %v8685_v28  ;;  %v8057_v50 = vpop.eup %8056  ;;  %v11999_v28 = vrot.slane %v8288_v37, 7 }
 0x1b6   : > { %11994 = vst [vmem:[#allocation17_spill] sm:$0xff] %v8689_v22  ;;  %v8059_v60 = vpop.eup %8058  ;;  %v958_v33 = vrot.slane %v8057_v50, 7  ;;  %v1071_v47 = vrot.slane %v8057_v50, 1 }
 0x1b7   : > { %v8061_v0 = vpop.eup %8060  ;;  %v956_v44 = vrot.slane %v8059_v60, 7  ;;  %v1069_v10 = vrot.slane %v8059_v60, 1 }
 0x1b8   : > { %v8063_v13 = vpop.eup %8062  ;;  %v1169_v62 = vpack.c.bf16 %v8061_v0, %v8057_v50  ;;  %v959_v11 = vrot.slane %v8061_v0, 7  ;;  %v1072_v20 = vrot.slane %v8061_v0, 1 }
 0x1b9   : > { %v1168_v38 = vpack.c.bf16 %v8063_v13, %v8059_v60  ;;  %v957_v30 = vrot.slane %v8063_v13, 7  ;;  %v964_v1 = vsel %vm960_vm2, %v955_v17, %v956_v44  ;;  %v8705_v22 = vsel %vm1073_vm3, %v1068_v51, %v1069_v10 }
 0x1ba   : > { %v992_v31 = vsel %vm960_vm2, %v959_v11, %v11999_v28  ;;  %v961_v21 = vsel %vm960_vm2, %v958_v33, %v959_v11  ;;  %v1070_v60 = vrot.slane %v8063_v13, 1  ;;  %v1074_v28 = vsel %vm1073_vm3, %v1071_v47, %v1072_v20 }
 0x1bb   : > { %7192 = vmatprep.mubr.msk.bf16.mxu1 %vm557_vm4, %v1168_v38  ;;  %v993_v17 = vsel %vm8693_vm11, 0.0, %v992_v31  ;;  %v963_v51 = vsel %vm960_vm2, %v956_v44, %v957_v30  ;;  %v962_v0 = vsel %vm960_vm2, %v957_v30, %v958_v33  ;;  %v7960_v31 = vld [vmem:[%s11874_s3 + $0x80] sm:$0xff]   ;;  %v7961_v30 = vld [vmem:[%s11874_s3 + $0x88] sm:$0xff]   ;;  %v12000_v33 = vrot.slane %v8288_v37, 1 }
 0x1bc   : > { %7193 = vmatmul.mubr.msk.bf16.gmra.mrb[28].mxu1 %vm557_vm4, %v1169_v62  ;;  %v1025_v11 = vpack.c.bf16 %v8331_v49, %v993_v17  ;;  %v1039_v50 = vpack.c.bf16 %v963_v51, %v964_v1  ;;  %v1040_v13 = vpack.c.bf16 %v961_v21, %v962_v0  ;;  %v1075_v38 = vsel %vm1073_vm3, %v1070_v60, %v1071_v47  ;;  %v7962_v1 = vld [vmem:[%s11874_s3 + $0x90] sm:$0xff]   ;;  %v7957_v37 = vld [vmem:[%s11874_s3 + $0x48] sm:$0xff]  }
 0x1bd   : > { %v1076_v44 = vsel %vm1073_vm3, %v1069_v10, %v1070_v60  ;;  %v1105_v49 = vsel %vm1073_vm3, %v1072_v20, %v12000_v33  ;;  %7276 = vmatprep.subr.bf16.mxu0 %v7960_v31  ;;  %v12001_v20 = vpack.c.bf16 %v8314_v42, %v8325_v48  ;;  %v7963_v10 = vld [vmem:[%s11874_s3 + $0x98] sm:$0xff]   ;;  %v12002_v60 = vpack.c.bf16 %v8398_v26, %v8376_v14  ;;  %v7958_v17 = vld [vmem:[%s11874_s3 + $0x50] sm:$0xff]  }
 0x1be   : > { %7204 = vmatprep.mubr.msk.bf16.mxu1 %vm557_vm4, %v1025_v11  ;;  %v1152_v21 = vpack.c.bf16 %v1075_v38, %v1076_v44  ;;  %v1137_v47 = vsel %vm8697_vm12, 0.0, %v1105_v49  ;;  %7277 = vmatpush3.bf16.msra.mxu0 %v7960_v31  ;;  %v7959_v42 = vld [vmem:[%s11874_s3 + $0x58] sm:$0xff]   ;;  %v12003_v48 = vpack.c.bf16 %v8384_v18, %v8402_v27  ;;  %v12004_v14 = vpack.c.bf16 %v8447_v16, %v8457_v24 }
 0x1bf   : > { %v1153_v62 = vpack.c.bf16 %v1137_v47, %v1074_v28  ;;  %7278 = vmatprep.subr.bf16.mxu0 %v7961_v30  ;;  %v12005_v26 = vpack.c.bf16 %v8518_v2, %v8497_v55  ;;  %v12006_v18 = vpack.c.bf16 %v8502_v36, %v8522_v3  ;;  %v12007_v27 = vpack.c.bf16 %v8561_v29, %v8571_v7  ;;  %v12026_v2 = vld [vmem:[#allocation15_spill] sm:$0xff]  ;;  %v12027_v3 = vld [vmem:[#allocation16_spill] sm:$0xff] }
 0x1c0   : > { %v12009_v16 = vpack.c.bf16 %v8615_v58, %v8629_v61  ;;  %v12010_v24 = vpack.c.bf16 %v8661_v63, %v8670_v40  ;;  %v12011_v29 = vpack.c.bf16 %v8339_v52, %v8348_v54  ;;  %v12013_v55 = vpack.c.bf16 %v8414_v34, %v8418_v35  ;;  %v12017_v54 = vld [vmem:[#allocation9_spill] sm:$0xff]  ;;  %v12020_v35 = vld [vmem:[#allocation12_spill] sm:$0xff]  ;;  %v8871_v61 = vld [vmem:[%s11876_s5 + $0x5] ss:$0 sm:$0xff] }
 0x1c1   : > { %v12014_v36 = vpack.c.bf16 %v8483_v57, %v8487_v12  ;;  %v12015_v52 = vpack.c.bf16 %v8506_v23, %v8469_v53  ;;  %v12023_v53 = vld [vmem:[#allocation13_spill] sm:$0xff]  ;;  %v12024_v12 = vld [vmem:[#allocation14_spill] sm:$0xff]  ;;  %v12030_v7 = vpack.c.bf16 %v8705_v22, %v8676_v46 }
 0x1c2   : > { %7279 = vmatpush3.bf16.msra.mxu0 %v7961_v30  ;;  %v12025_v23 = vpack.c.bf16 %v12023_v53, %v12024_v12  ;;  %v7966_v53 = vld [vmem:[%s11874_s3 + $0x70] sm:$0xff]  }
 0x1c3   : > { %7280 = vmatprep.subr.bf16.mxu0 %v7962_v1 }
 0x1c4   : > { %7205 = vmatmul.mubr.msk.bf16.vlgmr.msra.gmra.mrb[0].mxu1 %vm557_vm4, %v12001_v20 }
 0x1c5   : > { %7237 = vmatpush3.bf16.msra.mxu1 %v8423_v39  ;;  %7208 = vmatprep.mubr.msk.bf16.mxu1 %vm557_vm4, %v12002_v60  ;;  %v12008_v39 = vpack.c.bf16 %v8625_v59, %v8610_v41 }
 0x1c6   : > { %7238 = vmatprep.subr.bf16.mxu1 %v7957_v37  ;;  %7281 = vmatpush3.bf16.msra.mxu0 %v7962_v1 }
 0x1c7   : > { %7282 = vmatprep.subr.bf16.mxu0 %v7963_v10 }
 0x1c9   : > { %7239 = vmatpush3.bf16.msra.mxu1 %v7957_v37 }
 0x1ca   : > { %7240 = vmatprep.subr.bf16.mxu1 %v7958_v17  ;;  %7283 = vmatpush3.bf16.msra.mxu0 %v7963_v10 }
 0x1cc   : > { %7209 = vmatmul.mubr.msk.bf16.gmra.mrb[4].mxu1 %vm557_vm4, %v12003_v48 }
 0x1cd   : > { %7212 = vmatprep.mubr.msk.bf16.mxu1 %vm557_vm4, %v8461_v32  ;;  %7241 = vmatpush3.bf16.msra.mxu1 %v7958_v17  ;;  %v12012_v32 = vpack.c.bf16 %v8388_v19, %v8319_v45  ;;  %v12016_v45 = vpack.c.bf16 %v8534_v4, %v8538_v6  ;;  %v12018_v19 = vld [vmem:[#allocation10_spill] sm:$0xff]  ;;  %v12028_v4 = vld [vmem:[#allocation17_spill] sm:$0xff] }
 0x1ce   : > { %7242 = vmatprep.subr.bf16.mxu1 %v7959_v42  ;;  %v12019_v34 = vpack.c.bf16 %v12017_v54, %v12018_v19  ;;  %v12029_v6 = vpack.c.bf16 %v12027_v3, %v12028_v4 }
 0x1d1   : > { %7243 = vmatpush3.bf16.msra.mxu1 %v7959_v42 }
 0x1d4   : > { %7213 = vmatmul.mubr.msk.bf16.gmra.mrb[8].mxu1 %vm557_vm4, %v12004_v14 }
 0x1d5   : > { %7216 = vmatprep.mubr.msk.bf16.mxu1 %vm557_vm4, %v12005_v26 }
 0x1dc   : > { %7217 = vmatmul.mubr.msk.bf16.gmra.mrb[12].mxu1 %vm557_vm4, %v12006_v18 }
 0x1dd   : > { %7220 = vmatprep.mubr.msk.bf16.mxu1 %vm557_vm4, %v8575_v56  ;;  %v7964_v56 = vld [vmem:[%s11874_s3 + $0x60] sm:$0xff]  }
 0x1de   : > { %7316 = vmatprep.subr.bf16.mxu0 %v7964_v56 }
 0x1e4   : > { %7221 = vmatmul.mubr.msk.bf16.gmra.mrb[16].mxu1 %vm557_vm4, %v12007_v27 }
 0x1e5   : > { %7224 = vmatprep.mubr.msk.bf16.mxu1 %vm557_vm4, %v12008_v39 }
 0x1ec   : > { %7225 = vmatmul.mubr.msk.bf16.gmra.mrb[20].mxu1 %vm557_vm4, %v12009_v16  ;;  %v7965_v16 = vld [vmem:[%s11874_s3 + $0x68] sm:$0xff]  }
 0x1ed   : > { %7228 = vmatprep.mubr.msk.bf16.mxu1 %vm557_vm4, %v8679_v15 }
 0x1f4   : > { %7229 = vmatmul.mubr.msk.bf16.gmra.mrb[24].mxu1 %vm557_vm4, %v12010_v24 }
 0x1f5   : > { %7232 = vmatprep.mubr.msk.bf16.mxu1 %vm557_vm4, %v1039_v50 }
 0x1fc   : > { %7233 = vmatmul.mubr.msk.bf16.gmra.mrb[28].mxu1 %vm557_vm4, %v1040_v13 }
 0x1fd   : > { %7244 = vmatprep.mubr.msk.bf16.mxu1 %vm557_vm4, %v12011_v29 }
 0x204   : > { %7245 = vmatmul.mubr.msk.bf16.vlgmr.msra.gmra.mrb[0].mxu1 %vm557_vm4, %v12012_v32 }
 0x205   : > { %7248 = vmatprep.mubr.msk.bf16.mxu1 %vm557_vm4, %v12013_v55 }
 0x20c   : > { %7249 = vmatmul.mubr.msk.bf16.gmra.mrb[4].mxu1 %vm557_vm4, %v8471_v5  ;;  %v12021_v5 = vld [vmem:[#allocation7_spill] sm:$0xff] }
 0x20d   : > { %7252 = vmatprep.mubr.msk.bf16.mxu1 %vm557_vm4, %v12014_v36  ;;  %v12022_v57 = vpack.c.bf16 %v12020_v35, %v12021_v5 }
 0x214   : > { %7253 = vmatmul.mubr.msk.bf16.gmra.mrb[8].mxu1 %vm557_vm4, %v12015_v52 }
 0x215   : > { %7256 = vmatprep.mubr.msk.bf16.mxu1 %vm557_vm4, %v12016_v45 }
 0x21c   : > { %7257 = vmatmul.mubr.msk.bf16.gmra.mrb[12].mxu1 %vm557_vm4, %v8585_v43  ;;  %v8865_v43 = vld [vmem:[%s11876_s5 + $0x1] ss:$0 sm:$0xff] }
 0x21d   : > { %7260 = vmatprep.mubr.msk.bf16.mxu1 %vm557_vm4, %v12019_v34 }
 0x224   : > { %7261 = vmatmul.mubr.msk.bf16.gmra.mrb[16].mxu1 %vm557_vm4, %v12022_v57 }
 0x225   : > { %7264 = vmatprep.mubr.msk.bf16.mxu1 %vm557_vm4, %v12025_v23 }
 0x22c   : > { %7265 = vmatmul.mubr.msk.bf16.gmra.mrb[20].mxu1 %vm557_vm4, %v12026_v2 }
 0x22d   : > { %7268 = vmatprep.mubr.msk.bf16.mxu1 %vm557_vm4, %v12029_v6 }
 0x234   : > { %7269 = vmatmul.mubr.msk.bf16.gmra.mrb[24].mxu1 %vm557_vm4, %v12030_v7 }
 0x235   : > { %7272 = vmatprep.mubr.msk.bf16.mxu1 %vm557_vm4, %v1152_v21 }
 0x23c   : > { %7273 = vmatmul.mubr.msk.bf16.gmra.mrb[28].mxu1 %vm557_vm4, %v1153_v62 }
 0x2d7   : > { %v7246_v41 = vpop.f32.mrb[0].mxu1 }
 0x2d8   : > { %v1934_v58 = vadd.f32 %v7246_v41, %v8865_v43  ;;  %v1768_v59 = vpop.f32.mrb[1].mxu1 }
 0x2d9   : > { %v1932_v63 = vadd.f32 %v8865_v43, %v1768_v59  ;;  %v7247_v40 = vpop.f32.mrb[2].mxu1 }
 0x2da   : > { %v1966_v46 = vmax.f32 %v1934_v58, 0.0  ;;  %v1935_v15 = vadd.f32 %v7247_v40, %v8865_v43  ;;  %v1771_v22 = vpop.f32.mrb[3].mxu1 }
 0x2db   : > { %v1964_v50 = vmax.f32 %v1932_v63, 0.0  ;;  %v1933_v51 = vadd.f32 %v8865_v43, %v1771_v22 }
 0x2dc   : > { %v2003_v0 = vadd.f32 %v8871_v61, %v1966_v46  ;;  %v1967_v28 = vmax.f32 %v1935_v15, 0.0 }
 0x2dd   : > { %v8878_v11 = vadd.f32 %v8871_v61, %v1964_v50  ;;  %v1965_v13 = vmax.f32 %v1933_v51, 0.0 }
 0x2de   : > { %v2035_v38 = vrot.slane %v2003_v0, 7  ;;  %v8881_v31 = vadd.f32 %v8871_v61, %v1967_v28  ;;  %v2147_v30 = vrot.slane %v2003_v0, 1 }
 0x2df   : > { %v11903_v44 = vrot.slane %v8878_v11, 7  ;;  %v11902_v33 = vrot.slane %v8878_v11, 1  ;;  %v2002_v49 = vadd.f32 %v8871_v61, %v1965_v13  ;;  %v7250_v21 = vpop.f32.mrb[4].mxu1 }
 0x2e0   : > { %v2036_v47 = vrot.slane %v8881_v31, 7  ;;  %v2148_v62 = vrot.slane %v8881_v31, 1  ;;  %v2258_v1 = vpack.c.bf16 %v8881_v31, %v2003_v0  ;;  %v1938_v37 = vadd.f32 %v7250_v21, %v8865_v43  ;;  %v1784_v20 = vpop.f32.mrb[5].mxu1 }
 0x2e1   : > { %v2034_v10 = vrot.slane %v2002_v49, 7  ;;  %v2146_v60 = vrot.slane %v2002_v49, 1  ;;  %v1936_v17 = vadd.f32 %v8865_v43, %v1784_v20  ;;  %v7251_v42 = vpop.f32.mrb[6].mxu1  ;;  %v2257_v48 = vpack.c.bf16 %v2002_v49, %v8878_v11 }
 0x2e2   : > { %v8894_v14 = vsel %vm960_vm2, %v2035_v38, %v2036_v47  ;;  %v8898_v26 = vsel %vm1073_vm3, %v2147_v30, %v2148_v62  ;;  %v1970_v18 = vmax.f32 %v1938_v37, 0.0  ;;  %v1939_v27 = vadd.f32 %v7251_v42, %v8865_v43  ;;  %v1787_v39 = vpop.f32.mrb[7].mxu1 }
 0x2e3   : > { %12031 = vst [vmem:[#allocation9_spill] sm:$0xff] %v8898_v26  ;;  %v8906_v24 = vsel %vm960_vm2, %v2034_v10, %v2035_v38  ;;  %v1968_v29 = vmax.f32 %v1936_v17, 0.0  ;;  %v1937_v32 = vadd.f32 %v8865_v43, %v1787_v39  ;;  %7284 = vmatprep.mubr.msk.bf16.mxu0 %vm557_vm4, %v2257_v48  ;;  %v8914_v55 = vsel %vm960_vm2, %v11903_v44, %v2034_v10 }
 0x2e4   : > { %v8919_v52 = vadd.f32 %v8871_v61, %v1970_v18  ;;  %v1971_v45 = vmax.f32 %v1939_v27, 0.0  ;;  %7285 = vmatmul.mubr.msk.bf16.vlgmr.msra.gmra.mrb[32].mxu0 %vm557_vm4, %v2258_v1  ;;  %v8924_v54 = vsel %vm1073_vm3, %v2146_v60, %v2147_v30  ;;  %v8931_v35 = vsel %vm1073_vm3, %v11902_v33, %v2146_v60  ;;  %v7967_v30 = vld [vmem:[%s11874_s3 + $0x78] sm:$0xff]  }
 0x2e5   : > { %12032 = vst [vmem:[#allocation10_spill] sm:$0xff] %v8924_v54  ;;  %v2005_v19 = vadd.f32 %v8871_v61, %v1968_v29  ;;  %v1969_v34 = vmax.f32 %v1937_v32, 0.0  ;;  %7317 = vmatpush3.bf16.msra.mxu0 %v7964_v56  ;;  %12033 = vst [vmem:[#allocation12_spill] sm:$0xff] %v8931_v35 }
 0x2e6   : > { %v2039_v5 = vrot.slane %v8919_v52, 7  ;;  %v8935_v57 = vadd.f32 %v8871_v61, %v1971_v45  ;;  %7318 = vmatprep.subr.bf16.mxu0 %v7965_v16  ;;  %v2151_v23 = vrot.slane %v8919_v52, 1  ;;  %v9008_v45 = vld [vmem:[%s11874_s3 + $0xa0] sm:$0xff]  }
 0x2e7   : > { %v2037_v2 = vrot.slane %v2005_v19, 7  ;;  %v2149_v3 = vrot.slane %v2005_v19, 1  ;;  %v2006_v4 = vadd.f32 %v8871_v61, %v1969_v34  ;;  %v7254_v6 = vpop.f32.mrb[8].mxu1 }
 0x2e8   : > { %v2040_v7 = vrot.slane %v8935_v57, 7  ;;  %v2152_v56 = vrot.slane %v8935_v57, 1  ;;  %v1942_v41 = vadd.f32 %v7254_v6, %v8865_v43  ;;  %v1800_v58 = vpop.f32.mrb[9].mxu1  ;;  %v2260_v59 = vpack.c.bf16 %v8935_v57, %v8919_v52 }
 0x2e9   : > { %v8951_v63 = vsel %vm1073_vm3, %v2148_v62, %v2149_v3  ;;  %v2038_v40 = vrot.slane %v2006_v4, 7  ;;  %v2150_v46 = vrot.slane %v2006_v4, 1  ;;  %v1940_v15 = vadd.f32 %v8865_v43, %v1800_v58  ;;  %v7255_v22 = vpop.f32.mrb[10].mxu1  ;;  %7319 = vmatpush3.bf16.msra.mxu0 %v7965_v16 }
 0x2ea   : > { %12034 = vst [vmem:[#allocation7_spill] sm:$0xff] %v8951_v63  ;;  %v1974_v51 = vmax.f32 %v1942_v41, 0.0  ;;  %v1943_v0 = vadd.f32 %v7255_v22, %v8865_v43  ;;  %v1803_v28 = vpop.f32.mrb[11].mxu1  ;;  %v2259_v13 = vpack.c.bf16 %v2006_v4, %v2005_v19  ;;  %7320 = vmatprep.subr.bf16.mxu0 %v7966_v53  ;;  %v8967_v21 = vsel %vm960_vm2, %v2036_v47, %v2037_v2 }
 0x2eb   : > { %v1972_v38 = vmax.f32 %v1940_v15, 0.0  ;;  %v1941_v31 = vadd.f32 %v8865_v43, %v1803_v28  ;;  %v8963_v49 = vsel %vm960_vm2, %v2037_v2, %v2038_v40  ;;  %v8977_v20 = vsel %vm960_vm2, %v2039_v5, %v2040_v7 }
 0x2ec   : > { %v8970_v62 = vadd.f32 %v8871_v61, %v1974_v51  ;;  %v1975_v1 = vmax.f32 %v1943_v0, 0.0  ;;  %7288 = vmatprep.mubr.msk.bf16.mxu0 %vm557_vm4, %v2259_v13  ;;  %v8985_v47 = vsel %vm960_vm2, %v2038_v40, %v2039_v5  ;;  %v8991_v17 = vsel %vm1073_vm3, %v2150_v46, %v2151_v23 }
 0x2ed   : > { %v8980_v10 = vadd.f32 %v8871_v61, %v1972_v38  ;;  %v1973_v60 = vmax.f32 %v1941_v31, 0.0  ;;  %7289 = vmatmul.mubr.msk.bf16.gmra.mrb[36].mxu0 %vm557_vm4, %v2260_v59  ;;  %12035 = vst [vmem:[#allocation13_spill] sm:$0xff] %v8991_v17  ;;  %v9012_v19 = vsel %vm1073_vm3, %v2149_v3, %v2150_v46 }
 0x2ee   : > { %v2043_v42 = vrot.slane %v8970_v62, 7  ;;  %v11904_v48 = vrot.slane %v8970_v62, 1  ;;  %v8996_v18 = vadd.f32 %v8871_v61, %v1975_v1  ;;  %7321 = vmatpush3.bf16.msra.mxu0 %v7966_v53  ;;  %12036 = vst [vmem:[#allocation14_spill] sm:$0xff] %v9012_v19 }
 0x2ef   : > { %v2041_v39 = vrot.slane %v8980_v10, 7  ;;  %v2153_v16 = vrot.slane %v8980_v10, 1  ;;  %v9003_v29 = vadd.f32 %v8871_v61, %v1973_v60  ;;  %v7258_v32 = vpop.f32.mrb[12].mxu1  ;;  %7322 = vmatprep.subr.bf16.mxu0 %v7967_v30 }
 0x2f0   : > { %v2044_v34 = vrot.slane %v8996_v18, 7  ;;  %v1946_v53 = vadd.f32 %v7258_v32, %v8865_v43  ;;  %v1816_v2 = vpop.f32.mrb[13].mxu1  ;;  %v2262_v4 = vpack.c.bf16 %v8996_v18, %v8970_v62 }
 0x2f1   : > { %v2042_v6 = vrot.slane %v9003_v29, 7  ;;  %v2154_v41 = vrot.slane %v9003_v29, 1  ;;  %v1944_v58 = vadd.f32 %v8865_v43, %v1816_v2  ;;  %v7259_v59 = vpop.f32.mrb[14].mxu1  ;;  %v2261_v3 = vpack.c.bf16 %v9003_v29, %v8980_v10 }
 0x2f2   : > { %v1978_v40 = vmax.f32 %v1946_v53, 0.0  ;;  %v1947_v46 = vadd.f32 %v7259_v59, %v8865_v43  ;;  %v1819_v15 = vpop.f32.mrb[15].mxu1  ;;  %7323 = vmatpush3.bf16.msra.mxu0 %v7967_v30  ;;  %v2088_v22 = vsel %vm960_vm2, %v2040_v7, %v2041_v39  ;;  %v9029_v51 = vsel %vm960_vm2, %v2043_v42, %v2044_v34 }
 0x2f3   : > { %v1976_v0 = vmax.f32 %v1944_v58, 0.0  ;;  %v1945_v28 = vadd.f32 %v8865_v43, %v1819_v15  ;;  %7292 = vmatprep.mubr.msk.bf16.mxu0 %vm557_vm4, %v2261_v3  ;;  %7356 = vmatprep.subr.bf16.mxu0 %v9008_v45  ;;  %v2087_v13 = vsel %vm960_vm2, %v2041_v39, %v2042_v6  ;;  %v2105_v31 = vsel %vm8361_vm5, 0.0, %v2088_v22 }
 0x2f4   : > { %v9039_v30 = vadd.f32 %v8871_v61, %v1978_v40  ;;  %v1979_v7 = vmax.f32 %v1947_v46, 0.0  ;;  %v9041_v1 = vpack.c.bf16 %v2087_v13, %v2105_v31  ;;  %v9045_v60 = vsel %vm960_vm2, %v2042_v6, %v2043_v42 }
 0x2f5   : > { %v9048_v32 = vadd.f32 %v8871_v61, %v1976_v0  ;;  %v1977_v53 = vmax.f32 %v1945_v28, 0.0  ;;  %7293 = vmatmul.mubr.msk.bf16.gmra.mrb[40].mxu0 %vm557_vm4, %v2262_v4  ;;  %v2200_v42 = vsel %vm1073_vm3, %v2152_v56, %v2153_v16  ;;  %v2201_v15 = vsel %vm1073_vm3, %v2151_v23, %v2152_v56 }
 0x2f6   : > { %v2047_v58 = vrot.slane %v9039_v30, 7  ;;  %v9058_v3 = vadd.f32 %v8871_v61, %v1979_v7  ;;  %v9145_v36 = vsel %vm1073_vm3, %v2153_v16, %v2154_v41 }
 0x2f7   : > { %v2045_v4 = vrot.slane %v9048_v32, 7  ;;  %v11905_v6 = vrot.slane %v9048_v32, 1  ;;  %v9069_v40 = vadd.f32 %v8871_v61, %v1977_v53  ;;  %v7262_v46 = vpop.f32.mrb[16].mxu1  ;;  %12041 = vst [vmem:[#allocation17_spill] sm:$0xff] %v9145_v36 }
 0x2f8   : > { %v2048_v22 = vrot.slane %v9058_v3, 7  ;;  %v1950_v28 = vadd.f32 %v7262_v46, %v8865_v43  ;;  %v1832_v13 = vpop.f32.mrb[17].mxu1  ;;  %v2264_v31 = vpack.c.bf16 %v9058_v3, %v9039_v30 }
 0x2f9   : > { %v2046_v7 = vrot.slane %v9069_v40, 7  ;;  %v1948_v57 = vadd.f32 %v8865_v43, %v1832_v13  ;;  %v7263_v52 = vpop.f32.mrb[18].mxu1  ;;  %v2263_v23 = vpack.c.bf16 %v9069_v40, %v9048_v32  ;;  %v9090_v46 = vsel %vm960_vm2, %v2044_v34, %v2045_v4 }
 0x2fa   : > { %v1982_v56 = vmax.f32 %v1950_v28, 0.0  ;;  %v1951_v2 = vadd.f32 %v7263_v52, %v8865_v43  ;;  %v1835_v50 = vpop.f32.mrb[19].mxu1  ;;  %v9094_v12 = vsel %vm960_vm2, %v2047_v58, %v2048_v22 }
 0x2fb   : > { %v1980_v39 = vmax.f32 %v1948_v57, 0.0  ;;  %v1949_v27 = vadd.f32 %v8865_v43, %v1835_v50  ;;  %7296 = vmatprep.mubr.msk.bf16.mxu0 %vm557_vm4, %v2263_v23  ;;  %v9100_v13 = vsel %vm960_vm2, %v2045_v4, %v2046_v7  ;;  %v9104_v28 = vsel %vm960_vm2, %v2046_v7, %v2047_v58 }
 0x2fc   : > { %v9107_v34 = vadd.f32 %v8871_v61, %v1982_v56  ;;  %v1983_v52 = vmax.f32 %v1951_v2, 0.0  ;;  %v2216_v58 = vsel %vm8390_vm6, 0.0, %v2200_v42  ;;  %v9125_v2 = vsel %vm1073_vm3, %v2154_v41, %v11904_v48 }
 0x2fd   : > { %v9114_v57 = vadd.f32 %v8871_v61, %v1980_v39  ;;  %v1981_v23 = vmax.f32 %v1949_v27, 0.0  ;;  %7297 = vmatmul.mubr.msk.bf16.gmra.mrb[44].mxu0 %vm557_vm4, %v2264_v31  ;;  %12039 = vst [vmem:[#allocation15_spill] sm:$0xff] %v9125_v2  ;;  %v9132_v27 = vpack.c.bf16 %v2216_v58, %v2201_v15 }
 0x2fe   : > { %v2051_v7 = vrot.slane %v9107_v34, 7  ;;  %v9130_v39 = vadd.f32 %v8871_v61, %v1983_v52 }
 0x2ff   : > { %12040 = vst [vmem:[#allocation16_spill] sm:$0xff] %v9132_v27  ;;  %v2049_v31 = vrot.slane %v9114_v57, 7  ;;  %v9137_v50 = vadd.f32 %v8871_v61, %v1981_v23  ;;  %v7266_v37 = vpop.f32.mrb[20].mxu1 }
 0x300   : > { %v2052_v52 = vrot.slane %v9130_v39, 7  ;;  %v1954_v58 = vadd.f32 %v7266_v37, %v8865_v43  ;;  %v1848_v33 = vpop.f32.mrb[21].mxu1  ;;  %v2266_v23 = vpack.c.bf16 %v9130_v39, %v9107_v34 }
 0x301   : > { %v2050_v56 = vrot.slane %v9137_v50, 7  ;;  %v1952_v10 = vadd.f32 %v8865_v43, %v1848_v33  ;;  %v7267_v44 = vpop.f32.mrb[22].mxu1  ;;  %v2265_v16 = vpack.c.bf16 %v9137_v50, %v9114_v57  ;;  %v2080_v37 = vsel %vm960_vm2, %v2048_v22, %v2049_v31 }
 0x302   : > { %v1986_v41 = vmax.f32 %v1954_v58, 0.0  ;;  %v1955_v0 = vadd.f32 %v7267_v44, %v8865_v43  ;;  %v1851_v15 = vpop.f32.mrb[23].mxu1  ;;  %v9162_v42 = vsel %vm960_vm2, %v2051_v7, %v2052_v52  ;;  %v2113_v58 = vsel %vm8477_vm7, 0.0, %v2080_v37 }
 0x303   : > { %v1984_v53 = vmax.f32 %v1952_v10, 0.0  ;;  %v1953_v29 = vadd.f32 %v8865_v43, %v1851_v15  ;;  %7300 = vmatprep.mubr.msk.bf16.mxu0 %vm557_vm4, %v2265_v16  ;;  %v2079_v33 = vsel %vm960_vm2, %v2049_v31, %v2050_v56  ;;  %v9177_v5 = vsel %vm960_vm2, %v2050_v56, %v2051_v7 }
 0x304   : > { %v9171_v44 = vadd.f32 %v8871_v61, %v1986_v41  ;;  %v1987_v48 = vmax.f32 %v1955_v0, 0.0  ;;  %v9173_v22 = vpack.c.bf16 %v2079_v33, %v2113_v58 }
 0x305   : > { %v9180_v15 = vadd.f32 %v8871_v61, %v1984_v53  ;;  %v1985_v10 = vmax.f32 %v1953_v29, 0.0  ;;  %7301 = vmatmul.mubr.msk.bf16.gmra.mrb[48].mxu0 %vm557_vm4, %v2266_v23  ;;  %v12043_v53 = vrot.slane %v8996_v18, 1 }
 0x306   : > { %v2055_v0 = vrot.slane %v9171_v44, 7  ;;  %v9190_v37 = vadd.f32 %v8871_v61, %v1987_v48  ;;  %v12046_v48 = vrot.slane %v8970_v62, 1 }
 0x307   : > { %v9198_v7 = vsel %vm1073_vm3, %v12043_v53, %v11905_v6  ;;  %v2053_v56 = vrot.slane %v9180_v15, 7  ;;  %v9203_v29 = vadd.f32 %v8871_v61, %v1985_v10  ;;  %v7270_v33 = vpop.f32.mrb[24].mxu1  ;;  %v12045_v58 = vmov %v12043_v53 }
 0x308   : > { %12044 = vst [vmem:[#allocation18_spill] sm:$0xff] %v9198_v7  ;;  %v9211_v16 = vsel %vm1073_vm3, %v12046_v48, %v12045_v58  ;;  %v2056_v31 = vrot.slane %v9190_v37, 7  ;;  %v1958_v41 = vadd.f32 %v7270_v33, %v8865_v43  ;;  %v1864_v6 = vpop.f32.mrb[25].mxu1  ;;  %v2268_v10 = vpack.c.bf16 %v9190_v37, %v9171_v44 }
 0x309   : > { %12047 = vst [vmem:[#allocation19_spill] sm:$0xff] %v9211_v16  ;;  %v2054_v23 = vrot.slane %v9203_v29, 7  ;;  %v1956_v62 = vadd.f32 %v8865_v43, %v1864_v6  ;;  %v7271_v59 = vpop.f32.mrb[26].mxu1  ;;  %v2267_v58 = vpack.c.bf16 %v9203_v29, %v9180_v15  ;;  %v9226_v33 = vsel %vm960_vm2, %v2052_v52, %v2053_v56 }
 0x30a   : > { %v1990_v48 = vmax.f32 %v1958_v41, 0.0  ;;  %v1959_v4 = vadd.f32 %v7271_v59, %v8865_v43  ;;  %v1867_v53 = vpop.f32.mrb[27].mxu1  ;;  %v9230_v38 = vsel %vm960_vm2, %v2055_v0, %v2056_v31 }
 0x30b   : > { %v1988_v36 = vmax.f32 %v1956_v62, 0.0  ;;  %v1957_v18 = vadd.f32 %v8865_v43, %v1867_v53  ;;  %7304 = vmatprep.mubr.msk.bf16.mxu0 %vm557_vm4, %v2267_v58  ;;  %v9236_v6 = vsel %vm960_vm2, %v2053_v56, %v2054_v23  ;;  %v9240_v59 = vsel %vm960_vm2, %v2054_v23, %v2055_v0 }
 0x30c   : > { %v9243_v52 = vadd.f32 %v8871_v61, %v1990_v48  ;;  %v1991_v41 = vmax.f32 %v1959_v4, 0.0  ;;  %v12048_v56 = vrot.slane %v9039_v30, 1  ;;  %v12049_v23 = vrot.slane %v9069_v40, 1 }
 0x30d   : > { %v9250_v62 = vadd.f32 %v8871_v61, %v1988_v36  ;;  %v1989_v58 = vmax.f32 %v1957_v18, 0.0  ;;  %7305 = vmatmul.mubr.msk.bf16.gmra.mrb[52].mxu0 %vm557_vm4, %v2268_v10  ;;  %v12052_v18 = vrot.slane %v9048_v32, 1 }
 0x30e   : > { %v9261_v4 = vsel %vm1073_vm3, %v12049_v23, %v12048_v56  ;;  %v2059_v48 = vrot.slane %v9243_v52, 7  ;;  %v9266_v36 = vadd.f32 %v8871_v61, %v1991_v41  ;;  %v12051_v10 = vmov %v12049_v23 }
 0x30f   : > { %12050 = vst [vmem:[#allocation20_spill] sm:$0xff] %v9261_v4  ;;  %v9274_v0 = vsel %vm1073_vm3, %v12052_v18, %v12051_v10  ;;  %v2057_v2 = vrot.slane %v9250_v62, 7  ;;  %v9279_v23 = vadd.f32 %v8871_v61, %v1989_v58  ;;  %v7274_v16 = vpop.f32.mrb[28].mxu1 }
 0x310   : > { %12053 = vst [vmem:[#allocation21_spill] sm:$0xff] %v9274_v0  ;;  %v2060_v53 = vrot.slane %v9266_v36, 7  ;;  %v1962_v32 = vadd.f32 %v7274_v16, %v8865_v43  ;;  %v1880_v7 = vpop.f32.mrb[29].mxu1  ;;  %v2270_v10 = vpack.c.bf16 %v9266_v36, %v9243_v52 }
 0x311   : > { %v2058_v18 = vrot.slane %v9279_v23, 7  ;;  %v1960_v58 = vadd.f32 %v8865_v43, %v1880_v7  ;;  %v7275_v27 = vpop.f32.mrb[30].mxu1  ;;  %v2269_v41 = vpack.c.bf16 %v9279_v23, %v9250_v62  ;;  %v2072_v16 = vsel %vm960_vm2, %v2056_v31, %v2057_v2 }
 0x312   : > { %v1994_v0 = vmax.f32 %v1962_v32, 0.0  ;;  %v1963_v4 = vadd.f32 %v7275_v27, %v8865_v43  ;;  %v1883_v40 = vpop.f32.mrb[31].mxu1  ;;  %v9298_v19 = vsel %vm960_vm2, %v2059_v48, %v2060_v53  ;;  %v2121_v32 = vsel %vm8589_vm9, 0.0, %v2072_v16 }
 0x313   : > { %12054 = vst [vmem:[#allocation22_spill] sm:$0xff] %v9298_v19  ;;  %v1992_v17 = vmax.f32 %v1960_v58, 0.0  ;;  %v1961_v56 = vadd.f32 %v8865_v43, %v1883_v40  ;;  %7308 = vmatprep.mubr.msk.bf16.mxu0 %vm557_vm4, %v2269_v41  ;;  %v2071_v7 = vsel %vm960_vm2, %v2057_v2, %v2058_v18  ;;  %v9313_v35 = vsel %vm960_vm2, %v2058_v18, %v2059_v48 }
 0x314   : > { %v9307_v27 = vadd.f32 %v8871_v61, %v1994_v0  ;;  %v1995_v63 = vmax.f32 %v1963_v4, 0.0  ;;  %v9309_v31 = vpack.c.bf16 %v2071_v7, %v2121_v32  ;;  %12056 = vst [vmem:[#allocation23_spill] sm:$0xff] %v9313_v35  ;;  %v12057_v41 = vrot.slane %v9114_v57, 1 }
 0x315   : > { %v2029_v43 = vadd.f32 %v8871_v61, %v1992_v17  ;;  %v1993_v40 = vmax.f32 %v1961_v56, 0.0  ;;  %7309 = vmatmul.mubr.msk.bf16.gmra.mrb[56].mxu0 %vm557_vm4, %v2270_v10  ;;  %v12058_v0 = vrot.slane %v9058_v3, 1  ;;  %v12060_v56 = vrot.slane %v9039_v30, 1 }
 0x316   : > { %v2063_v58 = vrot.slane %v9307_v27, 7  ;;  %v2175_v48 = vrot.slane %v9307_v27, 1  ;;  %v2032_v18 = vadd.f32 %v8871_v61, %v1995_v63 }
 0x317   : > { %v2192_v4 = vsel %vm1073_vm3, %v12058_v0, %v12057_v41  ;;  %v12059_v17 = vmov %v12058_v0  ;;  %v2061_v16 = vrot.slane %v2029_v43, 7  ;;  %v2173_v7 = vrot.slane %v2029_v43, 1 }
 0x318   : > { %v2193_v10 = vsel %vm1073_vm3, %v12060_v56, %v12059_v17  ;;  %v2030_v32 = vadd.f32 %v8871_v61, %v1993_v40  ;;  %v2224_v41 = vsel %vm8510_vm8, 0.0, %v2192_v4  ;;  %v2064_v0 = vrot.slane %v2032_v18, 7 }
 0x319   : > { %v2176_v26 = vrot.slane %v2032_v18, 1  ;;  %v2272_v54 = vpack.c.bf16 %v2032_v18, %v9307_v27  ;;  %v9338_v35 = vpack.c.bf16 %v2224_v41, %v2193_v10  ;;  %v9342_v30 = vsel %vm960_vm2, %v2060_v53, %v2061_v16 }
 0x31a   : > { %v2062_v63 = vrot.slane %v2030_v32, 7  ;;  %v2174_v3 = vrot.slane %v2030_v32, 1  ;;  %v2271_v19 = vpack.c.bf16 %v2030_v32, %v2029_v43  ;;  %v12062_v17 = vrot.slane %v8878_v11, 7 }
 0x31b   : > { %v9350_v40 = vsel %vm960_vm2, %v2063_v58, %v2064_v0  ;;  %v12063_v27 = vrot.slane %v9107_v34, 1  ;;  %v12064_v4 = vrot.slane %v9137_v50, 1  ;;  %v12066_v18 = vrot.slane %v9114_v57, 1 }
 0x31c   : > { %v2096_v61 = vsel %vm960_vm2, %v2064_v0, %v12062_v17  ;;  %7312 = vmatprep.mubr.msk.bf16.mxu0 %vm557_vm4, %v2271_v19  ;;  %v9373_v32 = vsel %vm960_vm2, %v2061_v16, %v2062_v63  ;;  %v9377_v41 = vsel %vm960_vm2, %v2062_v63, %v2063_v58  ;;  %v12067_v17 = vrot.slane %v9180_v15, 1 }
 0x31d   : > { %v9358_v43 = vsel %vm1073_vm3, %v12064_v4, %v12063_v27  ;;  %v12065_v53 = vmov %v12064_v4  ;;  %v2097_v10 = vsel %vm8693_vm11, 0.0, %v2096_v61  ;;  %v2143_v0 = vpack.c.bf16 %v9373_v32, %v9342_v30  ;;  %7313 = vmatmul.mubr.msk.bf16.gmra.mrb[60].mxu0 %vm557_vm4, %v2272_v54 }
 0x31e   : > { %v9366_v56 = vsel %vm1073_vm3, %v12066_v18, %v12065_v53  ;;  %v2129_v57 = vpack.c.bf16 %v8914_v55, %v2097_v10  ;;  %v2144_v19 = vpack.c.bf16 %v9350_v40, %v9377_v41  ;;  %v12068_v16 = vrot.slane %v9130_v39, 1  ;;  %v7972_v10 = vld [vmem:[%s11874_s3 + $0xe0] sm:$0xff]  }
 0x31f   : > { %v2249_v50 = vpack.c.bf16 %v9358_v43, %v9366_v56  ;;  %v12070_v55 = vmov %v12063_v27  ;;  %v12071_v30 = vrot.slane %v9171_v44, 1  ;;  %v12072_v40 = vrot.slane %v9203_v29, 1  ;;  %v7973_v29 = vld [vmem:[%s11874_s3 + $0xe8] sm:$0xff]   ;;  %7396 = vmatprep.subr.bf16.mxu1 %v7972_v10  ;;  %v9587_v43 = vld [vmem:[%s11876_s5 + $0x2] ss:$0 sm:$0xff] }
 0x320   : > { %v9392_v61 = vsel %vm1073_vm3, %v12068_v16, %v12067_v17  ;;  %v12069_v58 = vmov %v12068_v16  ;;  %v12074_v54 = vmov %v12067_v17  ;;  %v12075_v34 = vrot.slane %v9250_v62, 1  ;;  %7324 = vmatprep.mubr.msk.bf16.mxu0 %vm557_vm4, %v2129_v57  ;;  %7397 = vmatpush3.bf16.msra.mxu1 %v7972_v10  ;;  %v7970_v10 = vld [vmem:[%s11874_s3 + $0xb0] sm:$0xff]  }
 0x321   : > { %v9401_v63 = vsel %vm1073_vm3, %v12070_v55, %v12069_v58  ;;  %v9409_v27 = vsel %vm1073_vm3, %v12072_v40, %v12071_v30  ;;  %v12073_v4 = vmov %v12072_v40  ;;  %v12076_v53 = vrot.slane %v9190_v37, 1  ;;  %7398 = vmatprep.subr.bf16.mxu1 %v7973_v29 }
 0x322   : > { %v9417_v39 = vsel %vm1073_vm3, %v12074_v54, %v12073_v4  ;;  %v2250_v15 = vpack.c.bf16 %v9392_v61, %v9401_v63  ;;  %v12078_v17 = vmov %v12071_v30  ;;  %v12080_v40 = vrot.slane %v9243_v52, 1 }
 0x323   : > { %v2184_v18 = vsel %vm1073_vm3, %v12076_v53, %v12075_v34  ;;  %v2251_v32 = vpack.c.bf16 %v9409_v27, %v9417_v39  ;;  %v12077_v41 = vmov %v12076_v53  ;;  %v12081_v57 = vrot.slane %v9279_v23, 1 }
 0x324   : > { %v2185_v16 = vsel %vm1073_vm3, %v12078_v17, %v12077_v41  ;;  %v2232_v55 = vsel %vm8601_vm10, 0.0, %v2184_v18  ;;  %v12083_v37 = vmov %v12075_v34  ;;  %v12084_v27 = vrot.slane %v9266_v36, 1  ;;  %v7974_v36 = vld [vmem:[%s11874_s3 + $0xf0] sm:$0xff]   ;;  %7399 = vmatpush3.bf16.msra.mxu1 %v7973_v29  ;;  %v12113_v29 = vld [vmem:[#allocation18_spill] sm:$0xff] }
 0x325   : > { %v2252_v30 = vpack.c.bf16 %v2232_v55, %v2185_v16  ;;  %v2182_v61 = vsel %vm1073_vm3, %v12081_v57, %v12080_v40  ;;  %v12082_v63 = vmov %v12081_v57  ;;  %v12086_v34 = vmov %v12080_v40  ;;  %7400 = vmatprep.subr.bf16.mxu1 %v7974_v36  ;;  %v12114_v40 = vld [vmem:[#allocation19_spill] sm:$0xff] }
 0x326   : > { %v2183_v44 = vsel %vm1073_vm3, %v12083_v37, %v12082_v63  ;;  %v2180_v4 = vsel %vm1073_vm3, %v12084_v27, %v2173_v7  ;;  %v12085_v39 = vmov %v12084_v27  ;;  %v2178_v62 = vsel %vm1073_vm3, %v2174_v3, %v2175_v48  ;;  %v12117_v63 = vld [vmem:[#allocation21_spill] sm:$0xff] }
 0x327   : > { %v2253_v54 = vpack.c.bf16 %v2182_v61, %v2183_v44  ;;  %v2181_v53 = vsel %vm1073_vm3, %v12086_v34, %v12085_v39  ;;  %v2179_v23 = vsel %vm1073_vm3, %v2173_v7, %v2174_v3  ;;  %v2177_v17 = vsel %vm1073_vm3, %v2175_v48, %v2176_v26  ;;  %v7969_v7 = vld [vmem:[%s11874_s3 + $0xa8] sm:$0xff]   ;;  %v12116_v61 = vld [vmem:[#allocation20_spill] sm:$0xff] }
 0x328   : > { %v2254_v18 = vpack.c.bf16 %v2180_v4, %v2181_v53  ;;  %v2255_v41 = vpack.c.bf16 %v2178_v62, %v2179_v23  ;;  %v12087_v16 = vrot.slane %v8878_v11, 1  ;;  %v12088_v11 = vpack.c.bf16 %v8894_v14, %v8906_v24  ;;  %7401 = vmatpush3.bf16.msra.mxu1 %v7974_v36  ;;  %v7971_v14 = vld [vmem:[%s11874_s3 + $0xb8] sm:$0xff]  }
 0x329   : > { %v12089_v48 = vpack.c.bf16 %v8963_v49, %v8967_v21  ;;  %v12090_v24 = vpack.c.bf16 %v8977_v20, %v8985_v47  ;;  %v12091_v49 = vpack.c.bf16 %v9029_v51, %v9045_v60  ;;  %v12092_v21 = vpack.c.bf16 %v9100_v13, %v9090_v46  ;;  %v12101_v46 = vld [vmem:[#allocation12_spill] sm:$0xff] }
 0x32a   : > { %v2208_v52 = vsel %vm1073_vm3, %v2176_v26, %v12087_v16  ;;  %7325 = vmatmul.mubr.msk.bf16.vlgmr.msra.gmra.mrb[32].mxu0 %vm557_vm4, %v12088_v11  ;;  %v7975_v26 = vld [vmem:[%s11874_s3 + $0xf8] sm:$0xff]   ;;  %v12093_v20 = vpack.c.bf16 %v9094_v12, %v9104_v28  ;;  %v12094_v47 = vpack.c.bf16 %v9162_v42, %v9177_v5  ;;  %v12096_v51 = vpack.c.bf16 %v9230_v38, %v9240_v59  ;;  %v12097_v12 = vld [vmem:[#allocation22_spill] sm:$0xff]  ;;  %v12103_v38 = vld [vmem:[#allocation7_spill] sm:$0xff] }
 0x32b   : > { %v2240_v55 = vsel %vm8697_vm12, 0.0, %v2208_v52  ;;  %7357 = vmatpush3.bf16.msra.mxu0 %v9008_v45  ;;  %7328 = vmatprep.mubr.msk.bf16.mxu0 %vm557_vm4, %v12089_v48  ;;  %v12095_v45 = vpack.c.bf16 %v9236_v6, %v9226_v33  ;;  %v12100_v5 = vld [vmem:[#allocation10_spill] sm:$0xff]  ;;  %v12104_v28 = vld [vmem:[#allocation9_spill] sm:$0xff]  ;;  %v12109_v59 = vld [vmem:[#allocation16_spill] sm:$0xff]  ;;  %v12115_v57 = vpack.c.bf16 %v12113_v29, %v12114_v40  ;;  %v12118_v37 = vpack.c.bf16 %v12116_v61, %v12117_v63 }
 0x32c   : > { %v2256_v3 = vpack.c.bf16 %v2240_v55, %v2177_v17  ;;  %7358 = vmatprep.subr.bf16.mxu0 %v7969_v7  ;;  %7402 = vmatprep.subr.bf16.mxu1 %v7975_v26  ;;  %v12102_v13 = vpack.c.bf16 %v12100_v5, %v12101_v46  ;;  %v12105_v42 = vpack.c.bf16 %v12103_v38, %v12104_v28  ;;  %v12107_v33 = vld [vmem:[#allocation14_spill] sm:$0xff]  ;;  %v7978_v29 = vld [vmem:[%s11874_s3 + $0xd0] sm:$0xff]  }
 0x32d   : > { %7403 = vmatpush3.bf16.msra.mxu1 %v7975_v26 }
 0x32f   : > { %7359 = vmatpush3.bf16.msra.mxu0 %v7969_v7 }
 0x330   : > { %7360 = vmatprep.subr.bf16.mxu0 %v7970_v10 }
 0x332   : > { %7329 = vmatmul.mubr.msk.bf16.gmra.mrb[36].mxu0 %vm557_vm4, %v12090_v24 }
 0x333   : > { %7332 = vmatprep.mubr.msk.bf16.mxu0 %vm557_vm4, %v9041_v1  ;;  %7361 = vmatpush3.bf16.msra.mxu0 %v7970_v10  ;;  %v12098_v1 = vld [vmem:[#allocation23_spill] sm:$0xff] }
 0x334   : > { %7362 = vmatprep.subr.bf16.mxu0 %v7971_v14  ;;  %v12099_v60 = vpack.c.bf16 %v12097_v12, %v12098_v1 }
 0x337   : > { %7363 = vmatpush3.bf16.msra.mxu0 %v7971_v14 }
 0x33a   : > { %7333 = vmatmul.mubr.msk.bf16.gmra.mrb[40].mxu0 %vm557_vm4, %v12091_v49 }
 0x33b   : > { %7336 = vmatprep.mubr.msk.bf16.mxu0 %vm557_vm4, %v12092_v21 }
 0x342   : > { %7337 = vmatmul.mubr.msk.bf16.gmra.mrb[44].mxu0 %vm557_vm4, %v12093_v20 }
 0x343   : > { %7340 = vmatprep.mubr.msk.bf16.mxu0 %vm557_vm4, %v9173_v22  ;;  %v12106_v22 = vld [vmem:[#allocation13_spill] sm:$0xff] }
 0x344   : > { %v12108_v6 = vpack.c.bf16 %v12106_v22, %v12107_v33 }
 0x34a   : > { %7341 = vmatmul.mubr.msk.bf16.gmra.mrb[48].mxu0 %vm557_vm4, %v12094_v47 }
 0x34b   : > { %7344 = vmatprep.mubr.msk.bf16.mxu0 %vm557_vm4, %v12095_v45 }
 0x352   : > { %7345 = vmatmul.mubr.msk.bf16.gmra.mrb[52].mxu0 %vm557_vm4, %v12096_v51 }
 0x353   : > { %7348 = vmatprep.mubr.msk.bf16.mxu0 %vm557_vm4, %v9309_v31  ;;  %v12110_v31 = vld [vmem:[#allocation15_spill] sm:$0xff] }
 0x35a   : > { %7349 = vmatmul.mubr.msk.bf16.gmra.mrb[56].mxu0 %vm557_vm4, %v12099_v60  ;;  %v7977_v60 = vld [vmem:[%s11874_s3 + $0xc8] sm:$0xff]  }
 0x35b   : > { %7352 = vmatprep.mubr.msk.bf16.mxu0 %vm557_vm4, %v2143_v0  ;;  %v12111_v0 = vld [vmem:[#allocation17_spill] sm:$0xff] }
 0x362   : > { %7353 = vmatmul.mubr.msk.bf16.gmra.mrb[60].mxu0 %vm557_vm4, %v2144_v19  ;;  %v12112_v19 = vpack.c.bf16 %v12110_v31, %v12111_v0 }
 0x363   : > { %7364 = vmatprep.mubr.msk.bf16.mxu0 %vm557_vm4, %v12102_v13 }
 0x36a   : > { %7365 = vmatmul.mubr.msk.bf16.vlgmr.msra.gmra.mrb[32].mxu0 %vm557_vm4, %v12105_v42 }
 0x36b   : > { %7368 = vmatprep.mubr.msk.bf16.mxu0 %vm557_vm4, %v12108_v6 }
 0x372   : > { %7369 = vmatmul.mubr.msk.bf16.gmra.mrb[36].mxu0 %vm557_vm4, %v12109_v59 }
 0x373   : > { %7372 = vmatprep.mubr.msk.bf16.mxu0 %vm557_vm4, %v12112_v19 }
 0x37a   : > { %7373 = vmatmul.mubr.msk.bf16.gmra.mrb[40].mxu0 %vm557_vm4, %v12115_v57 }
 0x37b   : > { %7376 = vmatprep.mubr.msk.bf16.mxu0 %vm557_vm4, %v12118_v37 }
 0x382   : > { %7377 = vmatmul.mubr.msk.bf16.gmra.mrb[44].mxu0 %vm557_vm4, %v9338_v35  ;;  %v7976_v35 = vld [vmem:[%s11874_s3 + $0xc0] sm:$0xff]  }
 0x383   : > { %7380 = vmatprep.mubr.msk.bf16.mxu0 %vm557_vm4, %v2249_v50  ;;  %7436 = vmatprep.subr.bf16.mxu1 %v7976_v35 }
 0x38a   : > { %7381 = vmatmul.mubr.msk.bf16.gmra.mrb[48].mxu0 %vm557_vm4, %v2250_v15 }
 0x38b   : > { %7384 = vmatprep.mubr.msk.bf16.mxu0 %vm557_vm4, %v2251_v32  ;;  %v9593_v32 = vld [vmem:[%s11876_s5 + $0x6] ss:$0 sm:$0xff] }
 0x392   : > { %7385 = vmatmul.mubr.msk.bf16.gmra.mrb[52].mxu0 %vm557_vm4, %v2252_v30 }
 0x393   : > { %7388 = vmatprep.mubr.msk.bf16.mxu0 %vm557_vm4, %v2253_v54 }
 0x39a   : > { %7389 = vmatmul.mubr.msk.bf16.gmra.mrb[56].mxu0 %vm557_vm4, %v2254_v18 }
 0x39b   : > { %7392 = vmatprep.mubr.msk.bf16.mxu0 %vm557_vm4, %v2255_v41 }
 0x3a2   : > { %7393 = vmatmul.mubr.msk.bf16.gmra.mrb[60].mxu0 %vm557_vm4, %v2256_v3 }
 0x43d   : > { %v7366_v56 = vpop.f32.mrb[32].mxu0 }
 0x43e   : > { %v3038_v50 = vadd.f32 %v7366_v56, %v9587_v43  ;;  %v2872_v15 = vpop.f32.mrb[33].mxu0 }
 0x43f   : > { %v3036_v30 = vadd.f32 %v9587_v43, %v2872_v15  ;;  %v7367_v44 = vpop.f32.mrb[34].mxu0 }
 0x440   : > { %v3070_v27 = vmax.f32 %v3038_v50, 0.0  ;;  %v3039_v4 = vadd.f32 %v7367_v44, %v9587_v43  ;;  %v2875_v54 = vpop.f32.mrb[35].mxu0 }
 0x441   : > { %v3068_v39 = vmax.f32 %v3036_v30, 0.0  ;;  %v3037_v34 = vadd.f32 %v9587_v43, %v2875_v54 }
 0x442   : > { %v3107_v53 = vadd.f32 %v9593_v32, %v3070_v27  ;;  %v3071_v62 = vmax.f32 %v3039_v4, 0.0 }
 0x443   : > { %v9600_v23 = vadd.f32 %v9593_v32, %v3068_v39  ;;  %v3069_v18 = vmax.f32 %v3037_v34, 0.0 }
 0x444   : > { %v3139_v41 = vrot.slane %v3107_v53, 7  ;;  %v9603_v17 = vadd.f32 %v9593_v32, %v3071_v62  ;;  %v3251_v16 = vrot.slane %v3107_v53, 1 }
 0x445   : > { %v11921_v52 = vrot.slane %v9600_v23, 7  ;;  %v11920_v36 = vrot.slane %v9600_v23, 1  ;;  %v3106_v55 = vadd.f32 %v9593_v32, %v3069_v18  ;;  %v7370_v7 = vpop.f32.mrb[36].mxu0 }
 0x446   : > { %v3140_v3 = vrot.slane %v9603_v17, 7  ;;  %v3252_v11 = vrot.slane %v9603_v17, 1  ;;  %v3362_v26 = vpack.c.bf16 %v9603_v17, %v3107_v53  ;;  %v3042_v48 = vadd.f32 %v7370_v7, %v9587_v43  ;;  %v2888_v10 = vpop.f32.mrb[37].mxu0  ;;  %v7979_v7 = vld [vmem:[%s11874_s3 + $0xd8] sm:$0xff]  }
 0x447   : > { %v3138_v14 = vrot.slane %v3106_v55, 7  ;;  %v3250_v24 = vrot.slane %v3106_v55, 1  ;;  %v3040_v49 = vadd.f32 %v9587_v43, %v2888_v10  ;;  %v7371_v21 = vpop.f32.mrb[38].mxu0  ;;  %v3361_v20 = vpack.c.bf16 %v3106_v55, %v9600_v23 }
 0x448   : > { %v9616_v47 = vsel %vm960_vm2, %v3139_v41, %v3140_v3  ;;  %v9620_v45 = vsel %vm1073_vm3, %v3251_v16, %v3252_v11  ;;  %v3074_v51 = vmax.f32 %v3042_v48, 0.0  ;;  %v3043_v12 = vadd.f32 %v7371_v21, %v9587_v43  ;;  %v2891_v1 = vpop.f32.mrb[39].mxu0 }
 0x449   : > { %12119 = vst [vmem:[#allocation6_spill] sm:$0xff] %v9620_v45  ;;  %v9628_v5 = vsel %vm960_vm2, %v3138_v14, %v3139_v41  ;;  %v3072_v46 = vmax.f32 %v3040_v49, 0.0  ;;  %v3041_v13 = vadd.f32 %v9587_v43, %v2891_v1  ;;  %7404 = vmatprep.mubr.msk.bf16.mxu1 %vm557_vm4, %v3361_v20  ;;  %v9636_v38 = vsel %vm960_vm2, %v11921_v52, %v3138_v14 }
 0x44a   : > { %v9641_v42 = vadd.f32 %v9593_v32, %v3074_v51  ;;  %v3075_v22 = vmax.f32 %v3043_v12, 0.0  ;;  %7405 = vmatmul.mubr.msk.bf16.vlgmr.msra.gmra.mrb[32].mxu1 %vm557_vm4, %v3362_v26  ;;  %v9646_v33 = vsel %vm1073_vm3, %v3250_v24, %v3251_v16  ;;  %v9653_v31 = vsel %vm1073_vm3, %v11920_v36, %v3250_v24 }
 0x44b   : > { %12120 = vst [vmem:[#allocation11_spill] sm:$0xff] %v9646_v33  ;;  %v3109_v6 = vadd.f32 %v9593_v32, %v3072_v46  ;;  %v3073_v59 = vmax.f32 %v3041_v13, 0.0  ;;  %7437 = vmatpush3.bf16.msra.mxu1 %v7976_v35  ;;  %12121 = vst [vmem:[#allocation22_spill] sm:$0xff] %v9653_v31 }
 0x44c   : > { %v3143_v0 = vrot.slane %v9641_v42, 7  ;;  %v9657_v19 = vadd.f32 %v9593_v32, %v3075_v22  ;;  %7438 = vmatprep.subr.bf16.mxu1 %v7977_v60  ;;  %v3255_v57 = vrot.slane %v9641_v42, 1 }
 0x44d   : > { %v3141_v61 = vrot.slane %v3109_v6, 7  ;;  %v3253_v63 = vrot.slane %v3109_v6, 1  ;;  %v3110_v37 = vadd.f32 %v9593_v32, %v3073_v59  ;;  %v7374_v35 = vpop.f32.mrb[40].mxu0  ;;  %v9730_v59 = vld [vmem:[%s11874_s3 + $0x100] sm:$0xff]  }
 0x44e   : > { %v3144_v56 = vrot.slane %v9657_v19, 7  ;;  %v3256_v50 = vrot.slane %v9657_v19, 1  ;;  %v3046_v15 = vadd.f32 %v7374_v35, %v9587_v43  ;;  %v2904_v30 = vpop.f32.mrb[41].mxu0  ;;  %v3364_v44 = vpack.c.bf16 %v9657_v19, %v9641_v42 }
 0x44f   : > { %v9673_v27 = vsel %vm1073_vm3, %v3252_v11, %v3253_v63  ;;  %v3142_v4 = vrot.slane %v3110_v37, 7  ;;  %v3254_v54 = vrot.slane %v3110_v37, 1  ;;  %v3044_v39 = vadd.f32 %v9587_v43, %v2904_v30  ;;  %v7375_v34 = vpop.f32.mrb[42].mxu0  ;;  %7439 = vmatpush3.bf16.msra.mxu1 %v7977_v60 }
 0x450   : > { %12122 = vst [vmem:[#allocation23_spill] sm:$0xff] %v9673_v27  ;;  %v3078_v62 = vmax.f32 %v3046_v15, 0.0  ;;  %v3047_v18 = vadd.f32 %v7375_v34, %v9587_v43  ;;  %v2907_v41 = vpop.f32.mrb[43].mxu0  ;;  %v3363_v17 = vpack.c.bf16 %v3110_v37, %v3109_v6  ;;  %7440 = vmatprep.subr.bf16.mxu1 %v7978_v29  ;;  %v9689_v26 = vsel %vm960_vm2, %v3140_v3, %v3141_v61 }
 0x451   : > { %v3076_v16 = vmax.f32 %v3044_v39, 0.0  ;;  %v3045_v55 = vadd.f32 %v9587_v43, %v2907_v41  ;;  %v9685_v11 = vsel %vm960_vm2, %v3141_v61, %v3142_v4  ;;  %v9699_v24 = vsel %vm960_vm2, %v3143_v0, %v3144_v56 }
 0x452   : > { %v9692_v48 = vadd.f32 %v9593_v32, %v3078_v62  ;;  %v3079_v10 = vmax.f32 %v3047_v18, 0.0  ;;  %7408 = vmatprep.mubr.msk.bf16.mxu1 %vm557_vm4, %v3363_v17  ;;  %v9707_v3 = vsel %vm960_vm2, %v3142_v4, %v3143_v0  ;;  %v9713_v20 = vsel %vm1073_vm3, %v3254_v54, %v3255_v57 }
 0x453   : > { %v9702_v49 = vadd.f32 %v9593_v32, %v3076_v16  ;;  %v3077_v21 = vmax.f32 %v3045_v55, 0.0  ;;  %7409 = vmatmul.mubr.msk.bf16.gmra.mrb[36].mxu1 %vm557_vm4, %v3364_v44  ;;  %12123 = vst [vmem:[#allocation10_spill] sm:$0xff] %v9713_v20  ;;  %v9734_v0 = vsel %vm1073_vm3, %v3253_v63, %v3254_v54 }
 0x454   : > { %v3147_v51 = vrot.slane %v9692_v48, 7  ;;  %v11922_v12 = vrot.slane %v9692_v48, 1  ;;  %v9718_v1 = vadd.f32 %v9593_v32, %v3079_v10  ;;  %7441 = vmatpush3.bf16.msra.mxu1 %v7978_v29  ;;  %12124 = vst [vmem:[#allocation12_spill] sm:$0xff] %v9734_v0 }
 0x455   : > { %v3145_v46 = vrot.slane %v9702_v49, 7  ;;  %v3257_v13 = vrot.slane %v9702_v49, 1  ;;  %v9725_v22 = vadd.f32 %v9593_v32, %v3077_v21  ;;  %v7378_v6 = vpop.f32.mrb[44].mxu0  ;;  %7442 = vmatprep.subr.bf16.mxu1 %v7979_v7 }
 0x456   : > { %v3148_v29 = vrot.slane %v9718_v1, 7  ;;  %v3050_v37 = vadd.f32 %v7378_v6, %v9587_v43  ;;  %v2920_v35 = vpop.f32.mrb[45].mxu0  ;;  %v3366_v15 = vpack.c.bf16 %v9718_v1, %v9692_v48 }
 0x457   : > { %v3146_v30 = vrot.slane %v9725_v22, 7  ;;  %v3258_v44 = vrot.slane %v9725_v22, 1  ;;  %v3048_v4 = vadd.f32 %v9587_v43, %v2920_v35  ;;  %v7379_v39 = vpop.f32.mrb[46].mxu0  ;;  %v3365_v63 = vpack.c.bf16 %v9725_v22, %v9702_v49 }
 0x458   : > { %v3082_v54 = vmax.f32 %v3050_v37, 0.0  ;;  %v3051_v34 = vadd.f32 %v7379_v39, %v9587_v43  ;;  %v2923_v62 = vpop.f32.mrb[47].mxu0  ;;  %7443 = vmatpush3.bf16.msra.mxu1 %v7979_v7  ;;  %v3192_v18 = vsel %vm960_vm2, %v3144_v56, %v3145_v46  ;;  %v9751_v41 = vsel %vm960_vm2, %v3147_v51, %v3148_v29 }
 0x459   : > { %v3080_v17 = vmax.f32 %v3048_v4, 0.0  ;;  %v3049_v16 = vadd.f32 %v9587_v43, %v2923_v62  ;;  %7412 = vmatprep.mubr.msk.bf16.mxu1 %vm557_vm4, %v3365_v63  ;;  %7476 = vmatprep.subr.bf16.mxu1 %v9730_v59  ;;  %v3191_v55 = vsel %vm960_vm2, %v3145_v46, %v3146_v30  ;;  %v3209_v7 = vsel %vm8361_vm5, 0.0, %v3192_v18 }
 0x45a   : > { %v9761_v21 = vadd.f32 %v9593_v32, %v3082_v54  ;;  %v3083_v56 = vmax.f32 %v3051_v34, 0.0  ;;  %v9763_v6 = vpack.c.bf16 %v3191_v55, %v3209_v7  ;;  %v9767_v37 = vsel %vm960_vm2, %v3146_v30, %v3147_v51 }
 0x45b   : > { %v9770_v35 = vadd.f32 %v9593_v32, %v3080_v17  ;;  %v3081_v4 = vmax.f32 %v3049_v16, 0.0  ;;  %7413 = vmatmul.mubr.msk.bf16.gmra.mrb[40].mxu1 %vm557_vm4, %v3366_v15  ;;  %v3304_v51 = vsel %vm1073_vm3, %v3256_v50, %v3257_v13  ;;  %v3305_v17 = vsel %vm1073_vm3, %v3255_v57, %v3256_v50 }
 0x45c   : > { %v3151_v63 = vrot.slane %v9761_v21, 7  ;;  %v9780_v34 = vadd.f32 %v9593_v32, %v3083_v56 }
 0x45d   : > { %v3149_v15 = vrot.slane %v9770_v35, 7  ;;  %v9791_v62 = vadd.f32 %v9593_v32, %v3081_v4  ;;  %v7382_v18 = vpop.f32.mrb[48].mxu0 }
 0x45e   : > { %v3152_v16 = vrot.slane %v9780_v34, 7  ;;  %v3054_v7 = vadd.f32 %v7382_v18, %v9587_v43  ;;  %v2936_v56 = vpop.f32.mrb[49].mxu0  ;;  %v3368_v39 = vpack.c.bf16 %v9780_v34, %v9761_v21 }
 0x45f   : > { %v3150_v4 = vrot.slane %v9791_v62, 7  ;;  %v3052_v19 = vadd.f32 %v9587_v43, %v2936_v56  ;;  %v7383_v42 = vpop.f32.mrb[50].mxu0  ;;  %v3367_v57 = vpack.c.bf16 %v9791_v62, %v9770_v35  ;;  %v9812_v18 = vsel %vm960_vm2, %v3148_v29, %v3149_v15 }
 0x460   : > { %v3086_v50 = vmax.f32 %v3054_v7, 0.0  ;;  %v3055_v40 = vadd.f32 %v7383_v42, %v9587_v43  ;;  %v2939_v46 = vpop.f32.mrb[51].mxu0  ;;  %v9816_v60 = vsel %vm960_vm2, %v3151_v63, %v3152_v16 }
 0x461   : > { %v3084_v14 = vmax.f32 %v3052_v19, 0.0  ;;  %v3053_v28 = vadd.f32 %v9587_v43, %v2939_v46  ;;  %7416 = vmatprep.mubr.msk.bf16.mxu1 %vm557_vm4, %v3367_v57  ;;  %v9822_v56 = vsel %vm960_vm2, %v3149_v15, %v3150_v4  ;;  %v9826_v7 = vsel %vm960_vm2, %v3150_v4, %v3151_v63 }
 0x462   : > { %v9829_v29 = vadd.f32 %v9593_v32, %v3086_v50  ;;  %v3087_v42 = vmax.f32 %v3055_v40, 0.0  ;;  %v3320_v63 = vsel %vm8390_vm6, 0.0, %v3304_v51  ;;  %v9847_v40 = vsel %vm1073_vm3, %v3258_v44, %v11922_v12 }
 0x463   : > { %v9836_v19 = vadd.f32 %v9593_v32, %v3084_v14  ;;  %v3085_v57 = vmax.f32 %v3053_v28, 0.0  ;;  %7417 = vmatmul.mubr.msk.bf16.gmra.mrb[44].mxu1 %vm557_vm4, %v3368_v39  ;;  %12127 = vst [vmem:[#allocation7_spill] sm:$0xff] %v9847_v40  ;;  %v9854_v28 = vpack.c.bf16 %v3320_v63, %v3305_v17  ;;  %v9867_v50 = vsel %vm1073_vm3, %v3257_v13, %v3258_v44 }
 0x464   : > { %v3155_v4 = vrot.slane %v9829_v29, 7  ;;  %v9852_v14 = vadd.f32 %v9593_v32, %v3087_v42  ;;  %12129 = vst [vmem:[#allocation13_spill] sm:$0xff] %v9867_v50 }
 0x465   : > { %12128 = vst [vmem:[#allocation9_spill] sm:$0xff] %v9854_v28  ;;  %v3153_v39 = vrot.slane %v9836_v19, 7  ;;  %v9859_v46 = vadd.f32 %v9593_v32, %v3085_v57  ;;  %v7386_v36 = vpop.f32.mrb[52].mxu0 }
 0x466   : > { %v3156_v42 = vrot.slane %v9852_v14, 7  ;;  %v3058_v63 = vadd.f32 %v7386_v36, %v9587_v43  ;;  %v2952_v52 = vpop.f32.mrb[53].mxu0  ;;  %v3370_v57 = vpack.c.bf16 %v9852_v14, %v9829_v29 }
 0x467   : > { %v3154_v55 = vrot.slane %v9859_v46, 7  ;;  %v3056_v49 = vadd.f32 %v9587_v43, %v2952_v52  ;;  %v7387_v51 = vpop.f32.mrb[54].mxu0  ;;  %v3369_v13 = vpack.c.bf16 %v9859_v46, %v9836_v19  ;;  %v3184_v36 = vsel %vm960_vm2, %v3152_v16, %v3153_v39 }
 0x468   : > { %v3090_v44 = vmax.f32 %v3058_v63, 0.0  ;;  %v3059_v53 = vadd.f32 %v7387_v51, %v9587_v43  ;;  %v2955_v17 = vpop.f32.mrb[55].mxu0  ;;  %v9884_v54 = vsel %vm960_vm2, %v3155_v4, %v3156_v42  ;;  %v3217_v63 = vsel %vm8477_vm7, 0.0, %v3184_v36 }
 0x469   : > { %v3088_v12 = vmax.f32 %v3056_v49, 0.0  ;;  %v3057_v22 = vadd.f32 %v9587_v43, %v2955_v17  ;;  %7420 = vmatprep.mubr.msk.bf16.mxu1 %vm557_vm4, %v3369_v13  ;;  %v3183_v52 = vsel %vm960_vm2, %v3153_v39, %v3154_v55  ;;  %v9899_v15 = vsel %vm960_vm2, %v3154_v55, %v3155_v4 }
 0x46a   : > { %v9893_v51 = vadd.f32 %v9593_v32, %v3090_v44  ;;  %v3091_v30 = vmax.f32 %v3059_v53, 0.0  ;;  %v9895_v16 = vpack.c.bf16 %v3183_v52, %v3217_v63  ;;  %v12131_v55 = vrot.slane %v9770_v35, 1 }
 0x46b   : > { %v9902_v17 = vadd.f32 %v9593_v32, %v3088_v12  ;;  %v3089_v49 = vmax.f32 %v3057_v22, 0.0  ;;  %7421 = vmatmul.mubr.msk.bf16.gmra.mrb[48].mxu1 %vm557_vm4, %v3370_v57  ;;  %v12132_v12 = vrot.slane %v9718_v1, 1 }
 0x46c   : > { %v3159_v53 = vrot.slane %v9893_v51, 7  ;;  %v9912_v36 = vadd.f32 %v9593_v32, %v3091_v30  ;;  %v12135_v30 = vrot.slane %v9692_v48, 1 }
 0x46d   : > { %v9920_v4 = vsel %vm1073_vm3, %v12132_v12, %v12131_v55  ;;  %v3157_v57 = vrot.slane %v9902_v17, 7  ;;  %v9925_v52 = vadd.f32 %v9593_v32, %v3089_v49  ;;  %v7390_v63 = vpop.f32.mrb[56].mxu0  ;;  %v12134_v13 = vmov %v12132_v12 }
 0x46e   : > { %12133 = vst [vmem:[#allocation14_spill] sm:$0xff] %v9920_v4  ;;  %v9933_v39 = vsel %vm1073_vm3, %v12135_v30, %v12134_v13  ;;  %v3160_v44 = vrot.slane %v9912_v36, 7  ;;  %v3062_v12 = vadd.f32 %v7390_v63, %v9587_v43  ;;  %v2968_v61 = vpop.f32.mrb[57].mxu0  ;;  %v3372_v49 = vpack.c.bf16 %v9912_v36, %v9893_v51 }
 0x46f   : > { %12136 = vst [vmem:[#allocation16_spill] sm:$0xff] %v9933_v39  ;;  %v3158_v22 = vrot.slane %v9925_v52, 7  ;;  %v3060_v48 = vadd.f32 %v9587_v43, %v2968_v61  ;;  %v7391_v10 = vpop.f32.mrb[58].mxu0  ;;  %v3371_v13 = vpack.c.bf16 %v9925_v52, %v9902_v17  ;;  %v9948_v63 = vsel %vm960_vm2, %v3156_v42, %v3157_v57 }
 0x470   : > { %v3094_v30 = vmax.f32 %v3062_v12, 0.0  ;;  %v3063_v50 = vadd.f32 %v7391_v10, %v9587_v43  ;;  %v2971_v55 = vpop.f32.mrb[59].mxu0  ;;  %v9952_v40 = vsel %vm960_vm2, %v3159_v53, %v3160_v44 }
 0x471   : > { %v3092_v28 = vmax.f32 %v3060_v48, 0.0  ;;  %v3061_v1 = vadd.f32 %v9587_v43, %v2971_v55  ;;  %7424 = vmatprep.mubr.msk.bf16.mxu1 %vm557_vm4, %v3371_v13  ;;  %v9958_v61 = vsel %vm960_vm2, %v3157_v57, %v3158_v22  ;;  %v9962_v10 = vsel %vm960_vm2, %v3158_v22, %v3159_v53 }
 0x472   : > { %12137 = vst [vmem:[#allocation15_spill] sm:$0xff] %v9962_v10  ;;  %v9965_v42 = vadd.f32 %v9593_v32, %v3094_v30  ;;  %v3095_v12 = vmax.f32 %v3063_v50, 0.0  ;;  %v12138_v57 = vrot.slane %v9761_v21, 1  ;;  %v12139_v22 = vrot.slane %v9791_v62, 1 }
 0x473   : > { %v9972_v48 = vadd.f32 %v9593_v32, %v3092_v28  ;;  %v3093_v13 = vmax.f32 %v3061_v1, 0.0  ;;  %7425 = vmatmul.mubr.msk.bf16.gmra.mrb[52].mxu1 %vm557_vm4, %v3372_v49  ;;  %v12142_v1 = vrot.slane %v9770_v35, 1 }
 0x474   : > { %v9983_v50 = vsel %vm1073_vm3, %v12139_v22, %v12138_v57  ;;  %v3163_v30 = vrot.slane %v9965_v42, 7  ;;  %v9988_v28 = vadd.f32 %v9593_v32, %v3095_v12  ;;  %v12141_v49 = vmov %v12139_v22 }
 0x475   : > { %12140 = vst [vmem:[#allocation17_spill] sm:$0xff] %v9983_v50  ;;  %v9996_v53 = vsel %vm1073_vm3, %v12142_v1, %v12141_v49  ;;  %v3161_v0 = vrot.slane %v9972_v48, 7  ;;  %v10001_v22 = vadd.f32 %v9593_v32, %v3093_v13  ;;  %v7394_v39 = vpop.f32.mrb[60].mxu0 }
 0x476   : > { %12143 = vst [vmem:[#allocation18_spill] sm:$0xff] %v9996_v53  ;;  %v3164_v55 = vrot.slane %v9988_v28, 7  ;;  %v3066_v35 = vadd.f32 %v7394_v39, %v9587_v43  ;;  %v2984_v4 = vpop.f32.mrb[61].mxu0  ;;  %v3374_v49 = vpack.c.bf16 %v9988_v28, %v9965_v42 }
 0x477   : > { %v3162_v1 = vrot.slane %v10001_v22, 7  ;;  %v3064_v13 = vadd.f32 %v9587_v43, %v2984_v4  ;;  %v7395_v20 = vpop.f32.mrb[62].mxu0  ;;  %v3373_v12 = vpack.c.bf16 %v10001_v22, %v9972_v48  ;;  %v3176_v39 = vsel %vm960_vm2, %v3160_v44, %v3161_v0 }
 0x478   : > { %v3098_v53 = vmax.f32 %v3066_v35, 0.0  ;;  %v3067_v50 = vadd.f32 %v7395_v20, %v9587_v43  ;;  %v2987_v62 = vpop.f32.mrb[63].mxu0  ;;  %v10020_v45 = vsel %vm960_vm2, %v3163_v30, %v3164_v55  ;;  %v3225_v35 = vsel %vm8589_vm9, 0.0, %v3176_v39 }
 0x479   : > { %12144 = vst [vmem:[#allocation19_spill] sm:$0xff] %v10020_v45  ;;  %v3096_v27 = vmax.f32 %v3064_v13, 0.0  ;;  %v3065_v57 = vadd.f32 %v9587_v43, %v2987_v62  ;;  %7428 = vmatprep.mubr.msk.bf16.mxu1 %vm557_vm4, %v3373_v12  ;;  %v3175_v4 = vsel %vm960_vm2, %v3161_v0, %v3162_v1  ;;  %v10035_v10 = vsel %vm960_vm2, %v3162_v1, %v3163_v30 }
 0x47a   : > { %v10029_v20 = vadd.f32 %v9593_v32, %v3098_v53  ;;  %v3099_v33 = vmax.f32 %v3067_v50, 0.0  ;;  %v10031_v44 = vpack.c.bf16 %v3175_v4, %v3225_v35  ;;  %12146 = vst [vmem:[#allocation20_spill] sm:$0xff] %v10035_v10  ;;  %v12147_v12 = vrot.slane %v9836_v19, 1 }
 0x47b   : > { %v3133_v43 = vadd.f32 %v9593_v32, %v3096_v27  ;;  %v3097_v62 = vmax.f32 %v3065_v57, 0.0  ;;  %7429 = vmatmul.mubr.msk.bf16.gmra.mrb[56].mxu1 %vm557_vm4, %v3374_v49  ;;  %v12148_v53 = vrot.slane %v9780_v34, 1  ;;  %v12150_v57 = vrot.slane %v9761_v21, 1 }
 0x47c   : > { %v3167_v13 = vrot.slane %v10029_v20, 7  ;;  %v3279_v30 = vrot.slane %v10029_v20, 1  ;;  %v3136_v1 = vadd.f32 %v9593_v32, %v3099_v33 }
 0x47d   : > { %v3296_v50 = vsel %vm1073_vm3, %v12148_v53, %v12147_v12  ;;  %v12149_v27 = vmov %v12148_v53  ;;  %v3165_v39 = vrot.slane %v3133_v43, 7  ;;  %v3277_v4 = vrot.slane %v3133_v43, 1 }
 0x47e   : > { %v3297_v49 = vsel %vm1073_vm3, %v12150_v57, %v12149_v27  ;;  %v3134_v35 = vadd.f32 %v9593_v32, %v3097_v62  ;;  %v3328_v12 = vsel %vm8510_vm8, 0.0, %v3296_v50  ;;  %v3168_v53 = vrot.slane %v3136_v1, 7 }
 0x47f   : > { %v3280_v0 = vrot.slane %v3136_v1, 1  ;;  %v3376_v31 = vpack.c.bf16 %v3136_v1, %v10029_v20  ;;  %v10060_v10 = vpack.c.bf16 %v3328_v12, %v3297_v49  ;;  %v10064_v21 = vsel %vm960_vm2, %v3164_v55, %v3165_v39 }
 0x480   : > { %v3166_v33 = vrot.slane %v3134_v35, 7  ;;  %v3278_v34 = vrot.slane %v3134_v35, 1  ;;  %v3375_v45 = vpack.c.bf16 %v3134_v35, %v3133_v43  ;;  %v12151_v27 = vrot.slane %v9600_v23, 7 }
 0x481   : > { %v10072_v62 = vsel %vm960_vm2, %v3167_v13, %v3168_v53  ;;  %v12152_v20 = vrot.slane %v9829_v29, 1  ;;  %v12153_v50 = vrot.slane %v9859_v46, 1  ;;  %v12155_v1 = vrot.slane %v9836_v19, 1 }
 0x482   : > { %v3200_v32 = vsel %vm960_vm2, %v3168_v53, %v12151_v27  ;;  %7432 = vmatprep.mubr.msk.bf16.mxu1 %vm557_vm4, %v3375_v45  ;;  %v10095_v35 = vsel %vm960_vm2, %v3165_v39, %v3166_v33  ;;  %v10099_v12 = vsel %vm960_vm2, %v3166_v33, %v3167_v13  ;;  %v12156_v27 = vrot.slane %v9902_v17, 1 }
 0x483   : > { %v10080_v43 = vsel %vm1073_vm3, %v12153_v50, %v12152_v20  ;;  %v12154_v55 = vmov %v12153_v50  ;;  %v3201_v49 = vsel %vm8693_vm11, 0.0, %v3200_v32  ;;  %v3247_v53 = vpack.c.bf16 %v10095_v35, %v10064_v21  ;;  %7433 = vmatmul.mubr.msk.bf16.gmra.mrb[60].mxu1 %vm557_vm4, %v3376_v31 }
 0x484   : > { %v10088_v57 = vsel %vm1073_vm3, %v12155_v1, %v12154_v55  ;;  %v3233_v19 = vpack.c.bf16 %v9636_v38, %v3201_v49  ;;  %v3248_v45 = vpack.c.bf16 %v10072_v62, %v10099_v12  ;;  %v12157_v39 = vrot.slane %v9852_v14, 1  ;;  %v7984_v49 = vld [vmem:[%s11874_s3 + $0x140] sm:$0xff]  }
 0x485   : > { %v3353_v46 = vpack.c.bf16 %v10080_v43, %v10088_v57  ;;  %v12159_v38 = vmov %v12152_v20  ;;  %v12160_v21 = vrot.slane %v9893_v51, 1  ;;  %v12161_v62 = vrot.slane %v9925_v52, 1  ;;  %v7985_v52 = vld [vmem:[%s11874_s3 + $0x148] sm:$0xff]   ;;  %7516 = vmatprep.subr.bf16.mxu0 %v7984_v49  ;;  %v10309_v43 = vld [vmem:[%s11876_s5 + $0x3] ss:$0 sm:$0xff] }
 0x486   : > { %v10114_v32 = vsel %vm1073_vm3, %v12157_v39, %v12156_v27  ;;  %v12158_v13 = vmov %v12157_v39  ;;  %v12163_v31 = vmov %v12156_v27  ;;  %v12164_v29 = vrot.slane %v9972_v48, 1  ;;  %7444 = vmatprep.mubr.msk.bf16.mxu1 %vm557_vm4, %v3233_v19  ;;  %7517 = vmatpush3.bf16.msra.mxu0 %v7984_v49  ;;  %v7982_v49 = vld [vmem:[%s11874_s3 + $0x110] sm:$0xff]  }
 0x487   : > { %v10123_v33 = vsel %vm1073_vm3, %v12159_v38, %v12158_v13  ;;  %v10131_v20 = vsel %vm1073_vm3, %v12161_v62, %v12160_v21  ;;  %v12162_v50 = vmov %v12161_v62  ;;  %v12165_v55 = vrot.slane %v9912_v36, 1  ;;  %7518 = vmatprep.subr.bf16.mxu0 %v7985_v52 }
 0x488   : > { %v10139_v14 = vsel %vm1073_vm3, %v12163_v31, %v12162_v50  ;;  %v3354_v17 = vpack.c.bf16 %v10114_v32, %v10123_v33  ;;  %v12167_v27 = vmov %v12160_v21  ;;  %v12168_v21 = vrot.slane %v9965_v42, 1 }
 0x489   : > { %v3288_v1 = vsel %vm1073_vm3, %v12165_v55, %v12164_v29  ;;  %v3355_v35 = vpack.c.bf16 %v10131_v20, %v10139_v14  ;;  %v12166_v12 = vmov %v12165_v55  ;;  %v12169_v19 = vrot.slane %v10001_v22, 1 }
 0x48a   : > { %v3289_v39 = vsel %vm1073_vm3, %v12167_v27, %v12166_v12  ;;  %v3336_v13 = vsel %vm8601_vm10, 0.0, %v3288_v1  ;;  %v12171_v36 = vmov %v12164_v29  ;;  %v12172_v62 = vrot.slane %v9988_v28, 1  ;;  %v7986_v28 = vld [vmem:[%s11874_s3 + $0x150] sm:$0xff]   ;;  %7519 = vmatpush3.bf16.msra.mxu0 %v7985_v52  ;;  %v12198_v52 = vld [vmem:[#allocation9_spill] sm:$0xff] }
 0x48b   : > { %v3356_v38 = vpack.c.bf16 %v3336_v13, %v3289_v39  ;;  %v3286_v32 = vsel %vm1073_vm3, %v12169_v19, %v12168_v21  ;;  %v12170_v33 = vmov %v12169_v19  ;;  %v12174_v14 = vmov %v12168_v21  ;;  %7520 = vmatprep.subr.bf16.mxu0 %v7986_v28  ;;  %v12202_v21 = vld [vmem:[#allocation14_spill] sm:$0xff]  ;;  %v12203_v19 = vld [vmem:[#allocation16_spill] sm:$0xff] }
 0x48c   : > { %v3287_v51 = vsel %vm1073_vm3, %v12171_v36, %v12170_v33  ;;  %v3284_v20 = vsel %vm1073_vm3, %v12172_v62, %v3277_v4  ;;  %v12173_v31 = vmov %v12172_v62  ;;  %v3282_v48 = vsel %vm1073_vm3, %v3278_v34, %v3279_v30  ;;  %v12205_v33 = vld [vmem:[#allocation17_spill] sm:$0xff]  ;;  %v12206_v36 = vld [vmem:[#allocation18_spill] sm:$0xff] }
 0x48d   : > { %v3357_v50 = vpack.c.bf16 %v3286_v32, %v3287_v51  ;;  %v3285_v29 = vsel %vm1073_vm3, %v12174_v14, %v12173_v31  ;;  %v3283_v22 = vsel %vm1073_vm3, %v3277_v4, %v3278_v34  ;;  %v3281_v12 = vsel %vm1073_vm3, %v3279_v30, %v3280_v0  ;;  %v7981_v4 = vld [vmem:[%s11874_s3 + $0x108] sm:$0xff]  }
 0x48e   : > { %v3358_v55 = vpack.c.bf16 %v3284_v20, %v3285_v29  ;;  %v3359_v1 = vpack.c.bf16 %v3282_v48, %v3283_v22  ;;  %v12175_v27 = vrot.slane %v9600_v23, 1  ;;  %v12176_v23 = vpack.c.bf16 %v9616_v47, %v9628_v5  ;;  %7521 = vmatpush3.bf16.msra.mxu0 %v7986_v28  ;;  %v7983_v47 = vld [vmem:[%s11874_s3 + $0x118] sm:$0xff]  }
 0x48f   : > { %v12177_v30 = vpack.c.bf16 %v9685_v11, %v9689_v26  ;;  %v12178_v5 = vpack.c.bf16 %v9699_v24, %v9707_v3  ;;  %v12179_v11 = vpack.c.bf16 %v9751_v41, %v9767_v37  ;;  %v12180_v26 = vpack.c.bf16 %v9822_v56, %v9812_v18  ;;  %v12184_v41 = vld [vmem:[#allocation15_spill] sm:$0xff]  ;;  %v12187_v37 = vld [vmem:[#allocation20_spill] sm:$0xff]  ;;  %v12190_v56 = vld [vmem:[#allocation22_spill] sm:$0xff] }
 0x490   : > { %v3312_v42 = vsel %vm1073_vm3, %v3280_v0, %v12175_v27  ;;  %7445 = vmatmul.mubr.msk.bf16.vlgmr.msra.gmra.mrb[32].mxu1 %vm557_vm4, %v12176_v23  ;;  %v7987_v0 = vld [vmem:[%s11874_s3 + $0x158] sm:$0xff]   ;;  %v12181_v24 = vpack.c.bf16 %v9816_v60, %v9826_v7  ;;  %v12182_v3 = vpack.c.bf16 %v9884_v54, %v9899_v15  ;;  %v12186_v60 = vld [vmem:[#allocation19_spill] sm:$0xff]  ;;  %v12204_v32 = vpack.c.bf16 %v12202_v21, %v12203_v19  ;;  %v7990_v21 = vld [vmem:[%s11874_s3 + $0x130] sm:$0xff]  }
 0x491   : > { %v3344_v39 = vsel %vm8697_vm12, 0.0, %v3312_v42  ;;  %7477 = vmatpush3.bf16.msra.mxu1 %v9730_v59  ;;  %7448 = vmatprep.mubr.msk.bf16.mxu1 %vm557_vm4, %v12177_v30  ;;  %v12183_v59 = vpack.c.bf16 %v9958_v61, %v9948_v63  ;;  %v12188_v18 = vpack.c.bf16 %v12186_v60, %v12187_v37  ;;  %v12189_v54 = vld [vmem:[#allocation11_spill] sm:$0xff]  ;;  %v12195_v63 = vld [vmem:[#allocation10_spill] sm:$0xff]  ;;  %v12196_v61 = vld [vmem:[#allocation12_spill] sm:$0xff]  ;;  %v12207_v51 = vpack.c.bf16 %v12205_v33, %v12206_v36 }
 0x492   : > { %v3360_v34 = vpack.c.bf16 %v3344_v39, %v3281_v12  ;;  %7478 = vmatprep.subr.bf16.mxu1 %v7981_v4  ;;  %7522 = vmatprep.subr.bf16.mxu0 %v7987_v0  ;;  %v12191_v7 = vpack.c.bf16 %v12189_v54, %v12190_v56  ;;  %v12192_v15 = vld [vmem:[#allocation23_spill] sm:$0xff] }
 0x493   : > { %7523 = vmatpush3.bf16.msra.mxu0 %v7987_v0 }
 0x495   : > { %7479 = vmatpush3.bf16.msra.mxu1 %v7981_v4 }
 0x496   : > { %7480 = vmatprep.subr.bf16.mxu1 %v7982_v49 }
 0x498   : > { %7449 = vmatmul.mubr.msk.bf16.gmra.mrb[36].mxu1 %vm557_vm4, %v12178_v5 }
 0x499   : > { %7452 = vmatprep.mubr.msk.bf16.mxu1 %vm557_vm4, %v9763_v6  ;;  %7481 = vmatpush3.bf16.msra.mxu1 %v7982_v49  ;;  %v12185_v6 = vpack.c.bf16 %v9952_v40, %v12184_v41  ;;  %v12193_v40 = vld [vmem:[#allocation6_spill] sm:$0xff] }
 0x49a   : > { %7482 = vmatprep.subr.bf16.mxu1 %v7983_v47 }
 0x49d   : > { %7483 = vmatpush3.bf16.msra.mxu1 %v7983_v47 }
 0x4a0   : > { %7453 = vmatmul.mubr.msk.bf16.gmra.mrb[40].mxu1 %vm557_vm4, %v12179_v11 }
 0x4a1   : > { %7456 = vmatprep.mubr.msk.bf16.mxu1 %vm557_vm4, %v12180_v26 }
 0x4a8   : > { %7457 = vmatmul.mubr.msk.bf16.gmra.mrb[44].mxu1 %vm557_vm4, %v12181_v24 }
 0x4a9   : > { %7460 = vmatprep.mubr.msk.bf16.mxu1 %vm557_vm4, %v9895_v16  ;;  %v12194_v16 = vpack.c.bf16 %v12192_v15, %v12193_v40 }
 0x4b0   : > { %7461 = vmatmul.mubr.msk.bf16.gmra.mrb[48].mxu1 %vm557_vm4, %v12182_v3 }
 0x4b1   : > { %7464 = vmatprep.mubr.msk.bf16.mxu1 %vm557_vm4, %v12183_v59 }
 0x4b8   : > { %7465 = vmatmul.mubr.msk.bf16.gmra.mrb[52].mxu1 %vm557_vm4, %v12185_v6 }
 0x4b9   : > { %7468 = vmatprep.mubr.msk.bf16.mxu1 %vm557_vm4, %v10031_v44  ;;  %v12197_v44 = vpack.c.bf16 %v12195_v63, %v12196_v61 }
 0x4c0   : > { %7469 = vmatmul.mubr.msk.bf16.gmra.mrb[56].mxu1 %vm557_vm4, %v12188_v18  ;;  %v7989_v18 = vld [vmem:[%s11874_s3 + $0x128] sm:$0xff]  }
 0x4c1   : > { %7472 = vmatprep.mubr.msk.bf16.mxu1 %vm557_vm4, %v3247_v53  ;;  %v12199_v53 = vld [vmem:[#allocation7_spill] sm:$0xff] }
 0x4c8   : > { %7473 = vmatmul.mubr.msk.bf16.gmra.mrb[60].mxu1 %vm557_vm4, %v3248_v45  ;;  %v12200_v45 = vld [vmem:[#allocation13_spill] sm:$0xff] }
 0x4c9   : > { %7484 = vmatprep.mubr.msk.bf16.mxu1 %vm557_vm4, %v12191_v7  ;;  %v12201_v13 = vpack.c.bf16 %v12199_v53, %v12200_v45 }
 0x4d0   : > { %7485 = vmatmul.mubr.msk.bf16.vlgmr.msra.gmra.mrb[32].mxu1 %vm557_vm4, %v12194_v16 }
 0x4d1   : > { %7488 = vmatprep.mubr.msk.bf16.mxu1 %vm557_vm4, %v12197_v44 }
 0x4d8   : > { %7489 = vmatmul.mubr.msk.bf16.gmra.mrb[36].mxu1 %vm557_vm4, %v12198_v52 }
 0x4d9   : > { %7492 = vmatprep.mubr.msk.bf16.mxu1 %vm557_vm4, %v12201_v13 }
 0x4e0   : > { %7493 = vmatmul.mubr.msk.bf16.gmra.mrb[40].mxu1 %vm557_vm4, %v12204_v32 }
 0x4e1   : > { %7496 = vmatprep.mubr.msk.bf16.mxu1 %vm557_vm4, %v12207_v51 }
 0x4e8   : > { %7497 = vmatmul.mubr.msk.bf16.gmra.mrb[44].mxu1 %vm557_vm4, %v10060_v10  ;;  %v7988_v10 = vld [vmem:[%s11874_s3 + $0x120] sm:$0xff]  }
 0x4e9   : > { %7500 = vmatprep.mubr.msk.bf16.mxu1 %vm557_vm4, %v3353_v46  ;;  %7556 = vmatprep.subr.bf16.mxu0 %v7988_v10 }
 0x4f0   : > { %7501 = vmatmul.mubr.msk.bf16.gmra.mrb[48].mxu1 %vm557_vm4, %v3354_v17 }
 0x4f1   : > { %7504 = vmatprep.mubr.msk.bf16.mxu1 %vm557_vm4, %v3355_v35  ;;  %v10315_v35 = vld [vmem:[%s11876_s5 + $0x7] ss:$0 sm:$0xff] }
 0x4f8   : > { %7505 = vmatmul.mubr.msk.bf16.gmra.mrb[52].mxu1 %vm557_vm4, %v3356_v38 }
 0x4f9   : > { %7508 = vmatprep.mubr.msk.bf16.mxu1 %vm557_vm4, %v3357_v50 }
 0x500   : > { %7509 = vmatmul.mubr.msk.bf16.gmra.mrb[56].mxu1 %vm557_vm4, %v3358_v55 }
 0x501   : > { %7512 = vmatprep.mubr.msk.bf16.mxu1 %vm557_vm4, %v3359_v1 }
 0x508   : > { %7513 = vmatmul.mubr.msk.bf16.gmra.mrb[60].mxu1 %vm557_vm4, %v3360_v34 }
 0x5a3   : > { %v7486_v57 = vpop.f32.mrb[32].mxu1 }
 0x5a4   : > { %v4142_v46 = vadd.f32 %v7486_v57, %v10309_v43  ;;  %v3976_v17 = vpop.f32.mrb[33].mxu1 }
 0x5a5   : > { %v4140_v38 = vadd.f32 %v10309_v43, %v3976_v17  ;;  %v7487_v62 = vpop.f32.mrb[34].mxu1 }
 0x5a6   : > { %v4174_v20 = vmax.f32 %v4142_v46, 0.0  ;;  %v4143_v50 = vadd.f32 %v7487_v62, %v10309_v43  ;;  %v3979_v31 = vpop.f32.mrb[35].mxu1 }
 0x5a7   : > { %v4172_v14 = vmax.f32 %v4140_v38, 0.0  ;;  %v4141_v29 = vadd.f32 %v10309_v43, %v3979_v31 }
 0x5a8   : > { %v4211_v48 = vadd.f32 %v10315_v35, %v4174_v20  ;;  %v4175_v22 = vmax.f32 %v4143_v50, 0.0 }
 0x5a9   : > { %v10322_v55 = vadd.f32 %v10315_v35, %v4172_v14  ;;  %v4173_v1 = vmax.f32 %v4141_v29, 0.0 }
 0x5aa   : > { %v4243_v12 = vrot.slane %v4211_v48, 7  ;;  %v10325_v27 = vadd.f32 %v10315_v35, %v4175_v22  ;;  %v4355_v42 = vrot.slane %v4211_v48, 1 }
 0x5ab   : > { %v11939_v28 = vrot.slane %v10322_v55, 7  ;;  %v11938_v39 = vrot.slane %v10322_v55, 1  ;;  %v4210_v4 = vadd.f32 %v10315_v35, %v4173_v1  ;;  %v7490_v34 = vpop.f32.mrb[36].mxu1 }
 0x5ac   : > { %v4244_v23 = vrot.slane %v10325_v27, 7  ;;  %v4356_v0 = vrot.slane %v10325_v27, 1  ;;  %v4466_v30 = vpack.c.bf16 %v10325_v27, %v4211_v48  ;;  %v4146_v49 = vadd.f32 %v7490_v34, %v10309_v43  ;;  %v3992_v47 = vpop.f32.mrb[37].mxu1  ;;  %v7991_v34 = vld [vmem:[%s11874_s3 + $0x138] sm:$0xff]  }
 0x5ad   : > { %v4242_v5 = vrot.slane %v4210_v4, 7  ;;  %v4354_v11 = vrot.slane %v4210_v4, 1  ;;  %v4144_v26 = vadd.f32 %v10309_v43, %v3992_v47  ;;  %v7491_v24 = vpop.f32.mrb[38].mxu1  ;;  %v4465_v3 = vpack.c.bf16 %v4210_v4, %v10322_v55 }
 0x5ae   : > { %v10338_v59 = vsel %vm960_vm2, %v4243_v12, %v4244_v23  ;;  %v10342_v41 = vsel %vm1073_vm3, %v4355_v42, %v4356_v0  ;;  %v4178_v6 = vmax.f32 %v4146_v49, 0.0  ;;  %v4147_v60 = vadd.f32 %v7491_v24, %v10309_v43  ;;  %v3995_v37 = vpop.f32.mrb[39].mxu1 }
 0x5af   : > { %12208 = vst [vmem:[#allocation21_spill] sm:$0xff] %v10342_v41  ;;  %v10350_v54 = vsel %vm960_vm2, %v4242_v5, %v4243_v12  ;;  %v4176_v56 = vmax.f32 %v4144_v26, 0.0  ;;  %v4145_v7 = vadd.f32 %v10309_v43, %v3995_v37  ;;  %7524 = vmatprep.mubr.msk.bf16.mxu0 %vm557_vm4, %v4465_v3  ;;  %v10358_v15 = vsel %vm960_vm2, %v11939_v28, %v4242_v5 }
 0x5b0   : > { %v10363_v16 = vadd.f32 %v10315_v35, %v4178_v6  ;;  %v4179_v63 = vmax.f32 %v4147_v60, 0.0  ;;  %7525 = vmatmul.mubr.msk.bf16.vlgmr.msra.gmra.mrb[64].mxu0 %vm557_vm4, %v4466_v30  ;;  %v10368_v61 = vsel %vm1073_vm3, %v4354_v11, %v4355_v42  ;;  %v10375_v53 = vsel %vm1073_vm3, %v11938_v39, %v4354_v11 }
 0x5b1   : > { %12209 = vst [vmem:[#allocation15_spill] sm:$0xff] %v10368_v61  ;;  %v4213_v44 = vadd.f32 %v10315_v35, %v4176_v56  ;;  %v4177_v52 = vmax.f32 %v4145_v7, 0.0  ;;  %7557 = vmatpush3.bf16.msra.mxu0 %v7988_v10  ;;  %12210 = vst [vmem:[#allocation19_spill] sm:$0xff] %v10375_v53 }
 0x5b2   : > { %v4247_v45 = vrot.slane %v10363_v16, 7  ;;  %v10379_v13 = vadd.f32 %v10315_v35, %v4179_v63  ;;  %7558 = vmatprep.subr.bf16.mxu0 %v7989_v18  ;;  %v4359_v32 = vrot.slane %v10363_v16, 1 }
 0x5b3   : > { %v4245_v33 = vrot.slane %v4213_v44, 7  ;;  %v4357_v36 = vrot.slane %v4213_v44, 1  ;;  %v4214_v51 = vadd.f32 %v10315_v35, %v4177_v52  ;;  %v7494_v10 = vpop.f32.mrb[40].mxu1  ;;  %v10452_v52 = vld [vmem:[%s11874_s3 + $0x160] sm:$0xff]  }
 0x5b4   : > { %v4248_v57 = vrot.slane %v10379_v13, 7  ;;  %v4360_v46 = vrot.slane %v10379_v13, 1  ;;  %v4150_v17 = vadd.f32 %v7494_v10, %v10309_v43  ;;  %v4008_v38 = vpop.f32.mrb[41].mxu1  ;;  %v4468_v62 = vpack.c.bf16 %v10379_v13, %v10363_v16 }
 0x5b5   : > { %v10395_v20 = vsel %vm1073_vm3, %v4356_v0, %v4357_v36  ;;  %v4246_v50 = vrot.slane %v4214_v51, 7  ;;  %v4358_v31 = vrot.slane %v4214_v51, 1  ;;  %v4148_v14 = vadd.f32 %v10309_v43, %v4008_v38  ;;  %v7495_v29 = vpop.f32.mrb[42].mxu1  ;;  %7559 = vmatpush3.bf16.msra.mxu0 %v7989_v18 }
 0x5b6   : > { %12211 = vst [vmem:[#allocation20_spill] sm:$0xff] %v10395_v20  ;;  %v4182_v22 = vmax.f32 %v4150_v17, 0.0  ;;  %v4151_v1 = vadd.f32 %v7495_v29, %v10309_v43  ;;  %v4011_v12 = vpop.f32.mrb[43].mxu1  ;;  %v4467_v27 = vpack.c.bf16 %v4214_v51, %v4213_v44  ;;  %7560 = vmatprep.subr.bf16.mxu0 %v7990_v21  ;;  %v10411_v30 = vsel %vm960_vm2, %v4244_v23, %v4245_v33 }
 0x5b7   : > { %v4180_v42 = vmax.f32 %v4148_v14, 0.0  ;;  %v4149_v4 = vadd.f32 %v10309_v43, %v4011_v12  ;;  %v10407_v0 = vsel %vm960_vm2, %v4245_v33, %v4246_v50  ;;  %v10421_v11 = vsel %vm960_vm2, %v4247_v45, %v4248_v57 }
 0x5b8   : > { %v10414_v49 = vadd.f32 %v10315_v35, %v4182_v22  ;;  %v4183_v47 = vmax.f32 %v4151_v1, 0.0  ;;  %7528 = vmatprep.mubr.msk.bf16.mxu0 %vm557_vm4, %v4467_v27  ;;  %v10429_v23 = vsel %vm960_vm2, %v4246_v50, %v4247_v45  ;;  %v10435_v3 = vsel %vm1073_vm3, %v4358_v31, %v4359_v32 }
 0x5b9   : > { %v10424_v26 = vadd.f32 %v10315_v35, %v4180_v42  ;;  %v4181_v24 = vmax.f32 %v4149_v4, 0.0  ;;  %7529 = vmatmul.mubr.msk.bf16.gmra.mrb[68].mxu0 %vm557_vm4, %v4468_v62  ;;  %12212 = vst [vmem:[#allocation11_spill] sm:$0xff] %v10435_v3  ;;  %v10456_v45 = vsel %vm1073_vm3, %v4357_v36, %v4358_v31  ;;  %v12265_v25 = vpack.c.bf16 %v10407_v0, %v10411_v30 }
 0x5ba   : > { %v4251_v6 = vrot.slane %v10414_v49, 7  ;;  %v11940_v60 = vrot.slane %v10414_v49, 1  ;;  %v10440_v37 = vadd.f32 %v10315_v35, %v4183_v47  ;;  %7561 = vmatpush3.bf16.msra.mxu0 %v7990_v21  ;;  %12213 = vst [vmem:[#allocation22_spill] sm:$0xff] %v10456_v45 }
 0x5bb   : > { %v4249_v56 = vrot.slane %v10424_v26, 7  ;;  %v4361_v7 = vrot.slane %v10424_v26, 1  ;;  %v10447_v63 = vadd.f32 %v10315_v35, %v4181_v24  ;;  %v7498_v44 = vpop.f32.mrb[44].mxu1  ;;  %7562 = vmatprep.subr.bf16.mxu0 %v7991_v34 }
 0x5bc   : > { %v4252_v21 = vrot.slane %v10440_v37, 7  ;;  %v4154_v51 = vadd.f32 %v7498_v44, %v10309_v43  ;;  %v4024_v10 = vpop.f32.mrb[45].mxu1  ;;  %v4470_v17 = vpack.c.bf16 %v10440_v37, %v10414_v49 }
 0x5bd   : > { %v4250_v38 = vrot.slane %v10447_v63, 7  ;;  %v4362_v62 = vrot.slane %v10447_v63, 1  ;;  %v4152_v50 = vadd.f32 %v10309_v43, %v4024_v10  ;;  %v7499_v14 = vpop.f32.mrb[46].mxu1  ;;  %v4469_v36 = vpack.c.bf16 %v10447_v63, %v10424_v26 }
 0x5be   : > { %v4186_v31 = vmax.f32 %v4154_v51, 0.0  ;;  %v4155_v29 = vadd.f32 %v7499_v14, %v10309_v43  ;;  %v4027_v22 = vpop.f32.mrb[47].mxu1  ;;  %7563 = vmatpush3.bf16.msra.mxu0 %v7991_v34  ;;  %v4296_v1 = vsel %vm960_vm2, %v4248_v57, %v4249_v56  ;;  %v10473_v12 = vsel %vm960_vm2, %v4251_v6, %v4252_v21 }
 0x5bf   : > { %v4184_v27 = vmax.f32 %v4152_v50, 0.0  ;;  %v4153_v42 = vadd.f32 %v10309_v43, %v4027_v22  ;;  %7532 = vmatprep.mubr.msk.bf16.mxu0 %vm557_vm4, %v4469_v36  ;;  %7596 = vmatprep.subr.bf16.mxu0 %v10452_v52  ;;  %v4295_v4 = vsel %vm960_vm2, %v4249_v56, %v4250_v38  ;;  %v4313_v34 = vsel %vm8361_vm5, 0.0, %v4296_v1 }
 0x5c0   : > { %v10483_v24 = vadd.f32 %v10315_v35, %v4186_v31  ;;  %v4187_v57 = vmax.f32 %v4155_v29, 0.0  ;;  %v10485_v44 = vpack.c.bf16 %v4295_v4, %v4313_v34  ;;  %v10489_v51 = vsel %vm960_vm2, %v4250_v38, %v4251_v6 }
 0x5c1   : > { %v10492_v10 = vadd.f32 %v10315_v35, %v4184_v27  ;;  %v4185_v50 = vmax.f32 %v4153_v42, 0.0  ;;  %7533 = vmatmul.mubr.msk.bf16.gmra.mrb[72].mxu0 %vm557_vm4, %v4470_v17  ;;  %v4408_v6 = vsel %vm1073_vm3, %v4360_v46, %v4361_v7  ;;  %v4409_v27 = vsel %vm1073_vm3, %v4359_v32, %v4360_v46 }
 0x5c2   : > { %v4255_v36 = vrot.slane %v10483_v24, 7  ;;  %v10502_v29 = vadd.f32 %v10315_v35, %v4187_v57  ;;  %v10589_v40 = vsel %vm1073_vm3, %v4361_v7, %v4362_v62  ;;  %v12267_v0 = vpack.c.bf16 %v10473_v12, %v10489_v51 }
 0x5c3   : > { %v4253_v17 = vrot.slane %v10492_v10, 7  ;;  %v11941_v38 = vrot.slane %v10492_v10, 1  ;;  %v10513_v22 = vadd.f32 %v10315_v35, %v4185_v50  ;;  %v7502_v1 = vpop.f32.mrb[48].mxu1  ;;  %12218 = vst [vmem:[#allocation10_spill] sm:$0xff] %v10589_v40 }
 0x5c4   : > { %v4256_v42 = vrot.slane %v10502_v29, 7  ;;  %v4158_v47 = vadd.f32 %v7502_v1, %v10309_v43  ;;  %v4040_v34 = vpop.f32.mrb[49].mxu1  ;;  %v4472_v57 = vpack.c.bf16 %v10502_v29, %v10483_v24 }
 0x5c5   : > { %v4254_v50 = vrot.slane %v10513_v22, 7  ;;  %v4156_v13 = vadd.f32 %v10309_v43, %v4040_v34  ;;  %v7503_v16 = vpop.f32.mrb[50].mxu1  ;;  %v4471_v32 = vpack.c.bf16 %v10513_v22, %v10492_v10  ;;  %v10534_v1 = vsel %vm960_vm2, %v4252_v21, %v4253_v17 }
 0x5c6   : > { %v4190_v46 = vmax.f32 %v4158_v47, 0.0  ;;  %v4159_v48 = vadd.f32 %v7503_v16, %v10309_v43  ;;  %v4043_v19 = vpop.f32.mrb[51].mxu1  ;;  %v10538_v56 = vsel %vm960_vm2, %v4255_v36, %v4256_v42 }
 0x5c7   : > { %v4188_v18 = vmax.f32 %v4156_v13, 0.0  ;;  %v4157_v5 = vadd.f32 %v10309_v43, %v4043_v19  ;;  %7536 = vmatprep.mubr.msk.bf16.mxu0 %vm557_vm4, %v4471_v32  ;;  %v10544_v34 = vsel %vm960_vm2, %v4253_v17, %v4254_v50  ;;  %v10548_v47 = vsel %vm960_vm2, %v4254_v50, %v4255_v36 }
 0x5c8   : > { %v10551_v21 = vadd.f32 %v10315_v35, %v4190_v46  ;;  %v4191_v16 = vmax.f32 %v4159_v48, 0.0  ;;  %v4424_v36 = vsel %vm8390_vm6, 0.0, %v4408_v6  ;;  %v10569_v48 = vsel %vm1073_vm3, %v4362_v62, %v11940_v60 }
 0x5c9   : > { %v10558_v13 = vadd.f32 %v10315_v35, %v4188_v18  ;;  %v4189_v32 = vmax.f32 %v4157_v5, 0.0  ;;  %7537 = vmatmul.mubr.msk.bf16.gmra.mrb[76].mxu0 %vm557_vm4, %v4472_v57  ;;  %12216 = vst [vmem:[#allocation23_spill] sm:$0xff] %v10569_v48  ;;  %v10576_v5 = vpack.c.bf16 %v4424_v36, %v4409_v27  ;;  %v12268_v30 = vpack.c.bf16 %v10544_v34, %v10534_v1  ;;  %v12278_v34 = vld [vmem:[#allocation19_spill] sm:$0xff] }
 0x5ca   : > { %v4259_v50 = vrot.slane %v10551_v21, 7  ;;  %v10574_v18 = vadd.f32 %v10315_v35, %v4191_v16 }
 0x5cb   : > { %12217 = vst [vmem:[#allocation6_spill] sm:$0xff] %v10576_v5  ;;  %v4257_v57 = vrot.slane %v10558_v13, 7  ;;  %v10581_v17 = vadd.f32 %v10315_v35, %v4189_v32  ;;  %v7506_v19 = vpop.f32.mrb[52].mxu1  ;;  %v12235_v53 = vrot.slane %v10558_v13, 1 }
 0x5cc   : > { %v4260_v16 = vrot.slane %v10574_v18, 7  ;;  %v4162_v36 = vadd.f32 %v7506_v19, %v10309_v43  ;;  %v4056_v39 = vpop.f32.mrb[53].mxu1  ;;  %v4474_v32 = vpack.c.bf16 %v10574_v18, %v10551_v21 }
 0x5cd   : > { %v4258_v46 = vrot.slane %v10581_v17, 7  ;;  %v4160_v26 = vadd.f32 %v10309_v43, %v4056_v39  ;;  %v7507_v28 = vpop.f32.mrb[54].mxu1  ;;  %v4473_v7 = vpack.c.bf16 %v10581_v17, %v10558_v13  ;;  %v4288_v19 = vsel %vm960_vm2, %v4256_v42, %v4257_v57 }
 0x5ce   : > { %v4194_v62 = vmax.f32 %v4162_v36, 0.0  ;;  %v4163_v4 = vadd.f32 %v7507_v28, %v10309_v43  ;;  %v4059_v27 = vpop.f32.mrb[55].mxu1  ;;  %v10606_v6 = vsel %vm960_vm2, %v4259_v50, %v4260_v16  ;;  %v4321_v36 = vsel %vm8477_vm7, 0.0, %v4288_v19 }
 0x5cf   : > { %v4192_v14 = vmax.f32 %v4160_v26, 0.0  ;;  %v4161_v63 = vadd.f32 %v10309_v43, %v4059_v27  ;;  %7540 = vmatprep.mubr.msk.bf16.mxu0 %vm557_vm4, %v4473_v7  ;;  %v4287_v39 = vsel %vm960_vm2, %v4257_v57, %v4258_v46  ;;  %v10621_v33 = vsel %vm960_vm2, %v4258_v46, %v4259_v50 }
 0x5d0   : > { %v10615_v28 = vadd.f32 %v10315_v35, %v4194_v62  ;;  %v4195_v60 = vmax.f32 %v4163_v4, 0.0  ;;  %v10617_v42 = vpack.c.bf16 %v4287_v39, %v4321_v36 }
 0x5d1   : > { %v10624_v27 = vadd.f32 %v10315_v35, %v4192_v14  ;;  %v4193_v26 = vmax.f32 %v4161_v63, 0.0  ;;  %7541 = vmatmul.mubr.msk.bf16.gmra.mrb[80].mxu0 %vm557_vm4, %v4474_v32  ;;  %v12220_v14 = vrot.slane %v10440_v37, 1 }
 0x5d2   : > { %v4263_v4 = vrot.slane %v10615_v28, 7  ;;  %v10634_v62 = vadd.f32 %v10315_v35, %v4195_v60  ;;  %v12223_v60 = vrot.slane %v10414_v49, 1 }
 0x5d3   : > { %v10642_v50 = vsel %vm1073_vm3, %v12220_v14, %v11941_v38  ;;  %v4261_v46 = vrot.slane %v10624_v27, 7  ;;  %v10647_v63 = vadd.f32 %v10315_v35, %v4193_v26  ;;  %v7510_v19 = vpop.f32.mrb[56].mxu1  ;;  %v12222_v39 = vmov %v12220_v14 }
 0x5d4   : > { %12221 = vst [vmem:[#allocation12_spill] sm:$0xff] %v10642_v50  ;;  %v10655_v36 = vsel %vm1073_vm3, %v12223_v60, %v12222_v39  ;;  %v4264_v57 = vrot.slane %v10634_v62, 7  ;;  %v4166_v31 = vadd.f32 %v7510_v19, %v10309_v43  ;;  %v4072_v7 = vpop.f32.mrb[57].mxu1  ;;  %v4476_v26 = vpack.c.bf16 %v10634_v62, %v10615_v28 }
 0x5d5   : > { %12224 = vst [vmem:[#allocation9_spill] sm:$0xff] %v10655_v36  ;;  %v4262_v32 = vrot.slane %v10647_v63, 7  ;;  %v4164_v49 = vadd.f32 %v10309_v43, %v4072_v7  ;;  %v7511_v38 = vpop.f32.mrb[58].mxu1  ;;  %v4475_v39 = vpack.c.bf16 %v10647_v63, %v10624_v27  ;;  %v10670_v19 = vsel %vm960_vm2, %v4260_v16, %v4261_v46 }
 0x5d6   : > { %v4198_v60 = vmax.f32 %v4166_v31, 0.0  ;;  %v4167_v40 = vadd.f32 %v7511_v38, %v10309_v43  ;;  %v4075_v14 = vpop.f32.mrb[59].mxu1  ;;  %v10674_v48 = vsel %vm960_vm2, %v4263_v4, %v4264_v57 }
 0x5d7   : > { %v4196_v5 = vmax.f32 %v4164_v49, 0.0  ;;  %v4165_v37 = vadd.f32 %v10309_v43, %v4075_v14  ;;  %7544 = vmatprep.mubr.msk.bf16.mxu0 %vm557_vm4, %v4475_v39  ;;  %v10680_v7 = vsel %vm960_vm2, %v4261_v46, %v4262_v32  ;;  %v10684_v38 = vsel %vm960_vm2, %v4262_v32, %v4263_v4 }
 0x5d8   : > { %12225 = vst [vmem:[#allocation7_spill] sm:$0xff] %v10684_v38  ;;  %v10687_v16 = vadd.f32 %v10315_v35, %v4198_v60  ;;  %v4199_v31 = vmax.f32 %v4167_v40, 0.0  ;;  %v12226_v46 = vrot.slane %v10483_v24, 1  ;;  %v12227_v32 = vrot.slane %v10513_v22, 1 }
 0x5d9   : > { %v10694_v49 = vadd.f32 %v10315_v35, %v4196_v5  ;;  %v4197_v39 = vmax.f32 %v4165_v37, 0.0  ;;  %7545 = vmatmul.mubr.msk.bf16.gmra.mrb[84].mxu0 %vm557_vm4, %v4476_v26  ;;  %v12230_v37 = vrot.slane %v10492_v10, 1 }
 0x5da   : > { %v10705_v40 = vsel %vm1073_vm3, %v12227_v32, %v12226_v46  ;;  %v4267_v60 = vrot.slane %v10687_v16, 7  ;;  %v10710_v5 = vadd.f32 %v10315_v35, %v4199_v31  ;;  %v12229_v26 = vmov %v12227_v32 }
 0x5db   : > { %12228 = vst [vmem:[#allocation13_spill] sm:$0xff] %v10705_v40  ;;  %v10718_v4 = vsel %vm1073_vm3, %v12230_v37, %v12229_v26  ;;  %v4265_v45 = vrot.slane %v10694_v49, 7  ;;  %v10723_v32 = vadd.f32 %v10315_v35, %v4197_v39  ;;  %v7514_v36 = vpop.f32.mrb[60].mxu1 }
 0x5dc   : > { %12231 = vst [vmem:[#allocation14_spill] sm:$0xff] %v10718_v4  ;;  %v4268_v14 = vrot.slane %v10710_v5, 7  ;;  %v4170_v10 = vadd.f32 %v7514_v36, %v10309_v43  ;;  %v4088_v50 = vpop.f32.mrb[61].mxu1  ;;  %v4478_v26 = vpack.c.bf16 %v10710_v5, %v10687_v16 }
 0x5dd   : > { %v4266_v37 = vrot.slane %v10723_v32, 7  ;;  %v4168_v39 = vadd.f32 %v10309_v43, %v4088_v50  ;;  %v7515_v3 = vpop.f32.mrb[62].mxu1  ;;  %v4477_v31 = vpack.c.bf16 %v10723_v32, %v10694_v49  ;;  %v4280_v36 = vsel %vm960_vm2, %v4264_v57, %v4265_v45 }
 0x5de   : > { %v4202_v4 = vmax.f32 %v4170_v10, 0.0  ;;  %v4171_v40 = vadd.f32 %v7515_v3, %v10309_v43  ;;  %v4091_v22 = vpop.f32.mrb[63].mxu1  ;;  %v10742_v41 = vsel %vm960_vm2, %v4267_v60, %v4268_v14  ;;  %v4329_v10 = vsel %vm8589_vm9, 0.0, %v4280_v36 }
 0x5df   : > { %12232 = vst [vmem:[#allocation16_spill] sm:$0xff] %v10742_v41  ;;  %v4200_v20 = vmax.f32 %v4168_v39, 0.0  ;;  %v4169_v46 = vadd.f32 %v10309_v43, %v4091_v22  ;;  %7548 = vmatprep.mubr.msk.bf16.mxu0 %vm557_vm4, %v4477_v31  ;;  %v4279_v50 = vsel %vm960_vm2, %v4265_v45, %v4266_v37  ;;  %v10757_v38 = vsel %vm960_vm2, %v4266_v37, %v4267_v60  ;;  %v12272_v12 = vld [vmem:[#allocation7_spill] sm:$0xff] }
 0x5e0   : > { %v10751_v3 = vadd.f32 %v10315_v35, %v4202_v4  ;;  %v4203_v61 = vmax.f32 %v4171_v40, 0.0  ;;  %v10753_v57 = vpack.c.bf16 %v4279_v50, %v4329_v10  ;;  %12234 = vst [vmem:[#allocation17_spill] sm:$0xff] %v10757_v38  ;;  %v12236_v4 = vrot.slane %v10502_v29, 1 }
 0x5e1   : > { %v4237_v43 = vadd.f32 %v10315_v35, %v4200_v20  ;;  %v4201_v22 = vmax.f32 %v4169_v46, 0.0  ;;  %7549 = vmatmul.mubr.msk.bf16.gmra.mrb[88].mxu0 %vm557_vm4, %v4478_v26  ;;  %v12238_v46 = vrot.slane %v10483_v24, 1 }
 0x5e2   : > { %v4400_v40 = vsel %vm1073_vm3, %v12236_v4, %v12235_v53  ;;  %v4271_v31 = vrot.slane %v10751_v3, 7  ;;  %v4383_v60 = vrot.slane %v10751_v3, 1  ;;  %v4240_v37 = vadd.f32 %v10315_v35, %v4203_v61 }
 0x5e3   : > { %v12237_v20 = vmov %v12236_v4  ;;  %v4269_v39 = vrot.slane %v4237_v43, 7  ;;  %v4381_v36 = vrot.slane %v4237_v43, 1  ;;  %v4238_v50 = vadd.f32 %v10315_v35, %v4201_v22 }
 0x5e4   : > { %v4401_v26 = vsel %vm1073_vm3, %v12238_v46, %v12237_v20  ;;  %v4432_v10 = vsel %vm8510_vm8, 0.0, %v4400_v40  ;;  %v4272_v53 = vrot.slane %v4240_v37, 7  ;;  %v4384_v4 = vrot.slane %v4240_v37, 1 }
 0x5e5   : > { %v4480_v45 = vpack.c.bf16 %v4240_v37, %v10751_v3  ;;  %v10782_v38 = vpack.c.bf16 %v4432_v10, %v4401_v26  ;;  %v4270_v61 = vrot.slane %v4238_v50, 7  ;;  %v4382_v29 = vrot.slane %v4238_v50, 1 }
 0x5e6   : > { %v4479_v41 = vpack.c.bf16 %v4238_v50, %v4237_v43  ;;  %v10786_v24 = vsel %vm960_vm2, %v4268_v14, %v4269_v39  ;;  %v12239_v20 = vrot.slane %v10322_v55, 7  ;;  %v10794_v2 = vsel %vm960_vm2, %v4271_v31, %v4272_v53  ;;  %v12274_v51 = vld [vmem:[#allocation16_spill] sm:$0xff] }
 0x5e7   : > { %v12240_v3 = vrot.slane %v10551_v21, 1  ;;  %v12241_v22 = vrot.slane %v10581_v17, 1  ;;  %v12243_v40 = vrot.slane %v10558_v13, 1  ;;  %v10817_v26 = vsel %vm960_vm2, %v4269_v39, %v4270_v61 }
 0x5e8   : > { %v4304_v35 = vsel %vm960_vm2, %v4272_v53, %v12239_v20  ;;  %7552 = vmatprep.mubr.msk.bf16.mxu0 %vm557_vm4, %v4479_v41  ;;  %v10821_v50 = vsel %vm960_vm2, %v4270_v61, %v4271_v31  ;;  %v4351_v10 = vpack.c.bf16 %v10817_v26, %v10786_v24  ;;  %v12244_v41 = vrot.slane %v10624_v27, 1 }
 0x5e9   : > { %v10802_v43 = vsel %vm1073_vm3, %v12241_v22, %v12240_v3  ;;  %v12242_v14 = vmov %v12241_v22  ;;  %v4305_v46 = vsel %vm8693_vm11, 0.0, %v4304_v35  ;;  %v4352_v8 = vpack.c.bf16 %v10794_v2, %v10821_v50  ;;  %7553 = vmatmul.mubr.msk.bf16.gmra.mrb[92].mxu0 %vm557_vm4, %v4480_v45 }
 0x5ea   : > { %v10810_v37 = vsel %vm1073_vm3, %v12243_v40, %v12242_v14  ;;  %v4337_v17 = vpack.c.bf16 %v10358_v15, %v4305_v46  ;;  %v12245_v39 = vrot.slane %v10574_v18, 1  ;;  %v12247_v15 = vmov %v12240_v3  ;;  %v7996_v14 = vld [vmem:[%s11875_s4] sm:$0xff]  }
 0x5eb   : > { %v4457_v13 = vpack.c.bf16 %v10802_v43, %v10810_v37  ;;  %v12248_v24 = vrot.slane %v10615_v28, 1  ;;  %v12249_v20 = vrot.slane %v10647_v63, 1  ;;  %v12251_v45 = vmov %v12244_v41  ;;  %v7997_v63 = vld [vmem:[%s11875_s4 + $0x8] sm:$0xff]   ;;  %7636 = vmatprep.subr.bf16.mxu1 %v7996_v14 }
 0x5ec   : > { %v10836_v53 = vsel %vm1073_vm3, %v12245_v39, %v12244_v41  ;;  %v12246_v31 = vmov %v12245_v39  ;;  %v12252_v21 = vrot.slane %v10694_v49, 1  ;;  %v12253_v3 = vrot.slane %v10634_v62, 1  ;;  %7564 = vmatprep.mubr.msk.bf16.mxu0 %vm557_vm4, %v4337_v17  ;;  %7637 = vmatpush3.bf16.msra.mxu1 %v7996_v14 }
 0x5ed   : > { %v10845_v61 = vsel %vm1073_vm3, %v12247_v15, %v12246_v31  ;;  %v10853_v35 = vsel %vm1073_vm3, %v12249_v20, %v12248_v24  ;;  %v12250_v2 = vmov %v12249_v20  ;;  %v12255_v26 = vmov %v12248_v24  ;;  %7638 = vmatprep.subr.bf16.mxu1 %v7997_v63 }
 0x5ee   : > { %v10861_v18 = vsel %vm1073_vm3, %v12251_v45, %v12250_v2  ;;  %v4392_v22 = vsel %vm1073_vm3, %v12253_v3, %v12252_v21  ;;  %v4458_v27 = vpack.c.bf16 %v10836_v53, %v10845_v61  ;;  %v12254_v46 = vmov %v12253_v3 }
 0x5ef   : > { %v4459_v40 = vpack.c.bf16 %v10853_v35, %v10861_v18  ;;  %v4393_v50 = vsel %vm1073_vm3, %v12255_v26, %v12254_v46  ;;  %v4440_v41 = vsel %vm8601_vm10, 0.0, %v4392_v22  ;;  %v12256_v31 = vrot.slane %v10687_v16, 1  ;;  %v12291_v46 = vld [vmem:[#allocation9_spill] sm:$0xff] }
 0x5f0   : > { %v4460_v39 = vpack.c.bf16 %v4440_v41, %v4393_v50  ;;  %v12257_v17 = vrot.slane %v10723_v32, 1  ;;  %v12259_v62 = vmov %v12252_v21  ;;  %v12260_v61 = vrot.slane %v10710_v5, 1  ;;  %v7998_v5 = vld [vmem:[%s11875_s4 + $0x10] sm:$0xff]   ;;  %7639 = vmatpush3.bf16.msra.mxu1 %v7997_v63  ;;  %v12293_v50 = vld [vmem:[#allocation13_spill] sm:$0xff]  ;;  %v12294_v41 = vld [vmem:[#allocation14_spill] sm:$0xff] }
 0x5f1   : > { %v12262_v35 = vmov %v12256_v31  ;;  %v4386_v49 = vsel %vm1073_vm3, %v4382_v29, %v4383_v60  ;;  %v4387_v32 = vsel %vm1073_vm3, %v4381_v36, %v4382_v29  ;;  %v4385_v21 = vsel %vm1073_vm3, %v4383_v60, %v4384_v4  ;;  %7640 = vmatprep.subr.bf16.mxu1 %v7998_v5  ;;  %v7994_v60 = vld [vmem:[%s11874_s3 + $0x170] sm:$0xff]  }
 0x5f2   : > { %v4390_v53 = vsel %vm1073_vm3, %v12257_v17, %v12256_v31  ;;  %v12258_v15 = vmov %v12257_v17  ;;  %v4388_v58 = vsel %vm1073_vm3, %v12260_v61, %v4381_v36  ;;  %v12261_v20 = vmov %v12260_v61  ;;  %v7993_v36 = vld [vmem:[%s11874_s3 + $0x168] sm:$0xff]   ;;  %v12290_v63 = vld [vmem:[#allocation12_spill] sm:$0xff] }
 0x5f3   : > { %v4391_v28 = vsel %vm1073_vm3, %v12259_v62, %v12258_v15  ;;  %v4389_v2 = vsel %vm1073_vm3, %v12262_v35, %v12261_v20  ;;  %v4463_v18 = vpack.c.bf16 %v4386_v49, %v4387_v32  ;;  %v12263_v3 = vrot.slane %v10322_v55, 1  ;;  %v11036_v15 = vld [vmem:[%s11876_s5 + $0x8] ss:$0 sm:$0xff] }
 0x5f4   : > { %v4461_v24 = vpack.c.bf16 %v4390_v53, %v4391_v28  ;;  %v4462_v45 = vpack.c.bf16 %v4388_v58, %v4389_v2  ;;  %v12264_v55 = vpack.c.bf16 %v10338_v59, %v10350_v54  ;;  %7641 = vmatpush3.bf16.msra.mxu1 %v7998_v5  ;;  %v7995_v59 = vld [vmem:[%s11874_s3 + $0x178] sm:$0xff]   ;;  %v12266_v54 = vpack.c.bf16 %v10421_v11, %v10429_v23 }
 0x5f5   : > { %v4416_v16 = vsel %vm1073_vm3, %v4384_v4, %v12263_v3  ;;  %7642 = vmatprep.subr.bf16.mxu1 %v7999_v9  ;;  %v12269_v11 = vpack.c.bf16 %v10538_v56, %v10548_v47  ;;  %v12270_v23 = vpack.c.bf16 %v10606_v6, %v10621_v33  ;;  %v12275_v56 = vld [vmem:[#allocation17_spill] sm:$0xff]  ;;  %v12277_v33 = vld [vmem:[#allocation15_spill] sm:$0xff]  ;;  %v12286_v4 = vld [vmem:[#allocation6_spill] sm:$0xff]  ;;  %v12292_v26 = vpack.c.bf16 %v12290_v63, %v12291_v46 }
 0x5f6   : > { %v4448_v22 = vsel %vm8697_vm12, 0.0, %v4416_v16  ;;  %7565 = vmatmul.mubr.msk.bf16.vlgmr.msra.gmra.mrb[64].mxu0 %vm557_vm4, %v12264_v55  ;;  %v12276_v1 = vpack.c.bf16 %v12274_v51, %v12275_v56  ;;  %v12279_v47 = vpack.c.bf16 %v12277_v33, %v12278_v34  ;;  %v12281_v6 = vld [vmem:[#allocation21_spill] sm:$0xff]  ;;  %v12295_v31 = vpack.c.bf16 %v12293_v50, %v12294_v41 }
 0x5f7   : > { %v4464_v29 = vpack.c.bf16 %v4448_v22, %v4385_v21  ;;  %7597 = vmatpush3.bf16.msra.mxu0 %v10452_v52  ;;  %7568 = vmatprep.mubr.msk.bf16.mxu0 %vm557_vm4, %v12265_v25  ;;  %v12271_v52 = vpack.c.bf16 %v10680_v7, %v10670_v19  ;;  %v12283_v19 = vld [vmem:[#allocation11_spill] sm:$0xff]  ;;  %v12284_v7 = vld [vmem:[#allocation22_spill] sm:$0xff] }
 0x5f8   : > { %7598 = vmatprep.subr.bf16.mxu0 %v7993_v36  ;;  %7643 = vmatpush3.bf16.msra.mxu1 %v7999_v9 }
 0x5fb   : > { %7599 = vmatpush3.bf16.msra.mxu0 %v7993_v36 }
 0x5fc   : > { %7600 = vmatprep.subr.bf16.mxu0 %v7994_v60 }
 0x5fe   : > { %7569 = vmatmul.mubr.msk.bf16.gmra.mrb[68].mxu0 %vm557_vm4, %v12266_v54 }
 0x5ff   : > { %7572 = vmatprep.mubr.msk.bf16.mxu0 %vm557_vm4, %v10485_v44  ;;  %7601 = vmatpush3.bf16.msra.mxu0 %v7994_v60  ;;  %v12273_v44 = vpack.c.bf16 %v10674_v48, %v12272_v12  ;;  %v12280_v48 = vld [vmem:[#allocation20_spill] sm:$0xff] }
 0x600   : > { %7602 = vmatprep.subr.bf16.mxu0 %v7995_v59 }
 0x603   : > { %7603 = vmatpush3.bf16.msra.mxu0 %v7995_v59 }
 0x606   : > { %7573 = vmatmul.mubr.msk.bf16.gmra.mrb[72].mxu0 %vm557_vm4, %v12267_v0 }
 0x607   : > { %7576 = vmatprep.mubr.msk.bf16.mxu0 %vm557_vm4, %v12268_v30 }
 0x60e   : > { %7577 = vmatmul.mubr.msk.bf16.gmra.mrb[76].mxu0 %vm557_vm4, %v12269_v11 }
 0x60f   : > { %7580 = vmatprep.mubr.msk.bf16.mxu0 %vm557_vm4, %v10617_v42  ;;  %v12282_v42 = vpack.c.bf16 %v12280_v48, %v12281_v6 }
 0x616   : > { %7581 = vmatmul.mubr.msk.bf16.gmra.mrb[80].mxu0 %vm557_vm4, %v12270_v23 }
 0x617   : > { %7584 = vmatprep.mubr.msk.bf16.mxu0 %vm557_vm4, %v12271_v52 }
 0x61e   : > { %7585 = vmatmul.mubr.msk.bf16.gmra.mrb[84].mxu0 %vm557_vm4, %v12273_v44 }
 0x61f   : > { %7588 = vmatprep.mubr.msk.bf16.mxu0 %vm557_vm4, %v10753_v57  ;;  %v12285_v57 = vpack.c.bf16 %v12283_v19, %v12284_v7 }
 0x626   : > { %7589 = vmatmul.mubr.msk.bf16.gmra.mrb[88].mxu0 %vm557_vm4, %v12276_v1 }
 0x627   : > { %7592 = vmatprep.mubr.msk.bf16.mxu0 %vm557_vm4, %v4351_v10  ;;  %v12287_v10 = vld [vmem:[#allocation23_spill] sm:$0xff] }
 0x62e   : > { %7593 = vmatmul.mubr.msk.bf16.gmra.mrb[92].mxu0 %vm557_vm4, %v4352_v8  ;;  %v12288_v8 = vld [vmem:[#allocation10_spill] sm:$0xff] }
 0x62f   : > { %7604 = vmatprep.mubr.msk.bf16.mxu0 %vm557_vm4, %v12279_v47  ;;  %v12289_v14 = vpack.c.bf16 %v12287_v10, %v12288_v8 }
 0x636   : > { %7605 = vmatmul.mubr.msk.bf16.vlgmr.msra.gmra.mrb[64].mxu0 %vm557_vm4, %v12282_v42 }
 0x637   : > { %7608 = vmatprep.mubr.msk.bf16.mxu0 %vm557_vm4, %v12285_v57 }
 0x63e   : > { %7609 = vmatmul.mubr.msk.bf16.gmra.mrb[68].mxu0 %vm557_vm4, %v12286_v4 }
 0x63f   : > { %7612 = vmatprep.mubr.msk.bf16.mxu0 %vm557_vm4, %v12289_v14 }
 0x646   : > { %7613 = vmatmul.mubr.msk.bf16.gmra.mrb[72].mxu0 %vm557_vm4, %v12292_v26 }
 0x647   : > { %7616 = vmatprep.mubr.msk.bf16.mxu0 %vm557_vm4, %v12295_v31 }
 0x64e   : > { %7617 = vmatmul.mubr.msk.bf16.gmra.mrb[76].mxu0 %vm557_vm4, %v10782_v38  ;;  %v11028_v38 = vld [vmem:[%s11876_s5 + $0x4] ss:$0 sm:$0xff] }
 0x64f   : > { %7620 = vmatprep.mubr.msk.bf16.mxu0 %vm557_vm4, %v4457_v13 }
 0x656   : > { %7621 = vmatmul.mubr.msk.bf16.gmra.mrb[80].mxu0 %vm557_vm4, %v4458_v27 }
 0x657   : > { %7624 = vmatprep.mubr.msk.bf16.mxu0 %vm557_vm4, %v4459_v40 }
 0x65e   : > { %7625 = vmatmul.mubr.msk.bf16.gmra.mrb[84].mxu0 %vm557_vm4, %v4460_v39 }
 0x65f   : > { %7628 = vmatprep.mubr.msk.bf16.mxu0 %vm557_vm4, %v4461_v24 }
 0x666   : > { %7629 = vmatmul.mubr.msk.bf16.gmra.mrb[88].mxu0 %vm557_vm4, %v4462_v45 }
 0x667   : > { %7632 = vmatprep.mubr.msk.bf16.mxu0 %vm557_vm4, %v4463_v18 }
 0x66e   : > { %7633 = vmatmul.mubr.msk.bf16.gmra.mrb[92].mxu0 %vm557_vm4, %v4464_v29 }
 0x709   : > { %v7606_v43 = vpop.f32.mrb[64].mxu0 }
 0x70a   : > { %v5246_v37 = vadd.f32 %v7606_v43, %v11028_v38  ;;  %v5080_v13 = vpop.f32.mrb[65].mxu0 }
 0x70b   : > { %v5244_v27 = vadd.f32 %v11028_v38, %v5080_v13  ;;  %v7607_v40 = vpop.f32.mrb[66].mxu0 }
 0x70c   : > { %v5278_v39 = vmax.f32 %v5246_v37, 0.0  ;;  %v5247_v17 = vadd.f32 %v7607_v40, %v11028_v38  ;;  %v5083_v53 = vpop.f32.mrb[67].mxu0 }
 0x70d   : > { %v5276_v62 = vmax.f32 %v5244_v27, 0.0  ;;  %v5245_v28 = vadd.f32 %v11028_v38, %v5083_v53 }
 0x70e   : > { %v5279_v61 = vmax.f32 %v5247_v17, 0.0  ;;  %v5315_v24 = vadd.f32 %v11036_v15, %v5278_v39 }
 0x70f   : > { %v5277_v58 = vmax.f32 %v5245_v28, 0.0  ;;  %v5313_v35 = vadd.f32 %v11036_v15, %v5276_v62 }
 0x710   : > { %v5316_v20 = vadd.f32 %v11036_v15, %v5279_v61 }
 0x711   : > { %v5314_v2 = vadd.f32 %v11036_v15, %v5277_v58  ;;  %v7610_v49 = vpop.f32.mrb[68].mxu0 }
 0x712   : > { %v5346_v32 = vpack.c.bf16 %v5316_v20, %v5315_v24  ;;  %v5250_v45 = vadd.f32 %v7610_v49, %v11028_v38  ;;  %v5096_v18 = vpop.f32.mrb[69].mxu0 }
 0x713   : > { %v5345_v21 = vpack.c.bf16 %v5314_v2, %v5313_v35  ;;  %v5248_v3 = vadd.f32 %v11028_v38, %v5096_v18  ;;  %v7611_v16 = vpop.f32.mrb[70].mxu0 }
 0x714   : > { %v5282_v5 = vmax.f32 %v5250_v45, 0.0  ;;  %v5251_v22 = vadd.f32 %v7611_v16, %v11028_v38  ;;  %v5099_v36 = vpop.f32.mrb[71].mxu0 }
 0x715   : > { %v5280_v29 = vmax.f32 %v5248_v3, 0.0  ;;  %v5249_v55 = vadd.f32 %v11028_v38, %v5099_v36  ;;  %7644 = vmatprep.mubr.msk.bf16.mxu1 %vm557_vm4, %v5345_v21 }
 0x716   : > { %v5283_v9 = vmax.f32 %v5251_v22, 0.0  ;;  %7645 = vmatmul.mubr.msk.bf16.vlgmr.msra.gmra.mrb[64].mxu1 %vm557_vm4, %v5346_v32  ;;  %v5319_v60 = vadd.f32 %v11036_v15, %v5282_v5 }
 0x717   : > { %v5281_v25 = vmax.f32 %v5249_v55, 0.0  ;;  %v5317_v54 = vadd.f32 %v11036_v15, %v5280_v29 }
 0x718   : > { %v5320_v59 = vadd.f32 %v11036_v15, %v5283_v9 }
 0x719   : > { %v5318_v0 = vadd.f32 %v11036_v15, %v5281_v25  ;;  %v7614_v30 = vpop.f32.mrb[72].mxu0 }
 0x71a   : > { %v5348_v11 = vpack.c.bf16 %v5320_v59, %v5319_v60  ;;  %v5254_v23 = vadd.f32 %v7614_v30, %v11028_v38  ;;  %v5112_v52 = vpop.f32.mrb[73].mxu0 }
 0x71b   : > { %v5347_v12 = vpack.c.bf16 %v5318_v0, %v5317_v54  ;;  %v5252_v44 = vadd.f32 %v11028_v38, %v5112_v52  ;;  %v7615_v51 = vpop.f32.mrb[74].mxu0 }
 0x71c   : > { %v5286_v56 = vmax.f32 %v5254_v23, 0.0  ;;  %v5255_v1 = vadd.f32 %v7615_v51, %v11028_v38  ;;  %v5115_v33 = vpop.f32.mrb[75].mxu0 }
 0x71d   : > { %v5284_v34 = vmax.f32 %v5252_v44, 0.0  ;;  %v5253_v47 = vadd.f32 %v11028_v38, %v5115_v33  ;;  %7648 = vmatprep.mubr.msk.bf16.mxu1 %vm557_vm4, %v5347_v12 }
 0x71e   : > { %v5287_v48 = vmax.f32 %v5255_v1, 0.0  ;;  %7649 = vmatmul.mubr.msk.bf16.gmra.mrb[68].mxu1 %vm557_vm4, %v5348_v11  ;;  %v5323_v42 = vadd.f32 %v11036_v15, %v5286_v56 }
 0x71f   : > { %v5285_v6 = vmax.f32 %v5253_v47, 0.0  ;;  %v5321_v7 = vadd.f32 %v11036_v15, %v5284_v34 }
 0x720   : > { %v5324_v19 = vadd.f32 %v11036_v15, %v5287_v48 }
 0x721   : > { %v5322_v57 = vadd.f32 %v11036_v15, %v5285_v6  ;;  %v7618_v4 = vpop.f32.mrb[76].mxu0 }
 0x722   : > { %v5350_v10 = vpack.c.bf16 %v5324_v19, %v5323_v42  ;;  %v5258_v8 = vadd.f32 %v7618_v4, %v11028_v38  ;;  %v5128_v14 = vpop.f32.mrb[77].mxu0 }
 0x723   : > { %v5349_v63 = vpack.c.bf16 %v5322_v57, %v5321_v7  ;;  %v5256_v46 = vadd.f32 %v11028_v38, %v5128_v14  ;;  %v7619_v26 = vpop.f32.mrb[78].mxu0 }
 0x724   : > { %v5290_v50 = vmax.f32 %v5258_v8, 0.0  ;;  %v5259_v41 = vadd.f32 %v7619_v26, %v11028_v38  ;;  %v5131_v31 = vpop.f32.mrb[79].mxu0 }
 0x725   : > { %v5288_v43 = vmax.f32 %v5256_v46, 0.0  ;;  %v5257_v37 = vadd.f32 %v11028_v38, %v5131_v31  ;;  %7652 = vmatprep.mubr.msk.bf16.mxu1 %vm557_vm4, %v5349_v63 }
 0x726   : > { %v5291_v13 = vmax.f32 %v5259_v41, 0.0  ;;  %7653 = vmatmul.mubr.msk.bf16.gmra.mrb[72].mxu1 %vm557_vm4, %v5350_v10  ;;  %v5327_v40 = vadd.f32 %v11036_v15, %v5290_v50 }
 0x727   : > { %v5289_v27 = vmax.f32 %v5257_v37, 0.0  ;;  %v5325_v17 = vadd.f32 %v11036_v15, %v5288_v43 }
 0x728   : > { %v5328_v39 = vadd.f32 %v11036_v15, %v5291_v13 }
 0x729   : > { %v5326_v53 = vadd.f32 %v11036_v15, %v5289_v27  ;;  %v7622_v62 = vpop.f32.mrb[80].mxu0 }
 0x72a   : > { %v5352_v28 = vpack.c.bf16 %v5328_v39, %v5327_v40  ;;  %v5262_v61 = vadd.f32 %v7622_v62, %v11028_v38  ;;  %v5144_v58 = vpop.f32.mrb[81].mxu0 }
 0x72b   : > { %v5351_v24 = vpack.c.bf16 %v5326_v53, %v5325_v17  ;;  %v5260_v20 = vadd.f32 %v11028_v38, %v5144_v58  ;;  %v7623_v35 = vpop.f32.mrb[82].mxu0 }
 0x72c   : > { %v5294_v2 = vmax.f32 %v5262_v61, 0.0  ;;  %v5263_v49 = vadd.f32 %v7623_v35, %v11028_v38  ;;  %v5147_v32 = vpop.f32.mrb[83].mxu0 }
 0x72d   : > { %v5292_v45 = vmax.f32 %v5260_v20, 0.0  ;;  %v5261_v18 = vadd.f32 %v11028_v38, %v5147_v32  ;;  %7656 = vmatprep.mubr.msk.bf16.mxu1 %vm557_vm4, %v5351_v24 }
 0x72e   : > { %v5295_v21 = vmax.f32 %v5263_v49, 0.0  ;;  %7657 = vmatmul.mubr.msk.bf16.gmra.mrb[76].mxu1 %vm557_vm4, %v5352_v28  ;;  %v5331_v16 = vadd.f32 %v11036_v15, %v5294_v2 }
 0x72f   : > { %v5293_v3 = vmax.f32 %v5261_v18, 0.0  ;;  %v5329_v22 = vadd.f32 %v11036_v15, %v5292_v45 }
 0x730   : > { %v5332_v5 = vadd.f32 %v11036_v15, %v5295_v21 }
 0x731   : > { %v5330_v36 = vadd.f32 %v11036_v15, %v5293_v3  ;;  %v7626_v29 = vpop.f32.mrb[84].mxu0 }
 0x732   : > { %v5354_v55 = vpack.c.bf16 %v5332_v5, %v5331_v16  ;;  %v5266_v9 = vadd.f32 %v7626_v29, %v11028_v38  ;;  %v5160_v25 = vpop.f32.mrb[85].mxu0 }
 0x733   : > { %v5353_v60 = vpack.c.bf16 %v5330_v36, %v5329_v22  ;;  %v5264_v59 = vadd.f32 %v11028_v38, %v5160_v25  ;;  %v7627_v54 = vpop.f32.mrb[86].mxu0 }
 0x734   : > { %v5298_v0 = vmax.f32 %v5266_v9, 0.0  ;;  %v5267_v30 = vadd.f32 %v7627_v54, %v11028_v38  ;;  %v5163_v11 = vpop.f32.mrb[87].mxu0 }
 0x735   : > { %v5296_v23 = vmax.f32 %v5264_v59, 0.0  ;;  %v5265_v52 = vadd.f32 %v11028_v38, %v5163_v11  ;;  %7660 = vmatprep.mubr.msk.bf16.mxu1 %vm557_vm4, %v5353_v60 }
 0x736   : > { %v5299_v12 = vmax.f32 %v5267_v30, 0.0  ;;  %7661 = vmatmul.mubr.msk.bf16.gmra.mrb[80].mxu1 %vm557_vm4, %v5354_v55  ;;  %v5335_v51 = vadd.f32 %v11036_v15, %v5298_v0 }
 0x737   : > { %v5297_v44 = vmax.f32 %v5265_v52, 0.0  ;;  %v5333_v1 = vadd.f32 %v11036_v15, %v5296_v23 }
 0x738   : > { %v5336_v56 = vadd.f32 %v11036_v15, %v5299_v12 }
 0x739   : > { %v5334_v33 = vadd.f32 %v11036_v15, %v5297_v44  ;;  %v7630_v34 = vpop.f32.mrb[88].mxu0 }
 0x73a   : > { %v5356_v47 = vpack.c.bf16 %v5336_v56, %v5335_v51  ;;  %v5270_v48 = vadd.f32 %v7630_v34, %v11028_v38  ;;  %v5176_v6 = vpop.f32.mrb[89].mxu0 }
 0x73b   : > { %v5355_v42 = vpack.c.bf16 %v5334_v33, %v5333_v1  ;;  %v5268_v19 = vadd.f32 %v11028_v38, %v5176_v6  ;;  %v7631_v7 = vpop.f32.mrb[90].mxu0 }
 0x73c   : > { %v5302_v57 = vmax.f32 %v5270_v48, 0.0  ;;  %v5271_v4 = vadd.f32 %v7631_v7, %v11028_v38  ;;  %v5179_v10 = vpop.f32.mrb[91].mxu0 }
 0x73d   : > { %v5300_v8 = vmax.f32 %v5268_v19, 0.0  ;;  %v5269_v14 = vadd.f32 %v11028_v38, %v5179_v10  ;;  %7664 = vmatprep.mubr.msk.bf16.mxu1 %vm557_vm4, %v5355_v42 }
 0x73e   : > { %v5303_v63 = vmax.f32 %v5271_v4, 0.0  ;;  %7665 = vmatmul.mubr.msk.bf16.gmra.mrb[84].mxu1 %vm557_vm4, %v5356_v47  ;;  %v5339_v26 = vadd.f32 %v11036_v15, %v5302_v57 }
 0x73f   : > { %v5301_v46 = vmax.f32 %v5269_v14, 0.0  ;;  %v5337_v41 = vadd.f32 %v11036_v15, %v5300_v8 }
 0x740   : > { %v5340_v50 = vadd.f32 %v11036_v15, %v5303_v63 }
 0x741   : > { %v5338_v31 = vadd.f32 %v11036_v15, %v5301_v46  ;;  %v7634_v43 = vpop.f32.mrb[92].mxu0 }
 0x742   : > { %v5358_v37 = vpack.c.bf16 %v5340_v50, %v5339_v26  ;;  %v5274_v13 = vadd.f32 %v7634_v43, %v11028_v38  ;;  %v5192_v27 = vpop.f32.mrb[93].mxu0 }
 0x743   : > { %v5357_v40 = vpack.c.bf16 %v5338_v31, %v5337_v41  ;;  %v5272_v39 = vadd.f32 %v11028_v38, %v5192_v27  ;;  %v7635_v17 = vpop.f32.mrb[94].mxu0 }
 0x744   : > { %v5306_v53 = vmax.f32 %v5274_v13, 0.0  ;;  %v5275_v62 = vadd.f32 %v7635_v17, %v11028_v38  ;;  %v5195_v28 = vpop.f32.mrb[95].mxu0 }
 0x745   : > { %v5304_v61 = vmax.f32 %v5272_v39, 0.0  ;;  %v5273_v58 = vadd.f32 %v11028_v38, %v5195_v28  ;;  %7668 = vmatprep.mubr.msk.bf16.mxu1 %vm557_vm4, %v5357_v40  ;;  %v11118_v38 = vld [vmem:[%s11876_s5 + $0x9] ss:$0 sm:$0xff] }
 0x746   : > { %v5307_v24 = vmax.f32 %v5275_v62, 0.0  ;;  %7669 = vmatmul.mubr.msk.bf16.gmra.mrb[88].mxu1 %vm557_vm4, %v5358_v37  ;;  %v5343_v35 = vadd.f32 %v11036_v15, %v5306_v53 }
 0x747   : > { %v5305_v20 = vmax.f32 %v5273_v58, 0.0  ;;  %v5341_v49 = vadd.f32 %v11036_v15, %v5304_v61 }
 0x748   : > { %v5344_v2 = vadd.f32 %v11036_v15, %v5307_v24 }
 0x749   : > { %v5342_v32 = vadd.f32 %v11036_v15, %v5305_v20 }
 0x74a   : > { %v5360_v45 = vpack.c.bf16 %v5344_v2, %v5343_v35 }
 0x74b   : > { %v5359_v18 = vpack.c.bf16 %v5342_v32, %v5341_v49 }
 0x74d   : > { %7672 = vmatprep.mubr.msk.bf16.mxu1 %vm557_vm4, %v5359_v18 }
 0x74e   : > { %7673 = vmatmul.mubr.msk.bf16.gmra.mrb[92].mxu1 %vm557_vm4, %v5360_v45 }
 0x7e9   : > { %v7646_v21 = vpop.f32.mrb[64].mxu1 }
 0x7ea   : > { %v11121_v3 = vadd.f32 %v7646_v21, %v11118_v38  ;;  %v5480_v16 = vpop.f32.mrb[65].mxu1 }
 0x7eb   : > { %v7647_v5 = vpop.f32.mrb[66].mxu1  ;;  %v11124_v15 = vadd.f32 %v11118_v38, %v5480_v16 }
 0x7ec   : > { %v5483_v22 = vpop.f32.mrb[67].mxu1  ;;  %v5614_v36 = vsel %vm5607_vm13, %v11121_v3, -inf  ;;  %v11134_v9 = vadd.f32 %v7647_v5, %v11118_v38 }
 0x7ed   : > { %v11129_v29 = vadd.f32 %v11118_v38, %v5483_v22  ;;  %5615 = vmax.xlane.f32.xlu0 %v5614_v36  ;;  %v5608_v25 = vsel %vm5607_vm13, %v11124_v15, -inf }
 0x7ee   : > { %v5617_v52 = vsel %vm5607_vm13, %v11134_v9, -inf }
 0x7ef   : > { %v5611_v55 = vsel %vm5607_vm13, %v11129_v29, -inf }
 0x7f0   : > { %5612 = vmax.xlane.f32.xlu1 %v5611_v55 }
 0x7f1   : > { %5609 = vmax.xlane.f32.xlu0 %v5608_v25  ;;  %v7650_v60 = vpop.f32.mrb[68].mxu1 }
 0x7f2   : > { %v11139_v59 = vadd.f32 %v7650_v60, %v11118_v38  ;;  %v5496_v54 = vpop.f32.mrb[69].mxu1 }
 0x7f3   : > { %v7651_v0 = vpop.f32.mrb[70].mxu1  ;;  %v11142_v30 = vadd.f32 %v11118_v38, %v5496_v54 }
 0x7f4   : > { %v11145_v11 = vadd.f32 %v7651_v0, %v11118_v38  ;;  %v5499_v23 = vpop.f32.mrb[71].mxu1  ;;  %v5626_v12 = vsel %vm5607_vm13, %v11139_v59, -inf }
 0x7f5   : > { %5618 = vmax.xlane.f32.xlu0 %v5617_v52  ;;  %5627 = vmax.xlane.f32.xlu1 %v5626_v12  ;;  %v11152_v44 = vadd.f32 %v11118_v38, %v5499_v23  ;;  %v5620_v56 = vsel %vm5607_vm13, %v11142_v30, -inf }
 0x7f6   : > { %v5629_v51 = vsel %vm5607_vm13, %v11145_v11, -inf }
 0x7f7   : > { %v5623_v19 = vsel %vm5607_vm13, %v11152_v44, -inf }
 0x7f9   : > { %5630 = vmax.xlane.f32.xlu0 %v5629_v51  ;;  %5621 = vmax.xlane.f32.xlu1 %v5620_v56  ;;  %v7654_v1 = vpop.f32.mrb[72].mxu1 }
 0x7fa   : > { %v11159_v33 = vadd.f32 %v7654_v1, %v11118_v38  ;;  %v5512_v34 = vpop.f32.mrb[73].mxu1 }
 0x7fb   : > { %v7655_v47 = vpop.f32.mrb[74].mxu1  ;;  %v11162_v48 = vadd.f32 %v11118_v38, %v5512_v34 }
 0x7fc   : > { %v11165_v6 = vadd.f32 %v7655_v47, %v11118_v38  ;;  %v5515_v42 = vpop.f32.mrb[75].mxu1  ;;  %v5638_v7 = vsel %vm5607_vm13, %v11159_v33, -inf }
 0x7fd   : > { %5624 = vmax.xlane.f32.xlu0 %v5623_v19  ;;  %5639 = vmax.xlane.f32.xlu1 %v5638_v7  ;;  %v11172_v57 = vadd.f32 %v11118_v38, %v5515_v42  ;;  %v5632_v10 = vsel %vm5607_vm13, %v11162_v48, -inf }
 0x7fe   : > { %v5641_v4 = vsel %vm5607_vm13, %v11165_v6, -inf }
 0x7ff   : > { %v5635_v31 = vsel %vm5607_vm13, %v11172_v57, -inf }
 0x801   : > { %5642 = vmax.xlane.f32.xlu0 %v5641_v4  ;;  %5633 = vmax.xlane.f32.xlu1 %v5632_v10  ;;  %v7658_v8 = vpop.f32.mrb[76].mxu1 }
 0x802   : > { %v11179_v14 = vadd.f32 %v7658_v8, %v11118_v38  ;;  %v5528_v63 = vpop.f32.mrb[77].mxu1 }
 0x803   : > { %v7659_v46 = vpop.f32.mrb[78].mxu1  ;;  %v11182_v26 = vadd.f32 %v11118_v38, %v5528_v63 }
 0x804   : > { %v11185_v50 = vadd.f32 %v7659_v46, %v11118_v38  ;;  %v5531_v41 = vpop.f32.mrb[79].mxu1  ;;  %v5650_v43 = vsel %vm5607_vm13, %v11179_v14, -inf }
 0x805   : > { %5636 = vmax.xlane.f32.xlu0 %v5635_v31  ;;  %5651 = vmax.xlane.f32.xlu1 %v5650_v43  ;;  %v11192_v37 = vadd.f32 %v11118_v38, %v5531_v41  ;;  %v5644_v27 = vsel %vm5607_vm13, %v11182_v26, -inf }
 0x806   : > { %v5653_v13 = vsel %vm5607_vm13, %v11185_v50, -inf }
 0x807   : > { %v5647_v58 = vsel %vm5607_vm13, %v11192_v37, -inf }
 0x809   : > { %5654 = vmax.xlane.f32.xlu0 %v5653_v13  ;;  %5645 = vmax.xlane.f32.xlu1 %v5644_v27  ;;  %v7662_v40 = vpop.f32.mrb[80].mxu1 }
 0x80a   : > { %v11199_v39 = vadd.f32 %v7662_v40, %v11118_v38  ;;  %v5544_v17 = vpop.f32.mrb[81].mxu1 }
 0x80b   : > { %v7663_v53 = vpop.f32.mrb[82].mxu1  ;;  %v11202_v62 = vadd.f32 %v11118_v38, %v5544_v17 }
 0x80c   : > { %v11205_v28 = vadd.f32 %v7663_v53, %v11118_v38  ;;  %v5547_v61 = vpop.f32.mrb[83].mxu1  ;;  %v5662_v24 = vsel %vm5607_vm13, %v11199_v39, -inf }
 0x80d   : > { %5648 = vmax.xlane.f32.xlu0 %v5647_v58  ;;  %5663 = vmax.xlane.f32.xlu1 %v5662_v24  ;;  %v11212_v20 = vadd.f32 %v11118_v38, %v5547_v61  ;;  %v5656_v2 = vsel %vm5607_vm13, %v11202_v62, -inf }
 0x80e   : > { %v5665_v35 = vsel %vm5607_vm13, %v11205_v28, -inf }
 0x80f   : > { %v5659_v22 = vsel %vm5607_vm13, %v11212_v20, -inf }
 0x811   : > { %5666 = vmax.xlane.f32.xlu0 %v5665_v35  ;;  %5657 = vmax.xlane.f32.xlu1 %v5656_v2  ;;  %v7666_v49 = vpop.f32.mrb[84].mxu1 }
 0x812   : > { %v11219_v32 = vadd.f32 %v7666_v49, %v11118_v38  ;;  %v5560_v45 = vpop.f32.mrb[85].mxu1 }
 0x813   : > { %v7667_v18 = vpop.f32.mrb[86].mxu1  ;;  %v11222_v21 = vadd.f32 %v11118_v38, %v5560_v45 }
 0x814   : > { %v11225_v16 = vadd.f32 %v7667_v18, %v11118_v38  ;;  %v5563_v5 = vpop.f32.mrb[87].mxu1  ;;  %v5674_v36 = vsel %vm5607_vm13, %v11219_v32, -inf }
 0x815   : > { %5660 = vmax.xlane.f32.xlu0 %v5659_v22  ;;  %5675 = vmax.xlane.f32.xlu1 %v5674_v36  ;;  %v11232_v55 = vadd.f32 %v11118_v38, %v5563_v5  ;;  %v5668_v60 = vsel %vm5607_vm13, %v11222_v21, -inf }
 0x816   : > { %v5677_v25 = vsel %vm5607_vm13, %v11225_v16, -inf }
 0x817   : > { %v5671_v1 = vsel %vm5607_vm13, %v11232_v55, -inf }
 0x819   : > { %5678 = vmax.xlane.f32.xlu0 %v5677_v25  ;;  %5669 = vmax.xlane.f32.xlu1 %v5668_v60  ;;  %v7670_v54 = vpop.f32.mrb[88].mxu1 }
 0x81a   : > { %v11239_v0 = vadd.f32 %v7670_v54, %v11118_v38  ;;  %v5576_v23 = vpop.f32.mrb[89].mxu1 }
 0x81b   : > { %v7671_v52 = vpop.f32.mrb[90].mxu1  ;;  %v11242_v12 = vadd.f32 %v11118_v38, %v5576_v23 }
 0x81c   : > { %v11245_v51 = vadd.f32 %v7671_v52, %v11118_v38  ;;  %v5579_v56 = vpop.f32.mrb[91].mxu1  ;;  %v5686_v34 = vsel %vm5607_vm13, %v11239_v0, -inf }
 0x81d   : > { %5672 = vmax.xlane.f32.xlu0 %v5671_v1  ;;  %5687 = vmax.xlane.f32.xlu1 %v5686_v34  ;;  %v11252_v47 = vadd.f32 %v11118_v38, %v5579_v56  ;;  %v5680_v19 = vsel %vm5607_vm13, %v11242_v12, -inf }
 0x81e   : > { %v5689_v42 = vsel %vm5607_vm13, %v11245_v51, -inf }
 0x81f   : > { %v5683_v41 = vsel %vm5607_vm13, %v11252_v47, -inf }
 0x821   : > { %5690 = vmax.xlane.f32.xlu0 %v5689_v42  ;;  %5681 = vmax.xlane.f32.xlu1 %v5680_v19  ;;  %v7674_v7 = vpop.f32.mrb[92].mxu1 }
 0x822   : > { %v5592_v4 = vpop.f32.mrb[93].mxu1  ;;  %v11267_v31 = vadd.f32 %v7674_v7, %v11118_v38 }
 0x823   : > { %v11259_v10 = vadd.f32 %v11118_v38, %v5592_v4  ;;  %v7675_v8 = vpop.f32.mrb[94].mxu1 }
 0x824   : > { %v11262_v63 = vadd.f32 %v7675_v8, %v11118_v38  ;;  %v5595_v46 = vpop.f32.mrb[95].mxu1  ;;  %v5698_v40 = vsel %vm5607_vm13, %v11267_v31, -inf }
 0x825   : > { %v11270_v43 = vadd.f32 %v11118_v38, %v5595_v46  ;;  %5684 = vmax.xlane.f32.xlu0 %v5683_v41  ;;  %v5692_v13 = vsel %vm5607_vm13, %v11259_v10, -inf  ;;  %v12296_v38 = vld [vmem:[#allocation2_spill] sm:$0xff] }
 0x826   : > { %5693 = vmax.xlane.f32.xlu1 %v5692_v13  ;;  %v5701_v17 = vsel %vm5607_vm13, %v11262_v63, -inf }
 0x827   : > { %v5695_v27 = vsel %vm5607_vm13, %v11270_v43, -inf }
 0x829   : > { %5696 = vmax.xlane.f32.xlu0 %v5695_v27 }
 0x82a   : > { %5699 = vmax.xlane.f32.xlu1 %v5698_v40 }
 0x82d   : > { %5702 = vmax.xlane.f32.xlu0 %v5701_v17 }
 0x87a   : > { %v5616_v53 = vpop.xlane.xlu0 %5615 }
 0x87b   : > { %vm5706_vm4 = vcmp.eq.f32.partialorder %v11121_v3, %v5616_v53 }
 0x87c   : > { %v5738_v61 = vsel %vm5706_vm4, %v12296_v38, 8 }
 0x87d   : > { %v11283_v58 = vsel %vm5607_vm13, %v5738_v61, 2147483647  ;;  %v5613_v24 = vpop.xlane.xlu1 %5612 }
 0x87e   : > { %vm5705_vm14 = vcmp.eq.f32.partialorder %v11129_v29, %v5613_v24  ;;  %v5610_v35 = vpop.xlane.xlu0 %5609  ;;  %v5800_v2 = vshra.s32 %v11283_v58, 16 }
 0x87f   : > { %vm5704_vm15 = vcmp.eq.f32.partialorder %v11124_v15, %v5610_v35  ;;  %v5737_v18 = vsel %vm5705_vm14, %v12296_v38, 8 }
 0x880   : > { %v5736_v49 = vsel %vm5704_vm15, %v12296_v38, 8  ;;  %v11289_v45 = vcvt.s32.f32 %v5800_v2  ;;  %v11300_v15 = vsel %vm5607_vm13, %v5737_v18, 2147483647 }
 0x881   : > { %v11293_v3 = vsel %vm5607_vm13, %v5736_v49, 2147483647  ;;  %v5785_v1 = vshra.s32 %v11300_v15, 16 }
 0x882   : > { %v5619_v5 = vpop.xlane.xlu0 %5618  ;;  %v5628_v22 = vpop.xlane.xlu1 %5627  ;;  %5803 = vmin.xlane.f32.xlu1 %v11289_v45  ;;  %v5770_v29 = vshra.s32 %v11293_v3, 16 }
 0x883   : > { %vm5707_vm0 = vcmp.eq.f32.partialorder %v11134_v9, %v5619_v5  ;;  %vm5710_vm1 = vcmp.eq.f32.partialorder %v11139_v59, %v5628_v22  ;;  %v11335_v41 = vcvt.s32.f32 %v5785_v1 }
 0x884   : > { %v5739_v36 = vsel %vm5707_vm0, %v12296_v38, 8  ;;  %v5742_v25 = vsel %vm5710_vm1, %v12296_v38, 8  ;;  %v11304_v60 = vcvt.s32.f32 %v5770_v29 }
 0x885   : > { %v11307_v54 = vsel %vm5607_vm13, %v5739_v36, 2147483647  ;;  %v11310_v23 = vsel %vm5607_vm13, %v5742_v25, 2147483647 }
 0x886   : > { %v5631_v52 = vpop.xlane.xlu0 %5630  ;;  %v5622_v56 = vpop.xlane.xlu1 %5621  ;;  %5773 = vmin.xlane.f32.xlu1 %v11304_v60  ;;  %v5815_v9 = vshra.s32 %v11307_v54, 16  ;;  %v5860_v59 = vshra.s32 %v11310_v23, 16 }
 0x887   : > { %vm5711_vm2 = vcmp.eq.f32.partialorder %v11145_v11, %v5631_v52  ;;  %vm5708_vm3 = vcmp.eq.f32.partialorder %v11142_v30, %v5622_v56 }
 0x888   : > { %v5743_v34 = vsel %vm5711_vm2, %v12296_v38, 8  ;;  %v5740_v42 = vsel %vm5708_vm3, %v12296_v38, 8  ;;  %v11320_v19 = vcvt.s32.f32 %v5815_v9  ;;  %v11322_v7 = vcvt.s32.f32 %v5860_v59 }
 0x889   : > { %v11325_v4 = vsel %vm5607_vm13, %v5743_v34, 2147483647  ;;  %v11328_v8 = vsel %vm5607_vm13, %v5740_v42, 2147483647 }
 0x88a   : > { %v5625_v46 = vpop.xlane.xlu0 %5624  ;;  %v5640_v11 = vpop.xlane.xlu1 %5639  ;;  %5818 = vmin.xlane.f32.xlu0 %v11320_v19  ;;  %5863 = vmin.xlane.f32.xlu1 %v11322_v7  ;;  %v5830_v30 = vshra.s32 %v11328_v8, 16  ;;  %v5875_v17 = vshra.s32 %v11325_v4, 16 }
 0x88b   : > { %vm5709_vm5 = vcmp.eq.f32.partialorder %v11152_v44, %v5625_v46  ;;  %vm5714_vm6 = vcmp.eq.f32.partialorder %v11159_v33, %v5640_v11 }
 0x88c   : > { %v5741_v13 = vsel %vm5709_vm5, %v12296_v38, 8  ;;  %v5746_v27 = vsel %vm5714_vm6, %v12296_v38, 8  ;;  %v11339_v40 = vcvt.s32.f32 %v5830_v30  ;;  %v11356_v18 = vcvt.s32.f32 %v5875_v17 }
 0x88d   : > { %v11343_v53 = vsel %vm5607_vm13, %v5741_v13, 2147483647  ;;  %v11346_v61 = vsel %vm5607_vm13, %v5746_v27, 2147483647 }
 0x88e   : > { %v5643_v24 = vpop.xlane.xlu0 %5642  ;;  %v5634_v44 = vpop.xlane.xlu1 %5633  ;;  %5788 = vmin.xlane.f32.xlu0 %v11335_v41  ;;  %5833 = vmin.xlane.f32.xlu1 %v11339_v40  ;;  %v5920_v33 = vshra.s32 %v11346_v61, 16  ;;  %v5845_v35 = vshra.s32 %v11343_v53, 16 }
 0x88f   : > { %vm5715_vm7 = vcmp.eq.f32.partialorder %v11165_v6, %v5643_v24  ;;  %vm5712_vm8 = vcmp.eq.f32.partialorder %v11162_v48, %v5634_v44 }
 0x890   : > { %v5747_v2 = vsel %vm5715_vm7, %v12296_v38, 8  ;;  %v5744_v49 = vsel %vm5712_vm8, %v12296_v38, 8  ;;  %v11358_v5 = vcvt.s32.f32 %v5920_v33  ;;  %v11371_v25 = vcvt.s32.f32 %v5845_v35 }
 0x891   : > { %v11361_v22 = vsel %vm5607_vm13, %v5747_v2, 2147483647  ;;  %v11364_v29 = vsel %vm5607_vm13, %v5744_v49, 2147483647 }
 0x892   : > { %v5637_v36 = vpop.xlane.xlu0 %5636  ;;  %v5652_v6 = vpop.xlane.xlu1 %5651  ;;  %5878 = vmin.xlane.f32.xlu0 %v11356_v18  ;;  %5923 = vmin.xlane.f32.xlu1 %v11358_v5  ;;  %v5890_v48 = vshra.s32 %v11364_v29, 16  ;;  %v5935_v59 = vshra.s32 %v11361_v22, 16 }
 0x893   : > { %vm5713_vm9 = vcmp.eq.f32.partialorder %v11172_v57, %v5637_v36  ;;  %vm5718_vm10 = vcmp.eq.f32.partialorder %v11179_v14, %v5652_v6 }
 0x894   : > { %v5745_v52 = vsel %vm5713_vm9, %v12296_v38, 8  ;;  %v5750_v56 = vsel %vm5718_vm10, %v12296_v38, 8  ;;  %v11375_v9 = vcvt.s32.f32 %v5890_v48  ;;  %v11392_v13 = vcvt.s32.f32 %v5935_v59 }
 0x895   : > { %v11379_v1 = vsel %vm5607_vm13, %v5745_v52, 2147483647  ;;  %v11382_v34 = vsel %vm5607_vm13, %v5750_v56, 2147483647 }
 0x896   : > { %v5655_v42 = vpop.xlane.xlu0 %5654  ;;  %v5646_v57 = vpop.xlane.xlu1 %5645  ;;  %5848 = vmin.xlane.f32.xlu0 %v11371_v25  ;;  %5893 = vmin.xlane.f32.xlu1 %v11375_v9  ;;  %v5980_v14 = vshra.s32 %v11382_v34, 16  ;;  %v5905_v46 = vshra.s32 %v11379_v1, 16 }
 0x897   : > { %vm5719_vm11 = vcmp.eq.f32.partialorder %v11185_v50, %v5655_v42  ;;  %vm5716_vm12 = vcmp.eq.f32.partialorder %v11182_v26, %v5646_v57 }
 0x898   : > { %v5751_v11 = vsel %vm5719_vm11, %v12296_v38, 8  ;;  %v5748_v30 = vsel %vm5716_vm12, %v12296_v38, 8  ;;  %v11394_v27 = vcvt.s32.f32 %v5980_v14  ;;  %v11407_v33 = vcvt.s32.f32 %v5905_v46 }
 0x899   : > { %v11397_v17 = vsel %vm5607_vm13, %v5751_v11, 2147483647  ;;  %v11400_v24 = vsel %vm5607_vm13, %v5748_v30, 2147483647 }
 0x89a   : > { %v5649_v44 = vpop.xlane.xlu0 %5648  ;;  %v5664_v50 = vpop.xlane.xlu1 %5663  ;;  %5938 = vmin.xlane.f32.xlu0 %v11392_v13  ;;  %5983 = vmin.xlane.f32.xlu1 %v11394_v27  ;;  %v5950_v26 = vshra.s32 %v11400_v24, 16  ;;  %v5995_v36 = vshra.s32 %v11397_v17, 16 }
 0x89b   : > { %vm5717_vm4 = vcmp.eq.f32.partialorder %v11192_v37, %v5649_v44  ;;  %vm5722_vm14 = vcmp.eq.f32.partialorder %v11199_v39, %v5664_v50 }
 0x89c   : > { %v5749_v35 = vsel %vm5717_vm4, %v12296_v38, 8  ;;  %v5754_v2 = vsel %vm5722_vm14, %v12296_v38, 8  ;;  %v11411_v49 = vcvt.s32.f32 %v5950_v26  ;;  %v11428_v57 = vcvt.s32.f32 %v5995_v36 }
 0x89d   : > { %v11415_v6 = vsel %vm5607_vm13, %v5749_v35, 2147483647  ;;  %v11418_v48 = vsel %vm5607_vm13, %v5754_v2, 2147483647 }
 0x89e   : > { %v5667_v52 = vpop.xlane.xlu0 %5666  ;;  %v5658_v37 = vpop.xlane.xlu1 %5657  ;;  %5908 = vmin.xlane.f32.xlu0 %v11407_v33  ;;  %5953 = vmin.xlane.f32.xlu1 %v11411_v49  ;;  %v6040_v39 = vshra.s32 %v11418_v48, 16  ;;  %v5965_v56 = vshra.s32 %v11415_v6, 16 }
 0x89f   : > { %vm5723_vm15 = vcmp.eq.f32.partialorder %v11205_v28, %v5667_v52  ;;  %vm5720_vm0 = vcmp.eq.f32.partialorder %v11202_v62, %v5658_v37 }
 0x8a0   : > { %v5755_v59 = vsel %vm5723_vm15, %v12296_v38, 8  ;;  %v5752_v42 = vsel %vm5720_vm0, %v12296_v38, 8  ;;  %v11430_v14 = vcvt.s32.f32 %v6040_v39  ;;  %v11443_v44 = vcvt.s32.f32 %v5965_v56 }
 0x8a1   : > { %v11433_v46 = vsel %vm5607_vm13, %v5755_v59, 2147483647  ;;  %v11436_v11 = vsel %vm5607_vm13, %v5752_v42, 2147483647 }
 0x8a2   : > { %v5661_v30 = vpop.xlane.xlu0 %5660  ;;  %v5676_v28 = vpop.xlane.xlu1 %5675  ;;  %5998 = vmin.xlane.f32.xlu0 %v11428_v57  ;;  %6043 = vmin.xlane.f32.xlu1 %v11430_v14  ;;  %v6010_v62 = vshra.s32 %v11436_v11, 16  ;;  %v6055_v2 = vshra.s32 %v11433_v46, 16 }
 0x8a3   : > { %vm5721_vm1 = vcmp.eq.f32.partialorder %v11212_v20, %v5661_v30  ;;  %vm5726_vm2 = vcmp.eq.f32.partialorder %v11219_v32, %v5676_v28 }
 0x8a4   : > { %v5753_v50 = vsel %vm5721_vm1, %v12296_v38, 8  ;;  %v5758_v26 = vsel %vm5726_vm2, %v12296_v38, 8  ;;  %v11447_v35 = vcvt.s32.f32 %v6010_v62  ;;  %v11464_v42 = vcvt.s32.f32 %v6055_v2 }
 0x8a5   : > { %v11451_v36 = vsel %vm5607_vm13, %v5753_v50, 2147483647  ;;  %v11454_v52 = vsel %vm5607_vm13, %v5758_v26, 2147483647 }
 0x8a6   : > { %v5679_v37 = vpop.xlane.xlu0 %5678  ;;  %v5670_v20 = vpop.xlane.xlu1 %5669  ;;  %5968 = vmin.xlane.f32.xlu0 %v11443_v44  ;;  %6013 = vmin.xlane.f32.xlu1 %v11447_v35  ;;  %v6100_v32 = vshra.s32 %v11454_v52, 16  ;;  %v6025_v39 = vshra.s32 %v11451_v36, 16 }
 0x8a7   : > { %vm5727_vm3 = vcmp.eq.f32.partialorder %v11225_v16, %v5679_v37  ;;  %vm5724_vm5 = vcmp.eq.f32.partialorder %v11222_v21, %v5670_v20 }
 0x8a8   : > { %v5759_v56 = vsel %vm5727_vm3, %v12296_v38, 8  ;;  %v5756_v59 = vsel %vm5724_vm5, %v12296_v38, 8  ;;  %v11466_v30 = vcvt.s32.f32 %v6100_v32  ;;  %v11479_v26 = vcvt.s32.f32 %v6025_v39 }
 0x8a9   : > { %v11469_v28 = vsel %vm5607_vm13, %v5759_v56, 2147483647  ;;  %v11472_v62 = vsel %vm5607_vm13, %v5756_v59, 2147483647 }
 0x8aa   : > { %12297 = vst [vmem:[#allocation18_spill] sm:$0xff] %v11466_v30  ;;  %v5673_v50 = vpop.xlane.xlu0 %5672  ;;  %v5688_v16 = vpop.xlane.xlu1 %5687  ;;  %6058 = vmin.xlane.f32.xlu0 %v11464_v42  ;;  %6103 = vmin.xlane.f32.xlu1 %v11466_v30  ;;  %v6070_v21 = vshra.s32 %v11472_v62, 16  ;;  %12298 = vst [vmem:[#allocation3_spill] sm:$0xff] %v11479_v26  ;;  %v6115_v32 = vshra.s32 %v11469_v28, 16 }
 0x8ab   : > { %vm5725_vm6 = vcmp.eq.f32.partialorder %v11232_v55, %v5673_v50  ;;  %vm5730_vm7 = vcmp.eq.f32.partialorder %v11239_v0, %v5688_v16 }
 0x8ac   : > { %v5757_v2 = vsel %vm5725_vm6, %v12296_v38, 8  ;;  %v5762_v37 = vsel %vm5730_vm7, %v12296_v38, 8  ;;  %v11483_v20 = vcvt.s32.f32 %v6070_v21  ;;  %v11500_v21 = vcvt.s32.f32 %v6115_v32 }
 0x8ad   : > { %v11487_v56 = vsel %vm5607_vm13, %v5757_v2, 2147483647  ;;  %v11490_v59 = vsel %vm5607_vm13, %v5762_v37, 2147483647 }
 0x8ae   : > { %12299 = vst [vmem:[#allocation4_spill] sm:$0xff] %v11483_v20  ;;  %v5691_v30 = vpop.xlane.xlu0 %5690  ;;  %v5682_v55 = vpop.xlane.xlu1 %5681  ;;  %6028 = vmin.xlane.f32.xlu0 %v11479_v26  ;;  %6073 = vmin.xlane.f32.xlu1 %v11483_v20  ;;  %v6160_v0 = vshra.s32 %v11490_v59, 16  ;;  %v6085_v39 = vshra.s32 %v11487_v56, 16 }
 0x8af   : > { %vm5731_vm8 = vcmp.eq.f32.partialorder %v11245_v51, %v5691_v30  ;;  %vm5728_vm9 = vcmp.eq.f32.partialorder %v11242_v12, %v5682_v55 }
 0x8b0   : > { %v5763_v50 = vsel %vm5731_vm8, %v12296_v38, 8  ;;  %v5760_v16 = vsel %vm5728_vm9, %v12296_v38, 8  ;;  %v11502_v2 = vcvt.s32.f32 %v6160_v0  ;;  %v11514_v30 = vcvt.s32.f32 %v6085_v39 }
 0x8b1   : > { %v11505_v37 = vsel %vm5607_vm13, %v5763_v50, 2147483647  ;;  %v11508_v20 = vsel %vm5607_vm13, %v5760_v16, 2147483647 }
 0x8b2   : > { %12300 = vst [vmem:[#allocation5_spill] sm:$0xff] %v11502_v2  ;;  %v5685_v26 = vpop.xlane.xlu0 %5684  ;;  %6118 = vmin.xlane.f32.xlu0 %v11500_v21  ;;  %6163 = vmin.xlane.f32.xlu1 %v11502_v2  ;;  %v6130_v12 = vshra.s32 %v11508_v20, 16  ;;  %12301 = vst [vmem:[#allocation8_spill] sm:$0xff] %v11514_v30  ;;  %v6175_v0 = vshra.s32 %v11505_v37, 16 }
 0x8b3   : > { %vm5729_vm10 = vcmp.eq.f32.partialorder %v11252_v47, %v5685_v26  ;;  %v5694_v51 = vpop.xlane.xlu1 %5693 }
 0x8b4   : > { %v5761_v32 = vsel %vm5729_vm10, %v12296_v38, 8  ;;  %vm5732_vm11 = vcmp.eq.f32.partialorder %v11259_v10, %v5694_v51  ;;  %v11518_v55 = vcvt.s32.f32 %v6130_v12  ;;  %v11534_v12 = vcvt.s32.f32 %v6175_v0 }
 0x8b5   : > { %v11522_v50 = vsel %vm5607_vm13, %v5761_v32, 2147483647  ;;  %v5764_v16 = vsel %vm5732_vm11, %v12296_v38, 8 }
 0x8b6   : > { %v11526_v2 = vsel %vm5607_vm13, %v5764_v16, 2147483647  ;;  %6088 = vmin.xlane.f32.xlu0 %v11514_v30  ;;  %v5697_v47 = vpop.xlane.xlu0 %5696  ;;  %6133 = vmin.xlane.f32.xlu1 %v11518_v55  ;;  %v6145_v51 = vshra.s32 %v11522_v50, 16 }
 0x8b7   : > { %vm5733_vm12 = vcmp.eq.f32.partialorder %v11270_v43, %v5697_v47  ;;  %v5700_v10 = vpop.xlane.xlu1 %5699  ;;  %v6190_v26 = vshra.s32 %v11526_v2, 16 }
 0x8b8   : > { %v5765_v39 = vsel %vm5733_vm12, %v12296_v38, 8  ;;  %vm5734_vm4 = vcmp.eq.f32.partialorder %v11267_v31, %v5700_v10  ;;  %v11551_v10 = vcvt.s32.f32 %v6145_v51  ;;  %v5799_v51 = vand.u32 65535, %v11283_v58 }
 0x8b9   : > { %v11538_v32 = vsel %vm5607_vm13, %v5765_v39, 2147483647  ;;  %v5766_v16 = vsel %vm5734_vm4, %v12296_v38, 8  ;;  %v11541_v30 = vcvt.s32.f32 %v6190_v26 }
 0x8ba   : > { %12302 = vst [vmem:[#allocation7_spill] sm:$0xff] %v11538_v32  ;;  %v11544_v43 = vsel %vm5607_vm13, %v5766_v16, 2147483647  ;;  %6178 = vmin.xlane.f32.xlu0 %v11534_v12  ;;  %v5703_v47 = vpop.xlane.xlu0 %5702  ;;  %v6205_v39 = vshra.s32 %v11538_v32, 16  ;;  %v5769_v32 = vand.u32 65535, %v11293_v3  ;;  %v5829_v3 = vand.u32 65535, %v11328_v8 }
 0x8bb   : > { %vm5735_vm14 = vcmp.eq.f32.partialorder %v11262_v63, %v5703_v47  ;;  %6193 = vmin.xlane.f32.xlu1 %v11541_v30  ;;  %v6220_v31 = vshra.s32 %v11544_v43, 16  ;;  %v5919_v8 = vand.u32 65535, %v11346_v61  ;;  %v5889_v61 = vand.u32 65535, %v11364_v29 }
 0x8bc   : > { %v5767_v0 = vsel %vm5735_vm14, %v12296_v38, 8  ;;  %v11561_v63 = vcvt.s32.f32 %v6205_v39  ;;  %v5979_v29 = vand.u32 65535, %v11382_v34  ;;  %v5949_v34 = vand.u32 65535, %v11400_v24 }
 0x8bd   : > { %v11555_v26 = vsel %vm5607_vm13, %v5767_v0, 2147483647  ;;  %v11557_v16 = vcvt.s32.f32 %v6220_v31  ;;  %v5801_v31 = vcvt.s32.f32 %v5799_v51  ;;  %v5784_v51 = vand.u32 65535, %v11300_v15 }
 0x8be   : > { %12303 = vst [vmem:[#allocation16_spill] sm:$0xff] %v11555_v26  ;;  %6148 = vmin.xlane.f32.xlu0 %v11551_v10  ;;  %12305 = vst [vmem:[#allocation15_spill] sm:$0xff] %v11561_v63  ;;  %v6235_v47 = vshra.s32 %v11555_v26, 16  ;;  %v5814_v26 = vand.u32 65535, %v11307_v54  ;;  %v5874_v15 = vand.u32 65535, %v11325_v4  ;;  %v5844_v4 = vand.u32 65535, %v11343_v53 }
 0x8bf   : > { %12304 = vst [vmem:[#allocation17_spill] sm:$0xff] %v11557_v16  ;;  %6223 = vmin.xlane.f32.xlu1 %v11557_v16  ;;  %v5771_v16 = vcvt.s32.f32 %v5769_v32  ;;  %v5934_v53 = vand.u32 65535, %v11361_v22  ;;  %v5904_v22 = vand.u32 65535, %v11379_v1  ;;  %v5994_v1 = vand.u32 65535, %v11397_v17 }
 0x8c0   : > { %v11565_v38 = vcvt.s32.f32 %v6235_v47  ;;  %v6039_v24 = vand.u32 65535, %v11418_v48  ;;  %v5964_v17 = vand.u32 65535, %v11415_v6  ;;  %v6009_v48 = vand.u32 65535, %v11436_v11 }
 0x8c1   : > { %v6054_v6 = vand.u32 65535, %v11433_v46  ;;  %v6099_v11 = vand.u32 65535, %v11454_v52  ;;  %v6024_v46 = vand.u32 65535, %v11451_v36  ;;  %v6069_v52 = vand.u32 65535, %v11472_v62 }
 0x8c2   : > { %6208 = vmin.xlane.f32.xlu0 %v11561_v63  ;;  %12306 = vst [vmem:[#allocation19_spill] sm:$0xff] %v11565_v38  ;;  %v5859_v63 = vand.u32 65535, %v11310_v23  ;;  %v6114_v36 = vand.u32 65535, %v11469_v28  ;;  %v6159_v62 = vand.u32 65535, %v11490_v59  ;;  %v6084_v28 = vand.u32 65535, %v11487_v56 }
 0x8c3   : > { %v6129_v59 = vand.u32 65535, %v11508_v20  ;;  %v6174_v56 = vand.u32 65535, %v11505_v37  ;;  %v6144_v37 = vand.u32 65535, %v11522_v50 }
 0x8c4   : > { %v5861_v54 = vcvt.s32.f32 %v5859_v63  ;;  %v5831_v63 = vcvt.s32.f32 %v5829_v3  ;;  %v5921_v3 = vcvt.s32.f32 %v5919_v8 }
 0x8c6   : > { %6238 = vmin.xlane.f32.xlu0 %v11565_v38 }
 0x90f   : > { %v11569_v0 = vpop.xlane.xlu1 %5803 }
 0x910   : > { %vm5805_vm13 = vcmp.eq.f32.partialorder %v11289_v45, %v11569_v0 }
 0x911   : > { %v5806_v39 = vsel %vm5805_vm13, %v5801_v31, inf  ;;  %v5816_v31 = vcvt.s32.f32 %v5814_v26  ;;  %v5786_v26 = vcvt.s32.f32 %v5784_v51  ;;  %v5876_v51 = vcvt.s32.f32 %v5874_v15 }
 0x912   : > { %5807 = vmin.xlane.f32.xlu1 %v5806_v39 }
 0x913   : > { %v11576_v47 = vpop.xlane.xlu1 %5773 }
 0x914   : > { %vm5775_vm15 = vcmp.eq.f32.partialorder %v11304_v60, %v11576_v47 }
 0x915   : > { %v5776_v58 = vsel %vm5775_vm15, %v5771_v16, inf }
 0x916   : > { %5777 = vmin.xlane.f32.xlu1 %v5776_v58 }
 0x917   : > { %v11582_v38 = vpop.xlane.xlu0 %5818  ;;  %v11584_v45 = vpop.xlane.xlu1 %5863 }
 0x918   : > { %vm5820_vm0 = vcmp.eq.f32.partialorder %v11320_v19, %v11582_v38  ;;  %vm5865_vm1 = vcmp.eq.f32.partialorder %v11322_v7, %v11584_v45 }
 0x919   : > { %v5821_v23 = vsel %vm5820_vm0, %v5816_v31, inf  ;;  %v5866_v60 = vsel %vm5865_vm1, %v5861_v54, inf }
 0x91a   : > { %5822 = vmin.xlane.f32.xlu0 %v5821_v23  ;;  %5867 = vmin.xlane.f32.xlu1 %v5866_v60  ;;  %v5846_v23 = vcvt.s32.f32 %v5844_v4  ;;  %v5891_v60 = vcvt.s32.f32 %v5889_v61  ;;  %v5906_v4 = vcvt.s32.f32 %v5904_v22  ;;  %v5951_v61 = vcvt.s32.f32 %v5949_v34 }
 0x91b   : > { %v11592_v32 = vpop.xlane.xlu0 %5788  ;;  %v11594_v16 = vpop.xlane.xlu1 %5833  ;;  %v6056_v22 = vcvt.s32.f32 %v6054_v6  ;;  %v6101_v34 = vcvt.s32.f32 %v6099_v11  ;;  %v6086_v6 = vcvt.s32.f32 %v6084_v28  ;;  %v6131_v11 = vcvt.s32.f32 %v6129_v59  ;;  %v12316_v59 = vld [vmem:[#allocation19_spill] sm:$0xff] }
 0x91c   : > { %vm5790_vm2 = vcmp.eq.f32.partialorder %v11335_v41, %v11592_v32  ;;  %vm5835_vm3 = vcmp.eq.f32.partialorder %v11339_v40, %v11594_v16 }
 0x91d   : > { %v5791_v19 = vsel %vm5790_vm2, %v5786_v26, inf  ;;  %v5836_v7 = vsel %vm5835_vm3, %v5831_v63, inf  ;;  %v5936_v26 = vcvt.s32.f32 %v5934_v53  ;;  %v5981_v63 = vcvt.s32.f32 %v5979_v29 }
 0x91e   : > { %5792 = vmin.xlane.f32.xlu0 %v5791_v19  ;;  %5837 = vmin.xlane.f32.xlu1 %v5836_v7 }
 0x91f   : > { %v11602_v39 = vpop.xlane.xlu0 %5878  ;;  %v11604_v58 = vpop.xlane.xlu1 %5923 }
 0x920   : > { %vm5880_vm5 = vcmp.eq.f32.partialorder %v11356_v18, %v11602_v39  ;;  %vm5925_vm6 = vcmp.eq.f32.partialorder %v11358_v5, %v11604_v58 }
 0x921   : > { %v5881_v41 = vsel %vm5880_vm5, %v5876_v51, inf  ;;  %v5926_v40 = vsel %vm5925_vm6, %v5921_v3, inf }
 0x922   : > { %5882 = vmin.xlane.f32.xlu0 %v5881_v41  ;;  %5927 = vmin.xlane.f32.xlu1 %v5926_v40  ;;  %v5996_v41 = vcvt.s32.f32 %v5994_v1  ;;  %v6041_v40 = vcvt.s32.f32 %v6039_v24  ;;  %v6071_v1 = vcvt.s32.f32 %v6069_v52  ;;  %v12308_v24 = vld [vmem:[#allocation3_spill] sm:$0xff]  ;;  %v6219_v52 = vand.u32 65535, %v11544_v43 }
 0x923   : > { %v11612_v31 = vpop.xlane.xlu0 %5848  ;;  %v11614_v54 = vpop.xlane.xlu1 %5893 }
 0x924   : > { %vm5850_vm7 = vcmp.eq.f32.partialorder %v11371_v25, %v11612_v31  ;;  %vm5895_vm8 = vcmp.eq.f32.partialorder %v11375_v9, %v11614_v54 }
 0x925   : > { %v5851_v18 = vsel %vm5850_vm7, %v5846_v23, inf  ;;  %v5896_v5 = vsel %vm5895_vm8, %v5891_v60, inf  ;;  %v5966_v23 = vcvt.s32.f32 %v5964_v17  ;;  %v6011_v60 = vcvt.s32.f32 %v6009_v48 }
 0x926   : > { %5852 = vmin.xlane.f32.xlu0 %v5851_v18  ;;  %5897 = vmin.xlane.f32.xlu1 %v5896_v5  ;;  %v6116_v17 = vcvt.s32.f32 %v6114_v36  ;;  %v6161_v48 = vcvt.s32.f32 %v6159_v62  ;;  %v12313_v36 = vld [vmem:[#allocation17_spill] sm:$0xff] }
 0x927   : > { %v11622_v15 = vpop.xlane.xlu0 %5938  ;;  %v11624_v8 = vpop.xlane.xlu1 %5983 }
 0x928   : > { %vm5940_vm9 = vcmp.eq.f32.partialorder %v11392_v13, %v11622_v15  ;;  %vm5985_vm10 = vcmp.eq.f32.partialorder %v11394_v27, %v11624_v8 }
 0x929   : > { %v5941_v25 = vsel %vm5940_vm9, %v5936_v26, inf  ;;  %v5986_v9 = vsel %vm5985_vm10, %v5981_v63, inf }
 0x92a   : > { %5942 = vmin.xlane.f32.xlu0 %v5941_v25  ;;  %5987 = vmin.xlane.f32.xlu1 %v5986_v9  ;;  %v6026_v9 = vcvt.s32.f32 %v6024_v46  ;;  %v6176_v46 = vcvt.s32.f32 %v6174_v56 }
 0x92b   : > { %v11632_v19 = vpop.xlane.xlu0 %5908  ;;  %v11634_v7 = vpop.xlane.xlu1 %5953 }
 0x92c   : > { %vm5910_vm11 = vcmp.eq.f32.partialorder %v11407_v33, %v11632_v19  ;;  %vm5955_vm12 = vcmp.eq.f32.partialorder %v11411_v49, %v11634_v7 }
 0x92d   : > { %v5911_v13 = vsel %vm5910_vm11, %v5906_v4, inf  ;;  %v5956_v27 = vsel %vm5955_vm12, %v5951_v61, inf }
 0x92e   : > { %5912 = vmin.xlane.f32.xlu0 %v5911_v13  ;;  %5957 = vmin.xlane.f32.xlu1 %v5956_v27 }
 0x92f   : > { %v11642_v51 = vpop.xlane.xlu0 %5998  ;;  %v11644_v3 = vpop.xlane.xlu1 %6043 }
 0x930   : > { %vm6000_vm4 = vcmp.eq.f32.partialorder %v11428_v57, %v11642_v51  ;;  %vm6045_vm14 = vcmp.eq.f32.partialorder %v11430_v14, %v11644_v3 }
 0x931   : > { %v6001_v33 = vsel %vm6000_vm4, %v5996_v41, inf  ;;  %v6046_v49 = vsel %vm6045_vm14, %v6041_v40, inf  ;;  %v12310_v41 = vld [vmem:[#allocation5_spill] sm:$0xff] }
 0x932   : > { %6002 = vmin.xlane.f32.xlu0 %v6001_v33  ;;  %6047 = vmin.xlane.f32.xlu1 %v6046_v49 }
 0x933   : > { %v11652_v53 = vpop.xlane.xlu0 %5968  ;;  %v11654_v29 = vpop.xlane.xlu1 %6013 }
 0x934   : > { %vm5970_vm13 = vcmp.eq.f32.partialorder %v11443_v44, %v11652_v53  ;;  %vm6015_vm15 = vcmp.eq.f32.partialorder %v11447_v35, %v11654_v29  ;;  %v12307_v44 = vld [vmem:[#allocation18_spill] sm:$0xff] }
 0x935   : > { %v5971_v57 = vsel %vm5970_vm13, %v5966_v23, inf  ;;  %v6016_v14 = vsel %vm6015_vm15, %v6011_v60, inf  ;;  %v6189_v23 = vand.u32 65535, %v11526_v2  ;;  %v12311_v60 = vld [vmem:[#allocation8_spill] sm:$0xff]  ;;  %vm6312_vm13 = vcmask 7168  }
 0x936   : > { %5972 = vmin.xlane.f32.xlu0 %v5971_v57  ;;  %6017 = vmin.xlane.f32.xlu1 %v6016_v14 }
 0x937   : > { %v11662_v18 = vpop.xlane.xlu0 %6058  ;;  %v11664_v5 = vpop.xlane.xlu1 %6103 }
 0x938   : > { %vm6060_vm0 = vcmp.eq.f32.partialorder %v11464_v42, %v11662_v18  ;;  %vm6105_vm1 = vcmp.eq.f32.partialorder %v12307_v44, %v11664_v5  ;;  %v12309_v42 = vld [vmem:[#allocation4_spill] sm:$0xff]  ;;  %v12312_v44 = vld [vmem:[#allocation7_spill] sm:$0xff] }
 0x939   : > { %v6061_v35 = vsel %vm6060_vm0, %v6056_v22, inf  ;;  %v6106_v26 = vsel %vm6105_vm1, %v6101_v34, inf  ;;  %v6191_v22 = vcvt.s32.f32 %v6189_v23  ;;  %v5825_v23 = vcvt.f32.s32 %v11582_v38 }
 0x93a   : > { %6062 = vmin.xlane.f32.xlu0 %v6061_v35  ;;  %6107 = vmin.xlane.f32.xlu1 %v6106_v26  ;;  %v6204_v35 = vand.u32 65535, %v12312_v44  ;;  %v6146_v26 = vcvt.s32.f32 %v6144_v37  ;;  %v6248_v37 = vld [vmem:[%s11733_s30] sm:$0xff] }
 0x93b   : > { %v11672_v63 = vpop.xlane.xlu0 %6028  ;;  %v11674_v25 = vpop.xlane.xlu1 %6073 }
 0x93c   : > { %vm6030_vm2 = vcmp.eq.f32.partialorder %v12308_v24, %v11672_v63  ;;  %vm6075_vm3 = vcmp.eq.f32.partialorder %v12309_v42, %v11674_v25  ;;  %v6206_v42 = vcvt.s32.f32 %v6204_v35 }
 0x93d   : > { %v6031_v4 = vsel %vm6030_vm2, %v6026_v9, inf  ;;  %v6076_v61 = vsel %vm6075_vm3, %v6071_v1, inf  ;;  %v12314_v9 = vld [vmem:[#allocation16_spill] sm:$0xff] }
 0x93e   : > { %6032 = vmin.xlane.f32.xlu0 %v6031_v4  ;;  %6077 = vmin.xlane.f32.xlu1 %v6076_v61  ;;  %v6234_v1 = vand.u32 65535, %v12314_v9  ;;  %v12315_v4 = vld [vmem:[#allocation15_spill] sm:$0xff] }
 0x93f   : > { %v11682_v13 = vpop.xlane.xlu0 %6118  ;;  %v11684_v27 = vpop.xlane.xlu1 %6163 }
 0x940   : > { %vm6120_vm5 = vcmp.eq.f32.partialorder %v11500_v21, %v11682_v13  ;;  %vm6165_vm6 = vcmp.eq.f32.partialorder %v12310_v41, %v11684_v27  ;;  %v6236_v28 = vcvt.s32.f32 %v6234_v1  ;;  %v5930_v1 = vcvt.f32.s32 %v11604_v58 }
 0x941   : > { %v6121_v40 = vsel %vm6120_vm5, %v6116_v17, inf  ;;  %v6166_v33 = vsel %vm6165_vm6, %v6161_v48, inf  ;;  %v5810_v48 = vcvt.f32.s32 %v11569_v0 }
 0x942   : > { %6122 = vmin.xlane.f32.xlu0 %v6121_v40  ;;  %6167 = vmin.xlane.f32.xlu1 %v6166_v33  ;;  %v5780_v33 = vcvt.f32.s32 %v11576_v47  ;;  %v5931_v58 = vshll.u32 %v5930_v1, 16 }
 0x943   : > { %v11691_v49 = vpop.xlane.xlu0 %6088  ;;  %v11693_v20 = vpop.xlane.xlu1 %6133  ;;  %v5811_v40 = vshll.u32 %v5810_v48, 16  ;;  %v6249_v48 = vld [vmem:[%s11733_s30 + $0x8] sm:$0xff] }
 0x944   : > { %vm6090_vm7 = vcmp.eq.f32.partialorder %v12311_v60, %v11691_v49  ;;  %vm6135_vm8 = vcmp.eq.f32.partialorder %v11518_v55, %v11693_v20  ;;  %v5781_v60 = vshll.u32 %v5780_v33, 16 }
 0x945   : > { %v6091_v21 = vsel %vm6090_vm7, %v6086_v6, inf  ;;  %v6136_v57 = vsel %vm6135_vm8, %v6131_v11, inf  ;;  %v6250_v6 = vld [vmem:[%s11733_s30 + $0x10] sm:$0xff] }
 0x946   : > { %6092 = vmin.xlane.f32.xlu0 %v6091_v21  ;;  %6137 = vmin.xlane.f32.xlu1 %v6136_v57  ;;  %v5870_v21 = vcvt.f32.s32 %v11584_v45  ;;  %v6251_v45 = vld [vmem:[%s11733_s30 + $0x18] sm:$0xff] }
 0x947   : > { %v11701_v14 = vpop.xlane.xlu0 %6178 }
 0x948   : > { %vm6180_vm9 = vcmp.eq.f32.partialorder %v11534_v12, %v11701_v14  ;;  %v11706_v2 = vpop.xlane.xlu1 %6193  ;;  %v6221_v12 = vcvt.s32.f32 %v6219_v52  ;;  %v5795_v52 = vcvt.f32.s32 %v11592_v32  ;;  %v5871_v44 = vshll.u32 %v5870_v21, 16 }
 0x949   : > { %vm6195_vm10 = vcmp.eq.f32.partialorder %v11541_v30, %v11706_v2  ;;  %v6181_v55 = vsel %vm6180_vm9, %v6176_v46, inf  ;;  %v5826_v46 = vshll.u32 %v5825_v23, 16 }
 0x94a   : > { %6182 = vmin.xlane.f32.xlu0 %v6181_v55  ;;  %v6196_v34 = vsel %vm6195_vm10, %v6191_v22, inf  ;;  %v5840_v22 = vcvt.f32.s32 %v11594_v16  ;;  %v5796_v9 = vshll.u32 %v5795_v52, 16  ;;  %v5885_v16 = vcvt.f32.s32 %v11602_v39 }
 0x94b   : > { %v11711_v50 = vpop.xlane.xlu0 %6148  ;;  %6197 = vmin.xlane.f32.xlu1 %v6196_v34  ;;  %v5945_v52 = vcvt.f32.s32 %v11622_v15 }
 0x94c   : > { %vm6150_vm11 = vcmp.eq.f32.partialorder %v11551_v10, %v11711_v50  ;;  %v11715_v43 = vpop.xlane.xlu1 %6223  ;;  %v5841_v32 = vshll.u32 %v5840_v22, 16  ;;  %v5886_v33 = vshll.u32 %v5885_v16, 16  ;;  %v5990_v22 = vcvt.f32.s32 %v11624_v8 }
 0x94d   : > { %vm6225_vm12 = vcmp.eq.f32.partialorder %v12313_v36, %v11715_v43  ;;  %v6151_v62 = vsel %vm6150_vm11, %v6146_v26, inf  ;;  %v6254_v36 = vld [vmem:[%s11733_s30 + $0x30] sm:$0xff] }
 0x94e   : > { %6152 = vmin.xlane.f32.xlu0 %v6151_v62  ;;  %v6226_v30 = vsel %vm6225_vm12, %v6221_v12, inf  ;;  %v5991_v8 = vshll.u32 %v5990_v22, 16 }
 0x94f   : > { %v11720_v24 = vpop.xlane.xlu0 %6208  ;;  %6227 = vmin.xlane.f32.xlu1 %v6226_v30 }
 0x950   : > { %vm6210_vm4 = vcmp.eq.f32.partialorder %v12315_v4, %v11720_v24 }
 0x951   : > { %v6211_v10 = vsel %vm6210_vm4, %v6206_v42, inf }
 0x952   : > { %6212 = vmin.xlane.f32.xlu0 %v6211_v10 }
 0x953   : > { %v11724_v61 = vpop.xlane.xlu0 %6238 }
 0x954   : > { %vm6240_vm14 = vcmp.eq.f32.partialorder %v12316_v59, %v11724_v61 }
 0x955   : > { %v6241_v17 = vsel %vm6240_vm14, %v6236_v28, inf }
 0x956   : > { %6242 = vmin.xlane.f32.xlu0 %v6241_v17 }
 0x99f   : > { %v5808_v41 = vpop.xlane.xlu1 %5807 }
 0x9a0   : > { %v5809_v56 = vcvt.f32.s32 %v5808_v41  ;;  %v6252_v41 = vld [vmem:[%s11733_s30 + $0x20] sm:$0xff] }
 0x9a2   : > { %v5812_v11 = vadd.s32 %v5811_v40, %v5809_v56  ;;  %v5855_v56 = vcvt.f32.s32 %v11612_v31 }
 0x9a3   : > { %v5778_v0 = vpop.xlane.xlu1 %5777 }
 0x9a4   : > { %v6282_v57 = vmul.u32 %v6250_v6, %v5812_v11  ;;  %v5779_v47 = vcvt.f32.s32 %v5778_v0  ;;  %v5900_v6 = vcvt.f32.s32 %v11614_v54 }
 0x9a6   : > { %6315 = vst.msk [vmem:[%s11742_s9 + $0x10] sm:$0xff] %vm6312_vm13, %v6282_v57  ;;  %v5782_v38 = vadd.s32 %v5781_v60, %v5779_v47  ;;  %v6255_v47 = vld [vmem:[%s11733_s30 + $0x38] sm:$0xff]  ;;  %v5901_v54 = vshll.u32 %v5900_v6, 16 }
 0x9a7   : > { %v5823_v55 = vpop.xlane.xlu0 %5822  ;;  %v5868_v34 = vpop.xlane.xlu1 %5867 }
 0x9a8   : > { %v6280_v35 = vmul.u32 %v6248_v37, %v5782_v38  ;;  %v5824_v26 = vcvt.f32.s32 %v5823_v55  ;;  %v5869_v12 = vcvt.f32.s32 %v5868_v34  ;;  %v6258_v37 = vld [vmem:[%s11733_s30 + $0x50] sm:$0xff] }
 0x9aa   : > { %6313 = vst.msk [vmem:[%s11742_s9] sm:$0xff] %vm6312_vm13, %v6280_v35  ;;  %v5827_v62 = vadd.s32 %v5826_v46, %v5824_v26  ;;  %v5872_v30 = vadd.s32 %v5871_v44, %v5869_v12  ;;  %v5856_v46 = vshll.u32 %v5855_v56, 16 }
 0x9ab   : > { %v5793_v42 = vpop.xlane.xlu0 %5792  ;;  %v5838_v4 = vpop.xlane.xlu1 %5837 }
 0x9ac   : > { %v6283_v10 = vmul.u32 %v6251_v45, %v5827_v62  ;;  %v6286_v28 = vmul.u32 %v6254_v36, %v5872_v30  ;;  %v5794_v59 = vcvt.f32.s32 %v5793_v42  ;;  %v5839_v17 = vcvt.f32.s32 %v5838_v4  ;;  %v6253_v45 = vld [vmem:[%s11733_s30 + $0x28] sm:$0xff]  ;;  %v6256_v36 = vld [vmem:[%s11733_s30 + $0x40] sm:$0xff] }
 0x9ad   : > { %v5946_v30 = vshll.u32 %v5945_v52, 16 }
 0x9ae   : > { %6316 = vst.msk [vmem:[%s11742_s9 + $0x18] sm:$0xff] %vm6312_vm13, %v6283_v10  ;;  %6319 = vst.msk [vmem:[%s11742_s9 + $0x30] sm:$0xff] %vm6312_vm13, %v6286_v28  ;;  %v5797_v40 = vadd.s32 %v5796_v9, %v5794_v59  ;;  %v5842_v39 = vadd.s32 %v5841_v32, %v5839_v17  ;;  %v5915_v9 = vcvt.f32.s32 %v11632_v19  ;;  %v5960_v32 = vcvt.f32.s32 %v11634_v7  ;;  %v6259_v59 = vld [vmem:[%s11733_s30 + $0x58] sm:$0xff]  ;;  %v6262_v17 = vld [vmem:[%s11733_s30 + $0x70] sm:$0xff] }
 0x9af   : > { %v5883_v11 = vpop.xlane.xlu0 %5882  ;;  %v5928_v23 = vpop.xlane.xlu1 %5927 }
 0x9b0   : > { %v6281_v0 = vmul.u32 %v6249_v48, %v5797_v40  ;;  %v6284_v60 = vmul.u32 %v6252_v41, %v5842_v39  ;;  %v5884_v21 = vcvt.f32.s32 %v5883_v11  ;;  %v5929_v57 = vcvt.f32.s32 %v5928_v23 }
 0x9b1   : > { %v5916_v41 = vshll.u32 %v5915_v9, 16  ;;  %v5961_v7 = vshll.u32 %v5960_v32, 16  ;;  %v6005_v40 = vcvt.f32.s32 %v11642_v51  ;;  %v6050_v39 = vcvt.f32.s32 %v11644_v3  ;;  %v6261_v9 = vld [vmem:[%s11733_s30 + $0x68] sm:$0xff]  ;;  %v6264_v32 = vld [vmem:[%s11733_s30 + $0x80] sm:$0xff] }
 0x9b2   : > { %6314 = vst.msk [vmem:[%s11742_s9 + $0x8] sm:$0xff] %vm6312_vm13, %v6281_v0  ;;  %6317 = vst.msk [vmem:[%s11742_s9 + $0x20] sm:$0xff] %vm6312_vm13, %v6284_v60  ;;  %v5887_v38 = vadd.s32 %v5886_v33, %v5884_v21  ;;  %v5932_v31 = vadd.s32 %v5931_v58, %v5929_v57  ;;  %v6257_v0 = vld [vmem:[%s11733_s30 + $0x48] sm:$0xff]  ;;  %v6260_v60 = vld [vmem:[%s11733_s30 + $0x60] sm:$0xff] }
 0x9b3   : > { %v5853_v55 = vpop.xlane.xlu0 %5852  ;;  %v5898_v34 = vpop.xlane.xlu1 %5897  ;;  %v6006_v57 = vshll.u32 %v6005_v40, 16  ;;  %v6051_v3 = vshll.u32 %v6050_v39, 16 }
 0x9b4   : > { %v6287_v44 = vmul.u32 %v6255_v47, %v5887_v38  ;;  %v6290_v35 = vmul.u32 %v6258_v37, %v5932_v31  ;;  %v5854_v26 = vcvt.f32.s32 %v5853_v55  ;;  %v5899_v12 = vcvt.f32.s32 %v5898_v34  ;;  %v6263_v55 = vld [vmem:[%s11733_s30 + $0x78] sm:$0xff]  ;;  %v6266_v34 = vld [vmem:[%s11733_s30 + $0x90] sm:$0xff] }
 0x9b5   : > { %v5975_v47 = vcvt.f32.s32 %v11652_v53  ;;  %v6020_v37 = vcvt.f32.s32 %v11654_v29 }
 0x9b6   : > { %6320 = vst.msk [vmem:[%s11742_s9 + $0x38] sm:$0xff] %vm6312_vm13, %v6287_v44  ;;  %6323 = vst.msk [vmem:[%s11742_s9 + $0x50] sm:$0xff] %vm6312_vm13, %v6290_v35  ;;  %v5857_v62 = vadd.s32 %v5856_v46, %v5854_v26  ;;  %v5902_v15 = vadd.s32 %v5901_v54, %v5899_v12  ;;  %v6065_v26 = vcvt.f32.s32 %v11662_v18  ;;  %v6110_v12 = vcvt.f32.s32 %v11664_v5 }
 0x9b7   : > { %v5943_v16 = vpop.xlane.xlu0 %5942  ;;  %v5988_v1 = vpop.xlane.xlu1 %5987  ;;  %v5976_v35 = vshll.u32 %v5975_v47, 16  ;;  %v6021_v29 = vshll.u32 %v6020_v37, 16  ;;  %v6095_v47 = vcvt.f32.s32 %v11691_v49  ;;  %v6140_v37 = vcvt.f32.s32 %v11693_v20 }
 0x9b8   : > { %v6285_v42 = vmul.u32 %v6253_v45, %v5857_v62  ;;  %v6288_v4 = vmul.u32 %v6256_v36, %v5902_v15  ;;  %v5944_v10 = vcvt.f32.s32 %v5943_v16  ;;  %v5989_v28 = vcvt.f32.s32 %v5988_v1 }
 0x9b9   : > { %v6066_v1 = vshll.u32 %v6065_v26, 16  ;;  %v6111_v5 = vshll.u32 %v6110_v12, 16  ;;  %v6141_v20 = vshll.u32 %v6140_v37, 16 }
 0x9ba   : > { %6318 = vst.msk [vmem:[%s11742_s9 + $0x28] sm:$0xff] %vm6312_vm13, %v6285_v42  ;;  %6321 = vst.msk [vmem:[%s11742_s9 + $0x40] sm:$0xff] %vm6312_vm13, %v6288_v4  ;;  %v5947_v48 = vadd.s32 %v5946_v30, %v5944_v10  ;;  %v5992_v19 = vadd.s32 %v5991_v8, %v5989_v28  ;;  %v6035_v42 = vcvt.f32.s32 %v11672_v63  ;;  %v6080_v4 = vcvt.f32.s32 %v11674_v25 }
 0x9bb   : > { %v5913_v33 = vpop.xlane.xlu0 %5912  ;;  %v5958_v58 = vpop.xlane.xlu1 %5957 }
 0x9bc   : > { %v6291_v56 = vmul.u32 %v6259_v59, %v5947_v48  ;;  %v6294_v6 = vmul.u32 %v6262_v17, %v5992_v19  ;;  %v5914_v11 = vcvt.f32.s32 %v5913_v33  ;;  %v5959_v23 = vcvt.f32.s32 %v5958_v58 }
 0x9bd   : > { %v6036_v39 = vshll.u32 %v6035_v42, 16  ;;  %v6081_v25 = vshll.u32 %v6080_v4, 16  ;;  %v6125_v33 = vcvt.f32.s32 %v11682_v13  ;;  %v6170_v58 = vcvt.f32.s32 %v11684_v27 }
 0x9be   : > { %6324 = vst.msk [vmem:[%s11742_s9 + $0x58] sm:$0xff] %vm6312_vm13, %v6291_v56  ;;  %6327 = vst.msk [vmem:[%s11742_s9 + $0x70] sm:$0xff] %vm6312_vm13, %v6294_v6  ;;  %v5917_v21 = vadd.s32 %v5916_v41, %v5914_v11  ;;  %v5962_v51 = vadd.s32 %v5961_v7, %v5959_v23  ;;  %v6267_v41 = vld [vmem:[%s11733_s30 + $0x98] sm:$0xff]  ;;  %v6270_v7 = vld [vmem:[%s11733_s30 + $0xb0] sm:$0xff] }
 0x9bf   : > { %v6003_v38 = vpop.xlane.xlu0 %6002  ;;  %v6048_v31 = vpop.xlane.xlu1 %6047  ;;  %v6171_v27 = vshll.u32 %v6170_v58, 16 }
 0x9c0   : > { %v6289_v46 = vmul.u32 %v6257_v0, %v5917_v21  ;;  %v6292_v54 = vmul.u32 %v6260_v60, %v5962_v51  ;;  %v6004_v52 = vcvt.f32.s32 %v6003_v38  ;;  %v6049_v22 = vcvt.f32.s32 %v6048_v31  ;;  %v6265_v21 = vld [vmem:[%s11733_s30 + $0x88] sm:$0xff]  ;;  %v6268_v51 = vld [vmem:[%s11733_s30 + $0xa0] sm:$0xff] }
 0x9c2   : > { %6322 = vst.msk [vmem:[%s11742_s9 + $0x48] sm:$0xff] %vm6312_vm13, %v6289_v46  ;;  %6325 = vst.msk [vmem:[%s11742_s9 + $0x60] sm:$0xff] %vm6312_vm13, %v6292_v54  ;;  %v6007_v44 = vadd.s32 %v6006_v57, %v6004_v52  ;;  %v6052_v53 = vadd.s32 %v6051_v3, %v6049_v22  ;;  %v6126_v3 = vshll.u32 %v6125_v33, 16  ;;  %v6273_v33 = vld [vmem:[%s11733_s30 + $0xc8] sm:$0xff] }
 0x9c3   : > { %v5973_v45 = vpop.xlane.xlu0 %5972  ;;  %v6018_v36 = vpop.xlane.xlu1 %6017 }
 0x9c4   : > { %v6295_v62 = vmul.u32 %v6263_v55, %v6007_v44  ;;  %v6298_v15 = vmul.u32 %v6266_v34, %v6052_v53  ;;  %v5974_v30 = vcvt.f32.s32 %v5973_v45  ;;  %v6019_v8 = vcvt.f32.s32 %v6018_v36  ;;  %v6271_v55 = vld [vmem:[%s11733_s30 + $0xb8] sm:$0xff]  ;;  %v6274_v34 = vld [vmem:[%s11733_s30 + $0xd0] sm:$0xff] }
 0x9c5   : > { %v6096_v53 = vshll.u32 %v6095_v47, 16 }
 0x9c6   : > { %6328 = vst.msk [vmem:[%s11742_s9 + $0x78] sm:$0xff] %vm6312_vm13, %v6295_v62  ;;  %6331 = vst.msk [vmem:[%s11742_s9 + $0x90] sm:$0xff] %vm6312_vm13, %v6298_v15  ;;  %v5977_v16 = vadd.s32 %v5976_v35, %v5974_v30  ;;  %v6022_v18 = vadd.s32 %v6021_v29, %v6019_v8  ;;  %v6185_v35 = vcvt.f32.s32 %v11701_v14  ;;  %v6200_v15 = vcvt.f32.s32 %v11706_v2  ;;  %v6269_v30 = vld [vmem:[%s11733_s30 + $0xa8] sm:$0xff]  ;;  %v6272_v8 = vld [vmem:[%s11733_s30 + $0xc0] sm:$0xff] }
 0x9c7   : > { %v6063_v10 = vpop.xlane.xlu0 %6062  ;;  %v6108_v28 = vpop.xlane.xlu1 %6107 }
 0x9c8   : > { %v6293_v59 = vmul.u32 %v6261_v9, %v5977_v16  ;;  %v6296_v17 = vmul.u32 %v6264_v32, %v6022_v18  ;;  %v6064_v48 = vcvt.f32.s32 %v6063_v10  ;;  %v6109_v19 = vcvt.f32.s32 %v6108_v28  ;;  %v6275_v28 = vld [vmem:[%s11733_s30 + $0xd8] sm:$0xff] }
 0x9c9   : > { %v6186_v32 = vshll.u32 %v6185_v35, 16  ;;  %v6155_v18 = vcvt.f32.s32 %v11711_v50  ;;  %v6201_v4 = vshll.u32 %v6200_v15, 16  ;;  %v6230_v10 = vcvt.f32.s32 %v11715_v43 }
 0x9ca   : > { %6326 = vst.msk [vmem:[%s11742_s9 + $0x68] sm:$0xff] %vm6312_vm13, %v6293_v59  ;;  %6329 = vst.msk [vmem:[%s11742_s9 + $0x80] sm:$0xff] %vm6312_vm13, %v6296_v17  ;;  %v6067_v40 = vadd.s32 %v6066_v1, %v6064_v48  ;;  %v6112_v63 = vadd.s32 %v6111_v5, %v6109_v19  ;;  %v6276_v48 = vld [vmem:[%s11733_s30 + $0xe0] sm:$0xff] }
 0x9cb   : > { %v6033_v56 = vpop.xlane.xlu0 %6032  ;;  %v6078_v6 = vpop.xlane.xlu1 %6077 }
 0x9cc   : > { %v6299_v11 = vmul.u32 %v6267_v41, %v6067_v40  ;;  %v6302_v23 = vmul.u32 %v6270_v7, %v6112_v63  ;;  %v6034_v0 = vcvt.f32.s32 %v6033_v56  ;;  %v6079_v60 = vcvt.f32.s32 %v6078_v6  ;;  %v6278_v6 = vld [vmem:[%s11733_s30 + $0xf0] sm:$0xff] }
 0x9cd   : > { %v6156_v41 = vshll.u32 %v6155_v18, 16  ;;  %v6215_v7 = vcvt.f32.s32 %v11720_v24 }
 0x9ce   : > { %6332 = vst.msk [vmem:[%s11742_s9 + $0x98] sm:$0xff] %vm6312_vm13, %v6299_v11  ;;  %6335 = vst.msk [vmem:[%s11742_s9 + $0xb0] sm:$0xff] %vm6312_vm13, %v6302_v23  ;;  %v6037_v57 = vadd.s32 %v6036_v39, %v6034_v0  ;;  %v6082_v13 = vadd.s32 %v6081_v25, %v6079_v60  ;;  %v6231_v39 = vshll.u32 %v6230_v10, 16  ;;  %v6245_v0 = vcvt.f32.s32 %v11724_v61 }
 0x9cf   : > { %v6123_v38 = vpop.xlane.xlu0 %6122  ;;  %v6168_v31 = vpop.xlane.xlu1 %6167  ;;  %v6216_v23 = vshll.u32 %v6215_v7, 16 }
 0x9d0   : > { %v6297_v46 = vmul.u32 %v6265_v21, %v6037_v57  ;;  %v6300_v54 = vmul.u32 %v6268_v51, %v6082_v13  ;;  %v6124_v52 = vcvt.f32.s32 %v6123_v38  ;;  %v6169_v22 = vcvt.f32.s32 %v6168_v31  ;;  %v6277_v57 = vld [vmem:[%s11733_s30 + $0xe8] sm:$0xff]  ;;  %v6279_v38 = vld [vmem:[%s11733_s30 + $0xf8] sm:$0xff] }
 0x9d2   : > { %6330 = vst.msk [vmem:[%s11742_s9 + $0x88] sm:$0xff] %vm6312_vm13, %v6297_v46  ;;  %6333 = vst.msk [vmem:[%s11742_s9 + $0xa0] sm:$0xff] %vm6312_vm13, %v6300_v54  ;;  %v6127_v44 = vadd.s32 %v6126_v3, %v6124_v52  ;;  %v6172_v49 = vadd.s32 %v6171_v27, %v6169_v22  ;;  %v6246_v27 = vshll.u32 %v6245_v0, 16 }
 0x9d3   : > { %v6093_v29 = vpop.xlane.xlu0 %6092  ;;  %v6138_v26 = vpop.xlane.xlu1 %6137 }
 0x9d4   : > { %v6303_v12 = vmul.u32 %v6271_v55, %v6127_v44  ;;  %v6306_v45 = vmul.u32 %v6274_v34, %v6172_v49  ;;  %v6094_v36 = vcvt.f32.s32 %v6093_v29  ;;  %v6139_v62 = vcvt.f32.s32 %v6138_v26 }
 0x9d6   : > { %6336 = vst.msk [vmem:[%s11742_s9 + $0xb8] sm:$0xff] %vm6312_vm13, %v6303_v12  ;;  %6339 = vst.msk [vmem:[%s11742_s9 + $0xd0] sm:$0xff] %vm6312_vm13, %v6306_v45  ;;  %v6097_v9 = vadd.s32 %v6096_v53, %v6094_v36  ;;  %v6142_v14 = vadd.s32 %v6141_v20, %v6139_v62 }
 0x9d7   : > { %v6183_v16 = vpop.xlane.xlu0 %6182 }
 0x9d8   : > { %v6301_v1 = vmul.u32 %v6269_v30, %v6097_v9  ;;  %v6304_v5 = vmul.u32 %v6272_v8, %v6142_v14  ;;  %v6184_v42 = vcvt.f32.s32 %v6183_v16  ;;  %v6198_v2 = vpop.xlane.xlu1 %6197 }
 0x9d9   : > { %v6199_v59 = vcvt.f32.s32 %v6198_v2 }
 0x9da   : > { %6334 = vst.msk [vmem:[%s11742_s9 + $0xa8] sm:$0xff] %vm6312_vm13, %v6301_v1  ;;  %6337 = vst.msk [vmem:[%s11742_s9 + $0xc0] sm:$0xff] %vm6312_vm13, %v6304_v5  ;;  %v6187_v17 = vadd.s32 %v6186_v32, %v6184_v42 }
 0x9db   : > { %v6202_v50 = vadd.s32 %v6201_v4, %v6199_v59  ;;  %v6153_v19 = vpop.xlane.xlu0 %6152 }
 0x9dc   : > { %v6307_v40 = vmul.u32 %v6275_v28, %v6187_v17  ;;  %v6154_v63 = vcvt.f32.s32 %v6153_v19  ;;  %v6228_v43 = vpop.xlane.xlu1 %6227 }
 0x9dd   : > { %v6308_v25 = vmul.u32 %v6276_v48, %v6202_v50  ;;  %v6229_v58 = vcvt.f32.s32 %v6228_v43 }
 0x9de   : > { %6340 = vst.msk [vmem:[%s11742_s9 + $0xd8] sm:$0xff] %vm6312_vm13, %v6307_v40  ;;  %v6157_v56 = vadd.s32 %v6156_v41, %v6154_v63 }
 0x9df   : > { %6341 = vst.msk [vmem:[%s11742_s9 + $0xe0] sm:$0xff] %vm6312_vm13, %v6308_v25  ;;  %v6232_v11 = vadd.s32 %v6231_v39, %v6229_v58  ;;  %v6213_v24 = vpop.xlane.xlu0 %6212 }
 0x9e0   : > { %v6305_v60 = vmul.u32 %v6273_v33, %v6157_v56  ;;  %v6214_v21 = vcvt.f32.s32 %v6213_v24 }
 0x9e1   : > { %v6310_v51 = vmul.u32 %v6278_v6, %v6232_v11 }
 0x9e2   : > { %6338 = vst.msk [vmem:[%s11742_s9 + $0xc8] sm:$0xff] %vm6312_vm13, %v6305_v60  ;;  %v6217_v13 = vadd.s32 %v6216_v23, %v6214_v21 }
 0x9e3   : > { %6343 = vst.msk [vmem:[%s11742_s9 + $0xf0] sm:$0xff] %vm6312_vm13, %v6310_v51  ;;  %v6243_v3 = vpop.xlane.xlu0 %6242 }
 0x9e4   : > { %v6309_v47 = vmul.u32 %v6277_v57, %v6217_v13  ;;  %v6244_v37 = vcvt.f32.s32 %v6243_v3 }
 0x9e6   : > { %6342 = vst.msk [vmem:[%s11742_s9 + $0xe8] sm:$0xff] %vm6312_vm13, %v6309_v47  ;;  %v6247_v31 = vadd.s32 %v6246_v27, %v6244_v37 }
 0x9e8   : > { %v6311_v46 = vmul.u32 %v6279_v38, %v6247_v31 }
 0x9ea   : > { %6344 = vst.msk [vmem:[%s11742_s9 + $0xf8] sm:$0xff] %vm6312_vm13, %v6311_v46 }
 0x9eb PF: > { %s16_s21 = sadd.s32 1, %s8070_s21  }
 0x9ec   : > { %p13_p4 = scmp.ge.s32.totalorder %s16_s21, 4  }
 0x9ee   :  { %15 = sbr.rel (!%p13_p4) target bundleno = 1 (0x1), region = 88 }

</bundles_post_ra>
